<compile_context>
chip_gen: v7x
topology: tpu7x:2x2x1
jax: 0.10.0
libtpu: 0.0.40
codegen_flags: <defaults>
</compile_context>

<pallas_src>
import numpy as np
import jax
import jax.numpy as jnp
from jax import lax
from jax.experimental import pallas as pl
from jax.experimental.pallas import tpu as pltpu

# ----------------------------------------------------------------------------
# Small synthetic config (mirrors MS-2D-TAN defaults at toy sizes)
# ----------------------------------------------------------------------------
B = 2              # batch
T = 16             # input frames
V_IN = 32          # visual input feature size
C = 32             # hidden size
POOL = 2           # FrameAvgPool kernel/stride -> N0 = T // POOL clips
L = 8              # text length
TXT_IN = 32        # text input feature size
TXT_H = 32         # LSTM hidden size
NUM_SCALES = 2     # cfg.PARAMS.NUM_SCALES
NUM_MAP_LAYERS = 2 # MapConv layers per scale (3x3, stride 1, pad 1)


def _tap_boundary_masks(n):
    """(9, n*n, 1) f32 validity masks for the 9 shifted 3x3-conv taps (zero padding)."""
    ii, jj = np.meshgrid(np.arange(n), np.arange(n), indexing="ij")
    masks = []
    for kh in range(3):
        for kw in range(3):
            dh, dw = kh - 1, kw - 1
            valid = ((ii + dh >= 0) & (ii + dh < n) & (jj + dw >= 0) & (jj + dw < n))
            masks.append(valid.reshape(n * n, 1).astype(np.float32))
    return np.stack(masks)                                           # (9, n*n, 1)


# ----------------------------------------------------------------------------
# Fused per-scale Pallas kernel: prop -> fusion -> map convs -> pred (per batch)
# ----------------------------------------------------------------------------
def _scale_kernel(f_ref, maskbc_ref, tapm_ref, txt_ref, wfus_ref, bfus_ref,
                  mapw_ref, mapb_ref, predw_ref, predb_ref,
                  o_ref, map_ref):
    """One batch element, whole map resident in one flat (N^2, C) VMEM scratch.

    f_ref     : (N, C)         clip features at this scale (f32)
    maskbc_ref: (N^2, C)       map mask broadcast over channels (f32, lane-dense)
    tapm_ref  : (9, N^2, 1)    boundary-validity masks per 3x3 tap (f32)
    txt_ref   : (1, C)         encoded sentence feature (tex_linear output)
    wfus_ref  : (C, C) bf16    fusion 1x1 vis conv weight;  bfus_ref: (1, C) f32
    mapw_ref  : (NL, C, 9C)    bf16 fused 3x3 conv weights, columns [k*C:(k+1)*C] = tap k
    mapb_ref  : (NL, 1, C)     f32
    predw_ref : (1, C)  predb_ref: (1, 1)     pred 1x1 conv (f32)
    o_ref     : (1, N^2)       prediction map, flat row-major, lane-dense
    map_ref   : (N^2, C)       VMEM scratch: span / fused / conv map (in-place between layers)
    """
    N, Cc = f_ref.shape
    NN = N * N
    num_layers = mapw_ref.shape[0]

    # ---- prop module: span max over clip intervals --------------------------
    # span[i, j] = max_{t in [i, j]} f[t] (0 below the diagonal), stored row-major
    # at aligned offsets i*N into the flat map scratch.
    j_ids = lax.broadcasted_iota(jnp.int32, (N, 1), 0)
    acc = jnp.full((N, Cc), -jnp.inf, jnp.float32)
    for i in range(N - 1, -1, -1):
        acc = jnp.maximum(acc, f_ref[pl.ds(i, 1), :])                # running max over start i
        map_ref[pl.ds(i * N, N), :] = jnp.where(j_ids >= i, acc, 0.0)

    # ---- fusion module (MulNormFusion): 1x1 conv, * txt, L2-norm, * mask ----
    v = jnp.dot(map_ref[...].astype(jnp.bfloat16), wfus_ref[...],
                preferred_element_type=jnp.float32) + bfus_ref[...]  # (N^2, C)
    fu = v * txt_ref[...]
    ss = jnp.sum(fu * fu, axis=-1, keepdims=True)
    fu = fu * lax.rsqrt(ss + 1e-24)                                  # EUP rsqrt, no sqrt+div
    map_ref[...] = fu * maskbc_ref[...]

    # ---- map module: NUM_MAP_LAYERS x (3x3 conv, pad=1, ReLU) ----------------
    # Pointwise-in-channels conv => ONE (N^2,C)@(C,9C) matmul per layer, then the 9
    # channel chunks are spatially shifted (flat roll of dh*N+dw) + boundary-masked
    # and summed.  Map is updated in place (full read happens before the store).
    for l in range(num_layers):
        z = jnp.dot(map_ref[...].astype(jnp.bfloat16), mapw_ref[l],
                    preferred_element_type=jnp.float32)              # (N^2, 9C)
        y = jnp.zeros((NN, Cc), jnp.float32)
        for k in range(9):
            zk = z[:, k * Cc:(k + 1) * Cc]                           # (N^2, C) tap chunk
            s = (k // 3 - 1) * N + (k % 3 - 1)                       # flat shift dh*N+dw
            if s != 0:
                zk = pltpu.roll(zk, shift=(-s) % NN, axis=0) * tapm_ref[k]
            y = y + zk
        map_ref[...] = jnp.maximum(y + mapb_ref[l], 0.0)

    # ---- pred module: Conv2d(C, 1, 1) + bias, lane-dense (1, N^2) output -----
    hm = map_ref[...] * maskbc_ref[...]                              # masked map
    p_row = jnp.dot(predw_ref[...], hm.T,
                    preferred_element_type=jnp.float32) + predb_ref[...]
    o_ref[...] = p_row                                               # single dense store


def pallas_tan_scale(f, mask_bc, tap_masks, txt, w_fus, b_fus, map_w, map_b, pred_w, pred_b):
    """Run the fused per-scale kernel over the batch. Returns (B, 1, N*N) flat predictions."""
    Bb, N, Cc = f.shape
    NN = N * N
    NL = map_w.shape[0]
    w_fus_bf = w_fus.astype(jnp.bfloat16)
    map_w_bf = map_w.astype(jnp.bfloat16)
    pred_w_row = pred_w.reshape(1, Cc)
    return pl.pallas_call(
        _scale_kernel,
        out_shape=jax.ShapeDtypeStruct((Bb, 1, NN), jnp.float32),
        grid=(Bb,),
        in_specs=[
            pl.BlockSpec((None, N, Cc), lambda b: (b, 0, 0)),
            pl.BlockSpec((None, NN, Cc), lambda b: (b, 0, 0)),
            pl.BlockSpec((9, NN, 1), lambda b: (0, 0, 0)),
            pl.BlockSpec((None, 1, Cc), lambda b: (b, 0, 0)),
            pl.BlockSpec((Cc, Cc), lambda b: (0, 0)),
            pl.BlockSpec((1, Cc), lambda b: (0, 0)),
            pl.BlockSpec((NL, Cc, 9 * Cc), lambda b: (0, 0, 0)),
            pl.BlockSpec((NL, 1, Cc), lambda b: (0, 0, 0)),
            pl.BlockSpec((1, Cc), lambda b: (0, 0)),
            pl.BlockSpec((1, 1), lambda b: (0, 0)),
        ],
        out_specs=pl.BlockSpec((None, 1, NN), lambda b: (b, 0, 0)),
        scratch_shapes=[pltpu.VMEM((NN, Cc), jnp.float32)],
        compiler_params=pltpu.CompilerParams(
            dimension_semantics=("parallel",)),       # batch axis -> both TCs on v7x
    )(f, mask_bc, tap_masks, txt, w_fus_bf, b_fus, map_w_bf, map_b, pred_w_row, pred_b)


# ----------------------------------------------------------------------------
# Module glue (tiny ops intentionally left to XLA per perf review)
# ----------------------------------------------------------------------------
def clip_module(visual_chlast, visual_mask_bt, p):
    # FrameAvgPool: ReLU(Conv1d(k=1)) then AvgPool1d(POOL, POOL)
    # TODO(synk): (B*T,32)@(32,32) matmul left to XLA; a pallas_call is pure launch overhead here.
    Bb, Tt, _ = visual_chlast.shape
    h = jax.nn.relu(visual_chlast @ p["w_clip"] + p["b_clip"])
    vis_h = h.reshape(Bb, Tt // POOL, POOL, C).mean(axis=2)
    # TODO(synk): exact clip-mask pooling in MS-2D-TAN is cfg dependent; use max-pool semantics.
    clip_mask = visual_mask_bt.reshape(Bb, Tt // POOL, POOL).max(axis=2)
    return vis_h, clip_mask


def text_encoder(textual_input, textual_mask, p):
    """MulNormFusion text branch (shared across scales): LSTM -> last valid -> linear."""
    # TODO(synk): tiny LSTM recurrence / linears left in plain JAX (lax.scan); Pallas adds only overhead.
    Bb, Ll, _ = textual_input.shape
    H = TXT_H
    xg = textual_input @ p["w_ih"] + p["b_lstm"]                    # (B, L, 4H)

    def step(carry, xg_t):
        h, c = carry
        gates = xg_t + h @ p["w_hh"]
        i = jax.nn.sigmoid(gates[:, 0:H])
        f = jax.nn.sigmoid(gates[:, H:2 * H])
        g = jnp.tanh(gates[:, 2 * H:3 * H])
        o = jax.nn.sigmoid(gates[:, 3 * H:4 * H])
        c = f * c + i * g
        h = o * jnp.tanh(c)
        return (h, c), h

    init = (jnp.zeros((Bb, H), jnp.float32), jnp.zeros((Bb, H), jnp.float32))
    _, hs = lax.scan(step, init, jnp.swapaxes(xg, 0, 1))
    hs = jnp.swapaxes(hs, 0, 1) * textual_mask                      # (B, L, H) * (B, L, 1)
    idx = (jnp.sum(textual_mask[..., 0], axis=1) - 1).astype(jnp.int32)
    txt_last = hs[jnp.arange(Bb), idx]                              # last valid timestep
    return txt_last @ p["w_lin"] + p["b_lin"]                       # tex_linear -> (B, C)


def multiscale_tan_forward(textual_input, textual_mask, visual_input, visual_mask, p):
    # 'GROUPS' not in cfg.CLIP_MODULE.PARAMS -> clip_input = visual_input
    visual_chlast = jnp.transpose(visual_input, (0, 2, 1))          # NCW -> (B, T, V_IN)
    visual_mask_bt = visual_mask[:, 0, :]                           # (B, T)

    vis_h, clip_mask = clip_module(visual_chlast, visual_mask_bt, p)
    txt3 = text_encoder(textual_input, textual_mask, p)[:, None, :]  # (B, 1, C)

    predictions, map_masks_out = [], []
    f, m = vis_h, clip_mask
    for s in range(NUM_SCALES):
        if s > 0:
            Bb, N, Cc = f.shape
            f = f.reshape(Bb, N // 2, 2, Cc).max(axis=2)            # MaxPool1d(2, 2) between scales
            m = m.reshape(Bb, N // 2, 2).max(axis=2)
        Bb, N, Cc = f.shape
        tri = jnp.triu(jnp.ones((N, N), jnp.float32))
        map_mask = tri[None] * m[:, :, None] * m[:, None, :]        # (B, N, N)
        # Lane-dense mask layout for the kernel: (B, N^2, C), broadcast over channels by XLA.
        mask_bc = jnp.broadcast_to(map_mask.reshape(Bb, N * N, 1), (Bb, N * N, Cc))
        tap_masks = jnp.asarray(_tap_boundary_masks(N))             # (9, N^2, 1) trace-time const
        # TODO(synk): MapConv masked-weight renormalization is cfg dependent; approximated by masking.
        pred_flat = pallas_tan_scale(f, mask_bc, tap_masks, txt3,
                                     p["w_fus"], p["b_fus"],
                                     p["map_w"][s], p["map_b"][s],
                                     p["pred_w"][s], p["pred_b"][s])  # (B, 1, N^2)
        pred = pred_flat.reshape(Bb, 1, N, N) * map_mask[:, None, :, :]  # prediction * map_mask
        predictions.append(pred)                                    # NCHW (B, 1, N, N)
        map_masks_out.append(map_mask[:, None, :, :])               # NCHW (B, 1, N, N)
    assert len(predictions) == len(map_masks_out) == NUM_SCALES
    return predictions, map_masks_out


# ----------------------------------------------------------------------------
# Deterministic parameter init (synthetic; no checkpoint load)
# ----------------------------------------------------------------------------
def init_params(key):
    ks = jax.random.split(key, 16)

    def nrm(k, shape, scale=0.05):
        return (scale * jax.random.normal(k, shape)).astype(jnp.float32)

    p = {
        "w_clip": nrm(ks[0], (V_IN, C)), "b_clip": jnp.zeros((1, C), jnp.float32),
        "w_ih": nrm(ks[1], (TXT_IN, 4 * TXT_H)),
        "w_hh": nrm(ks[2], (TXT_H, 4 * TXT_H)),
        # TODO(synk): b_ih + b_hh folded into one bias (sum them at checkpoint-load time).
        "b_lstm": jnp.zeros((1, 4 * TXT_H), jnp.float32),
        "w_lin": nrm(ks[3], (TXT_H, C)), "b_lin": jnp.zeros((1, C), jnp.float32),
        "w_fus": nrm(ks[4], (C, C)), "b_fus": jnp.zeros((1, C), jnp.float32),
        "map_w": [], "map_b": [], "pred_w": [], "pred_b": [],
    }
    kidx = 5
    for _ in range(NUM_SCALES):
        layer_ws = []
        for l in range(NUM_MAP_LAYERS):
            w33 = nrm(ks[kidx + l], (3, 3, C, C))                   # (kh, kw, Cin, Cout)
            w9 = w33.reshape(9, C, C)                               # tap = kh*3 + kw
            layer_ws.append(jnp.transpose(w9, (1, 0, 2)).reshape(C, 9 * C))  # fused (C, 9C)
        kidx += NUM_MAP_LAYERS
        p["map_w"].append(jnp.stack(layer_ws))                      # (NL, C, 9C)
        p["map_b"].append(jnp.zeros((NUM_MAP_LAYERS, 1, C), jnp.float32))
        p["pred_w"].append(nrm(ks[kidx], (C, 1))); kidx += 1
        p["pred_b"].append(jnp.zeros((1, 1), jnp.float32))
    return p


if __name__ == "__main__":
    key = jax.random.PRNGKey(0)
    k_param, k_txt, k_vis = jax.random.split(key, 3)
    params = init_params(k_param)

    textual_input = jax.random.normal(k_txt, (B, L, TXT_IN), jnp.float32)   # (B, L, TXT_IN)
    visual_input = jax.random.normal(k_vis, (B, V_IN, T), jnp.float32)      # NCW (Conv1d layout)
    txt_lens = jnp.array([L, 5])
    vis_lens = jnp.array([T, 12])
    textual_mask = (jnp.arange(L)[None, :] < txt_lens[:, None]).astype(jnp.float32)[..., None]  # (B, L, 1)
    visual_mask = (jnp.arange(T)[None, :] < vis_lens[:, None]).astype(jnp.float32)[:, None, :]  # (B, 1, T)

    fwd = jax.jit(multiscale_tan_forward)
    predictions, map_masks = fwd(textual_input, textual_mask, visual_input, visual_mask, params)
    jax.block_until_ready((predictions, map_masks))

    for s, (pr, mm) in enumerate(zip(predictions, map_masks)):
        n_s = (T // POOL) // (2 ** s)
        assert pr.shape == (B, 1, n_s, n_s) and mm.shape == (B, 1, n_s, n_s)
        assert bool(jnp.all(jnp.isfinite(pr)))
    print("KERNEL_OK")
</pallas_src>

<mosaic_0001>
module attributes {stable_mosaic.version = 11 : i64} {
  func.func @_scale_kernel(%arg0: i32, %arg1: memref<1x8x32xf32, #tpu.memory_space<vmem>>, %arg2: memref<1x64x32xf32, #tpu.memory_space<vmem>>, %arg3: memref<9x64x1xf32, #tpu.memory_space<vmem>>, %arg4: memref<1x1x32xf32, #tpu.memory_space<vmem>>, %arg5: memref<32x32xbf16, #tpu.memory_space<vmem>>, %arg6: memref<1x32xf32, #tpu.memory_space<vmem>>, %arg7: memref<2x32x288xbf16, #tpu.memory_space<vmem>>, %arg8: memref<2x1x32xf32, #tpu.memory_space<vmem>>, %arg9: memref<1x32xf32, #tpu.memory_space<vmem>>, %arg10: memref<1x1xf32, #tpu.memory_space<vmem>>, %arg11: memref<1x1x64xf32, #tpu.memory_space<vmem>>, %arg12: memref<64x32xf32, #tpu.memory_space<vmem>>) attributes {dimension_semantics = [#tpu.dimension_semantics<parallel>], iteration_bounds = array<i64: 2>, scalar_prefetch = 0 : i64, scratch_operands = 1 : i64, tpu.core_type = #tpu.core_type<tc>, window_params = [{transform_indices = @transform_0, window_bounds = array<i64: 1, 8, 32>}, {transform_indices = @transform_1, window_bounds = array<i64: 1, 64, 32>}, {pipeline_mode = #tpu.pipeline_mode<synchronous>, transform_indices = @transform_2, window_bounds = array<i64: 9, 64, 1>}, {transform_indices = @transform_3, window_bounds = array<i64: 1, 1, 32>}, {pipeline_mode = #tpu.pipeline_mode<synchronous>, transform_indices = @transform_4, window_bounds = array<i64: 32, 32>}, {pipeline_mode = #tpu.pipeline_mode<synchronous>, transform_indices = @transform_5, window_bounds = array<i64: 1, 32>}, {pipeline_mode = #tpu.pipeline_mode<synchronous>, transform_indices = @transform_6, window_bounds = array<i64: 2, 32, 288>}, {pipeline_mode = #tpu.pipeline_mode<synchronous>, transform_indices = @transform_7, window_bounds = array<i64: 2, 1, 32>}, {pipeline_mode = #tpu.pipeline_mode<synchronous>, transform_indices = @transform_8, window_bounds = array<i64: 1, 32>}, {pipeline_mode = #tpu.pipeline_mode<synchronous>, transform_indices = @transform_9, window_bounds = array<i64: 1, 1>}, {transform_indices = @transform_10, window_bounds = array<i64: 1, 1, 64>}]} {
    %0 = tpu.iota {dimensions = array<i32: 0>} : vector<8x1xi32>
    %cst = arith.constant 0xFF800000 : f32
    %1 = vector.broadcast %cst : f32 to vector<8x32xf32>
    %c0 = arith.constant 0 : index
    %c7 = arith.constant 7 : index
    %c0_0 = arith.constant 0 : index
    %2 = vector.load %arg1[%c0, %c7, %c0_0] : memref<1x8x32xf32, #tpu.memory_space<vmem>>, vector<1x1x32xf32>
    %3 = vector.shape_cast %2 : vector<1x1x32xf32> to vector<1x32xf32>
    %4 = vector.broadcast %3 : vector<1x32xf32> to vector<8x32xf32>
    %5 = arith.maximumf %1, %4 : vector<8x32xf32>
    %c7_i32 = arith.constant 7 : i32
    %6 = vector.broadcast %c7_i32 : i32 to vector<8x1xi32>
    %7 = arith.cmpi sge, %0, %6 : vector<8x1xi32>
    %cst_1 = arith.constant 0.000000e+00 : f32
    %8 = vector.shape_cast %7 : vector<8x1xi1> to vector<8x1xi1>
    %9 = vector.broadcast %8 : vector<8x1xi1> to vector<8x32xi1>
    %10 = vector.broadcast %cst_1 : f32 to vector<8x32xf32>
    %11 = arith.select %9, %5, %10 : vector<8x32xi1>, vector<8x32xf32>
    %c56 = arith.constant 56 : index
    %c0_2 = arith.constant 0 : index
    %12 = vector.load %arg12[%c56, %c0_2] : memref<64x32xf32, #tpu.memory_space<vmem>>, vector<8x32xf32>
    tpu.vector_store %arg12[%c56, %c0_2], %11 {strides = array<i32>} : memref<64x32xf32, #tpu.memory_space<vmem>>, vector<8x32xf32>,
    %c0_3 = arith.constant 0 : index
    %c6 = arith.constant 6 : index
    %c0_4 = arith.constant 0 : index
    %13 = vector.load %arg1[%c0_3, %c6, %c0_4] : memref<1x8x32xf32, #tpu.memory_space<vmem>>, vector<1x1x32xf32>
    %14 = vector.shape_cast %13 : vector<1x1x32xf32> to vector<1x32xf32>
    %15 = vector.broadcast %14 : vector<1x32xf32> to vector<8x32xf32>
    %16 = arith.maximumf %5, %15 : vector<8x32xf32>
    %c6_i32 = arith.constant 6 : i32
    %17 = vector.broadcast %c6_i32 : i32 to vector<8x1xi32>
    %18 = arith.cmpi sge, %0, %17 : vector<8x1xi32>
    %cst_5 = arith.constant 0.000000e+00 : f32
    %19 = vector.shape_cast %18 : vector<8x1xi1> to vector<8x1xi1>
    %20 = vector.broadcast %19 : vector<8x1xi1> to vector<8x32xi1>
    %21 = vector.broadcast %cst_5 : f32 to vector<8x32xf32>
    %22 = arith.select %20, %16, %21 : vector<8x32xi1>, vector<8x32xf32>
    %c48 = arith.constant 48 : index
    %c0_6 = arith.constant 0 : index
    %23 = vector.load %arg12[%c48, %c0_6] : memref<64x32xf32, #tpu.memory_space<vmem>>, vector<8x32xf32>
    tpu.vector_store %arg12[%c48, %c0_6], %22 {strides = array<i32>} : memref<64x32xf32, #tpu.memory_space<vmem>>, vector<8x32xf32>,
    %c0_7 = arith.constant 0 : index
    %c5 = arith.constant 5 : index
    %c0_8 = arith.constant 0 : index
    %24 = vector.load %arg1[%c0_7, %c5, %c0_8] : memref<1x8x32xf32, #tpu.memory_space<vmem>>, vector<1x1x32xf32>
    %25 = vector.shape_cast %24 : vector<1x1x32xf32> to vector<1x32xf32>
    %26 = vector.broadcast %25 : vector<1x32xf32> to vector<8x32xf32>
    %27 = arith.maximumf %16, %26 : vector<8x32xf32>
    %c5_i32 = arith.constant 5 : i32
    %28 = vector.broadcast %c5_i32 : i32 to vector<8x1xi32>
    %29 = arith.cmpi sge, %0, %28 : vector<8x1xi32>
    %cst_9 = arith.constant 0.000000e+00 : f32
    %30 = vector.shape_cast %29 : vector<8x1xi1> to vector<8x1xi1>
    %31 = vector.broadcast %30 : vector<8x1xi1> to vector<8x32xi1>
    %32 = vector.broadcast %cst_9 : f32 to vector<8x32xf32>
    %33 = arith.select %31, %27, %32 : vector<8x32xi1>, vector<8x32xf32>
    %c40 = arith.constant 40 : index
    %c0_10 = arith.constant 0 : index
    %34 = vector.load %arg12[%c40, %c0_10] : memref<64x32xf32, #tpu.memory_space<vmem>>, vector<8x32xf32>
    tpu.vector_store %arg12[%c40, %c0_10], %33 {strides = array<i32>} : memref<64x32xf32, #tpu.memory_space<vmem>>, vector<8x32xf32>,
    %c0_11 = arith.constant 0 : index
    %c4 = arith.constant 4 : index
    %c0_12 = arith.constant 0 : index
    %35 = vector.load %arg1[%c0_11, %c4, %c0_12] : memref<1x8x32xf32, #tpu.memory_space<vmem>>, vector<1x1x32xf32>
    %36 = vector.shape_cast %35 : vector<1x1x32xf32> to vector<1x32xf32>
    %37 = vector.broadcast %36 : vector<1x32xf32> to vector<8x32xf32>
    %38 = arith.maximumf %27, %37 : vector<8x32xf32>
    %c4_i32 = arith.constant 4 : i32
    %39 = vector.broadcast %c4_i32 : i32 to vector<8x1xi32>
    %40 = arith.cmpi sge, %0, %39 : vector<8x1xi32>
    %cst_13 = arith.constant 0.000000e+00 : f32
    %41 = vector.shape_cast %40 : vector<8x1xi1> to vector<8x1xi1>
    %42 = vector.broadcast %41 : vector<8x1xi1> to vector<8x32xi1>
    %43 = vector.broadcast %cst_13 : f32 to vector<8x32xf32>
    %44 = arith.select %42, %38, %43 : vector<8x32xi1>, vector<8x32xf32>
    %c32 = arith.constant 32 : index
    %c0_14 = arith.constant 0 : index
    %45 = vector.load %arg12[%c32, %c0_14] : memref<64x32xf32, #tpu.memory_space<vmem>>, vector<8x32xf32>
    tpu.vector_store %arg12[%c32, %c0_14], %44 {strides = array<i32>} : memref<64x32xf32, #tpu.memory_space<vmem>>, vector<8x32xf32>,
    %c0_15 = arith.constant 0 : index
    %c3 = arith.constant 3 : index
    %c0_16 = arith.constant 0 : index
    %46 = vector.load %arg1[%c0_15, %c3, %c0_16] : memref<1x8x32xf32, #tpu.memory_space<vmem>>, vector<1x1x32xf32>
    %47 = vector.shape_cast %46 : vector<1x1x32xf32> to vector<1x32xf32>
    %48 = vector.broadcast %47 : vector<1x32xf32> to vector<8x32xf32>
    %49 = arith.maximumf %38, %48 : vector<8x32xf32>
    %c3_i32 = arith.constant 3 : i32
    %50 = vector.broadcast %c3_i32 : i32 to vector<8x1xi32>
    %51 = arith.cmpi sge, %0, %50 : vector<8x1xi32>
    %cst_17 = arith.constant 0.000000e+00 : f32
    %52 = vector.shape_cast %51 : vector<8x1xi1> to vector<8x1xi1>
    %53 = vector.broadcast %52 : vector<8x1xi1> to vector<8x32xi1>
    %54 = vector.broadcast %cst_17 : f32 to vector<8x32xf32>
    %55 = arith.select %53, %49, %54 : vector<8x32xi1>, vector<8x32xf32>
    %c24 = arith.constant 24 : index
    %c0_18 = arith.constant 0 : index
    %56 = vector.load %arg12[%c24, %c0_18] : memref<64x32xf32, #tpu.memory_space<vmem>>, vector<8x32xf32>
    tpu.vector_store %arg12[%c24, %c0_18], %55 {strides = array<i32>} : memref<64x32xf32, #tpu.memory_space<vmem>>, vector<8x32xf32>,
    %c0_19 = arith.constant 0 : index
    %c2 = arith.constant 2 : index
    %c0_20 = arith.constant 0 : index
    %57 = vector.load %arg1[%c0_19, %c2, %c0_20] : memref<1x8x32xf32, #tpu.memory_space<vmem>>, vector<1x1x32xf32>
    %58 = vector.shape_cast %57 : vector<1x1x32xf32> to vector<1x32xf32>
    %59 = vector.broadcast %58 : vector<1x32xf32> to vector<8x32xf32>
    %60 = arith.maximumf %49, %59 : vector<8x32xf32>
    %c2_i32 = arith.constant 2 : i32
    %61 = vector.broadcast %c2_i32 : i32 to vector<8x1xi32>
    %62 = arith.cmpi sge, %0, %61 : vector<8x1xi32>
    %cst_21 = arith.constant 0.000000e+00 : f32
    %63 = vector.shape_cast %62 : vector<8x1xi1> to vector<8x1xi1>
    %64 = vector.broadcast %63 : vector<8x1xi1> to vector<8x32xi1>
    %65 = vector.broadcast %cst_21 : f32 to vector<8x32xf32>
    %66 = arith.select %64, %60, %65 : vector<8x32xi1>, vector<8x32xf32>
    %c16 = arith.constant 16 : index
    %c0_22 = arith.constant 0 : index
    %67 = vector.load %arg12[%c16, %c0_22] : memref<64x32xf32, #tpu.memory_space<vmem>>, vector<8x32xf32>
    tpu.vector_store %arg12[%c16, %c0_22], %66 {strides = array<i32>} : memref<64x32xf32, #tpu.memory_space<vmem>>, vector<8x32xf32>,
    %c0_23 = arith.constant 0 : index
    %c1 = arith.constant 1 : index
    %c0_24 = arith.constant 0 : index
    %68 = vector.load %arg1[%c0_23, %c1, %c0_24] : memref<1x8x32xf32, #tpu.memory_space<vmem>>, vector<1x1x32xf32>
    %69 = vector.shape_cast %68 : vector<1x1x32xf32> to vector<1x32xf32>
    %70 = vector.broadcast %69 : vector<1x32xf32> to vector<8x32xf32>
    %71 = arith.maximumf %60, %70 : vector<8x32xf32>
    %c1_i32 = arith.constant 1 : i32
    %72 = vector.broadcast %c1_i32 : i32 to vector<8x1xi32>
    %73 = arith.cmpi sge, %0, %72 : vector<8x1xi32>
    %cst_25 = arith.constant 0.000000e+00 : f32
    %74 = vector.shape_cast %73 : vector<8x1xi1> to vector<8x1xi1>
    %75 = vector.broadcast %74 : vector<8x1xi1> to vector<8x32xi1>
    %76 = vector.broadcast %cst_25 : f32 to vector<8x32xf32>
    %77 = arith.select %75, %71, %76 : vector<8x32xi1>, vector<8x32xf32>
    %c8 = arith.constant 8 : index
    %c0_26 = arith.constant 0 : index
    %78 = vector.load %arg12[%c8, %c0_26] : memref<64x32xf32, #tpu.memory_space<vmem>>, vector<8x32xf32>
    tpu.vector_store %arg12[%c8, %c0_26], %77 {strides = array<i32>} : memref<64x32xf32, #tpu.memory_space<vmem>>, vector<8x32xf32>,
    %c0_27 = arith.constant 0 : index
    %c0_28 = arith.constant 0 : index
    %c0_29 = arith.constant 0 : index
    %79 = vector.load %arg1[%c0_27, %c0_28, %c0_29] : memref<1x8x32xf32, #tpu.memory_space<vmem>>, vector<1x1x32xf32>
    %80 = vector.shape_cast %79 : vector<1x1x32xf32> to vector<1x32xf32>
    %81 = vector.broadcast %80 : vector<1x32xf32> to vector<8x32xf32>
    %82 = arith.maximumf %71, %81 : vector<8x32xf32>
    %c0_i32 = arith.constant 0 : i32
    %83 = vector.broadcast %c0_i32 : i32 to vector<8x1xi32>
    %84 = arith.cmpi sge, %0, %83 : vector<8x1xi32>
    %cst_30 = arith.constant 0.000000e+00 : f32
    %85 = vector.shape_cast %84 : vector<8x1xi1> to vector<8x1xi1>
    %86 = vector.broadcast %85 : vector<8x1xi1> to vector<8x32xi1>
    %87 = vector.broadcast %cst_30 : f32 to vector<8x32xf32>
    %88 = arith.select %86, %82, %87 : vector<8x32xi1>, vector<8x32xf32>
    %c0_31 = arith.constant 0 : index
    %c0_32 = arith.constant 0 : index
    %89 = vector.load %arg12[%c0_31, %c0_32] : memref<64x32xf32, #tpu.memory_space<vmem>>, vector<8x32xf32>
    tpu.vector_store %arg12[%c0_31, %c0_32], %88 {strides = array<i32>} : memref<64x32xf32, #tpu.memory_space<vmem>>, vector<8x32xf32>,
    %c0_33 = arith.constant 0 : index
    %c0_34 = arith.constant 0 : index
    %90 = vector.load %arg12[%c0_33, %c0_34] : memref<64x32xf32, #tpu.memory_space<vmem>>, vector<64x32xf32>
    %91 = arith.truncf %90 : vector<64x32xf32> to vector<64x32xbf16>
    %c0_35 = arith.constant 0 : index
    %c0_36 = arith.constant 0 : index
    %92 = vector.load %arg5[%c0_35, %c0_36] : memref<32x32xbf16, #tpu.memory_space<vmem>>, vector<32x32xbf16>
    %cst_37 = arith.constant dense<0.000000e+00> : vector<64x32xf32>
    %93 = tpu.matmul %91, %92, %cst_37 {dimension_numbers = #tpu.dot_dimension_numbers<[1], [0], [0], [1], [0, 0, 1, 1], [], []>} : vector<64x32xbf16>, vector<32x32xbf16>, vector<64x32xf32> -> vector<64x32xf32>
    %c0_38 = arith.constant 0 : index
    %c0_39 = arith.constant 0 : index
    %94 = vector.load %arg6[%c0_38, %c0_39] : memref<1x32xf32, #tpu.memory_space<vmem>>, vector<1x32xf32>
    %95 = vector.broadcast %94 : vector<1x32xf32> to vector<64x32xf32>
    %96 = arith.addf %93, %95 : vector<64x32xf32>
    %c0_40 = arith.constant 0 : index
    %c0_41 = arith.constant 0 : index
    %c0_42 = arith.constant 0 : index
    %97 = vector.load %arg4[%c0_40, %c0_41, %c0_42] : memref<1x1x32xf32, #tpu.memory_space<vmem>>, vector<1x1x32xf32>
    %98 = vector.shape_cast %97 : vector<1x1x32xf32> to vector<1x32xf32>
    %99 = vector.broadcast %98 : vector<1x32xf32> to vector<64x32xf32>
    %100 = arith.mulf %96, %99 : vector<64x32xf32>
    %101 = arith.mulf %100, %100 : vector<64x32xf32>
    %cst_43 = arith.constant dense<0.000000e+00> : vector<64xf32>
    %102 = vector.multi_reduction <add>, %101, %cst_43 [1] : vector<64x32xf32> to vector<64xf32>
    %103 = vector.shape_cast %102 : vector<64xf32> to vector<64x1xf32>
    %cst_44 = arith.constant 1.000000e-24 : f32
    %104 = vector.broadcast %cst_44 : f32 to vector<64x1xf32>
    %105 = arith.addf %103, %104 : vector<64x1xf32>
    %106 = math.rsqrt %105 : vector<64x1xf32>
    %107 = vector.broadcast %106 : vector<64x1xf32> to vector<64x32xf32>
    %108 = arith.mulf %100, %107 : vector<64x32xf32>
    %c0_45 = arith.constant 0 : index
    %c0_46 = arith.constant 0 : index
    %c0_47 = arith.constant 0 : index
    %109 = vector.load %arg2[%c0_45, %c0_46, %c0_47] : memref<1x64x32xf32, #tpu.memory_space<vmem>>, vector<1x64x32xf32>
    %110 = vector.shape_cast %109 : vector<1x64x32xf32> to vector<64x32xf32>
    %111 = arith.mulf %108, %110 : vector<64x32xf32>
    %c0_48 = arith.constant 0 : index
    %c0_49 = arith.constant 0 : index
    %112 = vector.load %arg12[%c0_48, %c0_49] : memref<64x32xf32, #tpu.memory_space<vmem>>, vector<64x32xf32>
    tpu.vector_store %arg12[%c0_48, %c0_49], %111 {strides = array<i32>} : memref<64x32xf32, #tpu.memory_space<vmem>>, vector<64x32xf32>,
    %c0_50 = arith.constant 0 : index
    %c0_51 = arith.constant 0 : index
    %113 = vector.load %arg12[%c0_50, %c0_51] : memref<64x32xf32, #tpu.memory_space<vmem>>, vector<64x32xf32>
    %114 = arith.truncf %113 : vector<64x32xf32> to vector<64x32xbf16>
    %c0_52 = arith.constant 0 : index
    %c0_53 = arith.constant 0 : index
    %c0_54 = arith.constant 0 : index
    %115 = vector.load %arg7[%c0_52, %c0_53, %c0_54] : memref<2x32x288xbf16, #tpu.memory_space<vmem>>, vector<1x32x288xbf16>
    %116 = vector.shape_cast %115 : vector<1x32x288xbf16> to vector<32x288xbf16>
    %cst_55 = arith.constant dense<0.000000e+00> : vector<64x288xf32>
    %117 = tpu.matmul %114, %116, %cst_55 {dimension_numbers = #tpu.dot_dimension_numbers<[1], [0], [0], [1], [0, 0, 1, 1], [], []>} : vector<64x32xbf16>, vector<32x288xbf16>, vector<64x288xf32> -> vector<64x288xf32>
    %cst_56 = arith.constant 0.000000e+00 : f32
    %118 = vector.broadcast %cst_56 : f32 to vector<64x32xf32>
    %119 = vector.extract_strided_slice %117 {offsets = [0, 0], sizes = [64, 32], strides = [1, 1]} : vector<64x288xf32> to vector<64x32xf32>
    %c9_i32 = arith.constant 9 : i32
    %120 = tpu.dynamic_rotate %119 by %c9_i32 dim 0 : vector<64x32xf32>, i32 -> vector<64x32xf32>
    %c0_57 = arith.constant 0 : index
    %c0_58 = arith.constant 0 : index
    %c0_59 = arith.constant 0 : index
    %121 = vector.load %arg3[%c0_57, %c0_58, %c0_59] : memref<9x64x1xf32, #tpu.memory_space<vmem>>, vector<1x64x1xf32>
    %122 = vector.shape_cast %121 : vector<1x64x1xf32> to vector<64x1xf32>
    %123 = vector.broadcast %122 : vector<64x1xf32> to vector<64x32xf32>
    %124 = arith.mulf %120, %123 : vector<64x32xf32>
    %125 = arith.addf %118, %124 : vector<64x32xf32>
    %126 = vector.extract_strided_slice %117 {offsets = [0, 32], sizes = [64, 32], strides = [1, 1]} : vector<64x288xf32> to vector<64x32xf32>
    %c8_i32 = arith.constant 8 : i32
    %127 = tpu.dynamic_rotate %126 by %c8_i32 dim 0 : vector<64x32xf32>, i32 -> vector<64x32xf32>
    %c1_60 = arith.constant 1 : index
    %c0_61 = arith.constant 0 : index
    %c0_62 = arith.constant 0 : index
    %128 = vector.load %arg3[%c1_60, %c0_61, %c0_62] : memref<9x64x1xf32, #tpu.memory_space<vmem>>, vector<1x64x1xf32>
    %129 = vector.shape_cast %128 : vector<1x64x1xf32> to vector<64x1xf32>
    %130 = vector.broadcast %129 : vector<64x1xf32> to vector<64x32xf32>
    %131 = arith.mulf %127, %130 : vector<64x32xf32>
    %132 = arith.addf %125, %131 : vector<64x32xf32>
    %133 = vector.extract_strided_slice %117 {offsets = [0, 64], sizes = [64, 32], strides = [1, 1]} : vector<64x288xf32> to vector<64x32xf32>
    %c7_i32_63 = arith.constant 7 : i32
    %134 = tpu.dynamic_rotate %133 by %c7_i32_63 dim 0 : vector<64x32xf32>, i32 -> vector<64x32xf32>
    %c2_64 = arith.constant 2 : index
    %c0_65 = arith.constant 0 : index
    %c0_66 = arith.constant 0 : index
    %135 = vector.load %arg3[%c2_64, %c0_65, %c0_66] : memref<9x64x1xf32, #tpu.memory_space<vmem>>, vector<1x64x1xf32>
    %136 = vector.shape_cast %135 : vector<1x64x1xf32> to vector<64x1xf32>
    %137 = vector.broadcast %136 : vector<64x1xf32> to vector<64x32xf32>
    %138 = arith.mulf %134, %137 : vector<64x32xf32>
    %139 = arith.addf %132, %138 : vector<64x32xf32>
    %140 = vector.extract_strided_slice %117 {offsets = [0, 96], sizes = [64, 32], strides = [1, 1]} : vector<64x288xf32> to vector<64x32xf32>
    %c1_i32_67 = arith.constant 1 : i32
    %141 = tpu.dynamic_rotate %140 by %c1_i32_67 dim 0 : vector<64x32xf32>, i32 -> vector<64x32xf32>
    %c3_68 = arith.constant 3 : index
    %c0_69 = arith.constant 0 : index
    %c0_70 = arith.constant 0 : index
    %142 = vector.load %arg3[%c3_68, %c0_69, %c0_70] : memref<9x64x1xf32, #tpu.memory_space<vmem>>, vector<1x64x1xf32>
    %143 = vector.shape_cast %142 : vector<1x64x1xf32> to vector<64x1xf32>
    %144 = vector.broadcast %143 : vector<64x1xf32> to vector<64x32xf32>
    %145 = arith.mulf %141, %144 : vector<64x32xf32>
    %146 = arith.addf %139, %145 : vector<64x32xf32>
    %147 = vector.extract_strided_slice %117 {offsets = [0, 128], sizes = [64, 32], strides = [1, 1]} : vector<64x288xf32> to vector<64x32xf32>
    %148 = arith.addf %146, %147 : vector<64x32xf32>
    %149 = vector.extract_strided_slice %117 {offsets = [0, 160], sizes = [64, 32], strides = [1, 1]} : vector<64x288xf32> to vector<64x32xf32>
    %c63_i32 = arith.constant 63 : i32
    %150 = tpu.dynamic_rotate %149 by %c63_i32 dim 0 : vector<64x32xf32>, i32 -> vector<64x32xf32>
    %c5_71 = arith.constant 5 : index
    %c0_72 = arith.constant 0 : index
    %c0_73 = arith.constant 0 : index
    %151 = vector.load %arg3[%c5_71, %c0_72, %c0_73] : memref<9x64x1xf32, #tpu.memory_space<vmem>>, vector<1x64x1xf32>
    %152 = vector.shape_cast %151 : vector<1x64x1xf32> to vector<64x1xf32>
    %153 = vector.broadcast %152 : vector<64x1xf32> to vector<64x32xf32>
    %154 = arith.mulf %150, %153 : vector<64x32xf32>
    %155 = arith.addf %148, %154 : vector<64x32xf32>
    %156 = vector.extract_strided_slice %117 {offsets = [0, 192], sizes = [64, 32], strides = [1, 1]} : vector<64x288xf32> to vector<64x32xf32>
    %c57_i32 = arith.constant 57 : i32
    %157 = tpu.dynamic_rotate %156 by %c57_i32 dim 0 : vector<64x32xf32>, i32 -> vector<64x32xf32>
    %c6_74 = arith.constant 6 : index
    %c0_75 = arith.constant 0 : index
    %c0_76 = arith.constant 0 : index
    %158 = vector.load %arg3[%c6_74, %c0_75, %c0_76] : memref<9x64x1xf32, #tpu.memory_space<vmem>>, vector<1x64x1xf32>
    %159 = vector.shape_cast %158 : vector<1x64x1xf32> to vector<64x1xf32>
    %160 = vector.broadcast %159 : vector<64x1xf32> to vector<64x32xf32>
    %161 = arith.mulf %157, %160 : vector<64x32xf32>
    %162 = arith.addf %155, %161 : vector<64x32xf32>
    %163 = vector.extract_strided_slice %117 {offsets = [0, 224], sizes = [64, 32], strides = [1, 1]} : vector<64x288xf32> to vector<64x32xf32>
    %c56_i32 = arith.constant 56 : i32
    %164 = tpu.dynamic_rotate %163 by %c56_i32 dim 0 : vector<64x32xf32>, i32 -> vector<64x32xf32>
    %c7_77 = arith.constant 7 : index
    %c0_78 = arith.constant 0 : index
    %c0_79 = arith.constant 0 : index
    %165 = vector.load %arg3[%c7_77, %c0_78, %c0_79] : memref<9x64x1xf32, #tpu.memory_space<vmem>>, vector<1x64x1xf32>
    %166 = vector.shape_cast %165 : vector<1x64x1xf32> to vector<64x1xf32>
    %167 = vector.broadcast %166 : vector<64x1xf32> to vector<64x32xf32>
    %168 = arith.mulf %164, %167 : vector<64x32xf32>
    %169 = arith.addf %162, %168 : vector<64x32xf32>
    %170 = vector.extract_strided_slice %117 {offsets = [0, 256], sizes = [64, 32], strides = [1, 1]} : vector<64x288xf32> to vector<64x32xf32>
    %c55_i32 = arith.constant 55 : i32
    %171 = tpu.dynamic_rotate %170 by %c55_i32 dim 0 : vector<64x32xf32>, i32 -> vector<64x32xf32>
    %c8_80 = arith.constant 8 : index
    %c0_81 = arith.constant 0 : index
    %c0_82 = arith.constant 0 : index
    %172 = vector.load %arg3[%c8_80, %c0_81, %c0_82] : memref<9x64x1xf32, #tpu.memory_space<vmem>>, vector<1x64x1xf32>
    %173 = vector.shape_cast %172 : vector<1x64x1xf32> to vector<64x1xf32>
    %174 = vector.broadcast %173 : vector<64x1xf32> to vector<64x32xf32>
    %175 = arith.mulf %171, %174 : vector<64x32xf32>
    %176 = arith.addf %169, %175 : vector<64x32xf32>
    %c0_83 = arith.constant 0 : index
    %c0_84 = arith.constant 0 : index
    %c0_85 = arith.constant 0 : index
    %177 = vector.load %arg8[%c0_83, %c0_84, %c0_85] : memref<2x1x32xf32, #tpu.memory_space<vmem>>, vector<1x1x32xf32>
    %178 = vector.shape_cast %177 : vector<1x1x32xf32> to vector<1x32xf32>
    %179 = vector.broadcast %178 : vector<1x32xf32> to vector<64x32xf32>
    %180 = arith.addf %176, %179 : vector<64x32xf32>
    %cst_86 = arith.constant 0.000000e+00 : f32
    %181 = vector.broadcast %cst_86 : f32 to vector<64x32xf32>
    %182 = arith.maximumf %180, %181 : vector<64x32xf32>
    %c0_87 = arith.constant 0 : index
    %c0_88 = arith.constant 0 : index
    %183 = vector.load %arg12[%c0_87, %c0_88] : memref<64x32xf32, #tpu.memory_space<vmem>>, vector<64x32xf32>
    tpu.vector_store %arg12[%c0_87, %c0_88], %182 {strides = array<i32>} : memref<64x32xf32, #tpu.memory_space<vmem>>, vector<64x32xf32>,
    %c0_89 = arith.constant 0 : index
    %c0_90 = arith.constant 0 : index
    %184 = vector.load %arg12[%c0_89, %c0_90] : memref<64x32xf32, #tpu.memory_space<vmem>>, vector<64x32xf32>
    %185 = arith.truncf %184 : vector<64x32xf32> to vector<64x32xbf16>
    %c1_91 = arith.constant 1 : index
    %c0_92 = arith.constant 0 : index
    %c0_93 = arith.constant 0 : index
    %186 = vector.load %arg7[%c1_91, %c0_92, %c0_93] : memref<2x32x288xbf16, #tpu.memory_space<vmem>>, vector<1x32x288xbf16>
    %187 = vector.shape_cast %186 : vector<1x32x288xbf16> to vector<32x288xbf16>
    %cst_94 = arith.constant dense<0.000000e+00> : vector<64x288xf32>
    %188 = tpu.matmul %185, %187, %cst_94 {dimension_numbers = #tpu.dot_dimension_numbers<[1], [0], [0], [1], [0, 0, 1, 1], [], []>} : vector<64x32xbf16>, vector<32x288xbf16>, vector<64x288xf32> -> vector<64x288xf32>
    %cst_95 = arith.constant 0.000000e+00 : f32
    %189 = vector.broadcast %cst_95 : f32 to vector<64x32xf32>
    %190 = vector.extract_strided_slice %188 {offsets = [0, 0], sizes = [64, 32], strides = [1, 1]} : vector<64x288xf32> to vector<64x32xf32>
    %c9_i32_96 = arith.constant 9 : i32
    %191 = tpu.dynamic_rotate %190 by %c9_i32_96 dim 0 : vector<64x32xf32>, i32 -> vector<64x32xf32>
    %c0_97 = arith.constant 0 : index
    %c0_98 = arith.constant 0 : index
    %c0_99 = arith.constant 0 : index
    %192 = vector.load %arg3[%c0_97, %c0_98, %c0_99] : memref<9x64x1xf32, #tpu.memory_space<vmem>>, vector<1x64x1xf32>
    %193 = vector.shape_cast %192 : vector<1x64x1xf32> to vector<64x1xf32>
    %194 = vector.broadcast %193 : vector<64x1xf32> to vector<64x32xf32>
    %195 = arith.mulf %191, %194 : vector<64x32xf32>
    %196 = arith.addf %189, %195 : vector<64x32xf32>
    %197 = vector.extract_strided_slice %188 {offsets = [0, 32], sizes = [64, 32], strides = [1, 1]} : vector<64x288xf32> to vector<64x32xf32>
    %c8_i32_100 = arith.constant 8 : i32
    %198 = tpu.dynamic_rotate %197 by %c8_i32_100 dim 0 : vector<64x32xf32>, i32 -> vector<64x32xf32>
    %c1_101 = arith.constant 1 : index
    %c0_102 = arith.constant 0 : index
    %c0_103 = arith.constant 0 : index
    %199 = vector.load %arg3[%c1_101, %c0_102, %c0_103] : memref<9x64x1xf32, #tpu.memory_space<vmem>>, vector<1x64x1xf32>
    %200 = vector.shape_cast %199 : vector<1x64x1xf32> to vector<64x1xf32>
    %201 = vector.broadcast %200 : vector<64x1xf32> to vector<64x32xf32>
    %202 = arith.mulf %198, %201 : vector<64x32xf32>
    %203 = arith.addf %196, %202 : vector<64x32xf32>
    %204 = vector.extract_strided_slice %188 {offsets = [0, 64], sizes = [64, 32], strides = [1, 1]} : vector<64x288xf32> to vector<64x32xf32>
    %c7_i32_104 = arith.constant 7 : i32
    %205 = tpu.dynamic_rotate %204 by %c7_i32_104 dim 0 : vector<64x32xf32>, i32 -> vector<64x32xf32>
    %c2_105 = arith.constant 2 : index
    %c0_106 = arith.constant 0 : index
    %c0_107 = arith.constant 0 : index
    %206 = vector.load %arg3[%c2_105, %c0_106, %c0_107] : memref<9x64x1xf32, #tpu.memory_space<vmem>>, vector<1x64x1xf32>
    %207 = vector.shape_cast %206 : vector<1x64x1xf32> to vector<64x1xf32>
    %208 = vector.broadcast %207 : vector<64x1xf32> to vector<64x32xf32>
    %209 = arith.mulf %205, %208 : vector<64x32xf32>
    %210 = arith.addf %203, %209 : vector<64x32xf32>
    %211 = vector.extract_strided_slice %188 {offsets = [0, 96], sizes = [64, 32], strides = [1, 1]} : vector<64x288xf32> to vector<64x32xf32>
    %c1_i32_108 = arith.constant 1 : i32
    %212 = tpu.dynamic_rotate %211 by %c1_i32_108 dim 0 : vector<64x32xf32>, i32 -> vector<64x32xf32>
    %c3_109 = arith.constant 3 : index
    %c0_110 = arith.constant 0 : index
    %c0_111 = arith.constant 0 : index
    %213 = vector.load %arg3[%c3_109, %c0_110, %c0_111] : memref<9x64x1xf32, #tpu.memory_space<vmem>>, vector<1x64x1xf32>
    %214 = vector.shape_cast %213 : vector<1x64x1xf32> to vector<64x1xf32>
    %215 = vector.broadcast %214 : vector<64x1xf32> to vector<64x32xf32>
    %216 = arith.mulf %212, %215 : vector<64x32xf32>
    %217 = arith.addf %210, %216 : vector<64x32xf32>
    %218 = vector.extract_strided_slice %188 {offsets = [0, 128], sizes = [64, 32], strides = [1, 1]} : vector<64x288xf32> to vector<64x32xf32>
    %219 = arith.addf %217, %218 : vector<64x32xf32>
    %220 = vector.extract_strided_slice %188 {offsets = [0, 160], sizes = [64, 32], strides = [1, 1]} : vector<64x288xf32> to vector<64x32xf32>
    %c63_i32_112 = arith.constant 63 : i32
    %221 = tpu.dynamic_rotate %220 by %c63_i32_112 dim 0 : vector<64x32xf32>, i32 -> vector<64x32xf32>
    %c5_113 = arith.constant 5 : index
    %c0_114 = arith.constant 0 : index
    %c0_115 = arith.constant 0 : index
    %222 = vector.load %arg3[%c5_113, %c0_114, %c0_115] : memref<9x64x1xf32, #tpu.memory_space<vmem>>, vector<1x64x1xf32>
    %223 = vector.shape_cast %222 : vector<1x64x1xf32> to vector<64x1xf32>
    %224 = vector.broadcast %223 : vector<64x1xf32> to vector<64x32xf32>
    %225 = arith.mulf %221, %224 : vector<64x32xf32>
    %226 = arith.addf %219, %225 : vector<64x32xf32>
    %227 = vector.extract_strided_slice %188 {offsets = [0, 192], sizes = [64, 32], strides = [1, 1]} : vector<64x288xf32> to vector<64x32xf32>
    %c57_i32_116 = arith.constant 57 : i32
    %228 = tpu.dynamic_rotate %227 by %c57_i32_116 dim 0 : vector<64x32xf32>, i32 -> vector<64x32xf32>
    %c6_117 = arith.constant 6 : index
    %c0_118 = arith.constant 0 : index
    %c0_119 = arith.constant 0 : index
    %229 = vector.load %arg3[%c6_117, %c0_118, %c0_119] : memref<9x64x1xf32, #tpu.memory_space<vmem>>, vector<1x64x1xf32>
    %230 = vector.shape_cast %229 : vector<1x64x1xf32> to vector<64x1xf32>
    %231 = vector.broadcast %230 : vector<64x1xf32> to vector<64x32xf32>
    %232 = arith.mulf %228, %231 : vector<64x32xf32>
    %233 = arith.addf %226, %232 : vector<64x32xf32>
    %234 = vector.extract_strided_slice %188 {offsets = [0, 224], sizes = [64, 32], strides = [1, 1]} : vector<64x288xf32> to vector<64x32xf32>
    %c56_i32_120 = arith.constant 56 : i32
    %235 = tpu.dynamic_rotate %234 by %c56_i32_120 dim 0 : vector<64x32xf32>, i32 -> vector<64x32xf32>
    %c7_121 = arith.constant 7 : index
    %c0_122 = arith.constant 0 : index
    %c0_123 = arith.constant 0 : index
    %236 = vector.load %arg3[%c7_121, %c0_122, %c0_123] : memref<9x64x1xf32, #tpu.memory_space<vmem>>, vector<1x64x1xf32>
    %237 = vector.shape_cast %236 : vector<1x64x1xf32> to vector<64x1xf32>
    %238 = vector.broadcast %237 : vector<64x1xf32> to vector<64x32xf32>
    %239 = arith.mulf %235, %238 : vector<64x32xf32>
    %240 = arith.addf %233, %239 : vector<64x32xf32>
    %241 = vector.extract_strided_slice %188 {offsets = [0, 256], sizes = [64, 32], strides = [1, 1]} : vector<64x288xf32> to vector<64x32xf32>
    %c55_i32_124 = arith.constant 55 : i32
    %242 = tpu.dynamic_rotate %241 by %c55_i32_124 dim 0 : vector<64x32xf32>, i32 -> vector<64x32xf32>
    %c8_125 = arith.constant 8 : index
    %c0_126 = arith.constant 0 : index
    %c0_127 = arith.constant 0 : index
    %243 = vector.load %arg3[%c8_125, %c0_126, %c0_127] : memref<9x64x1xf32, #tpu.memory_space<vmem>>, vector<1x64x1xf32>
    %244 = vector.shape_cast %243 : vector<1x64x1xf32> to vector<64x1xf32>
    %245 = vector.broadcast %244 : vector<64x1xf32> to vector<64x32xf32>
    %246 = arith.mulf %242, %245 : vector<64x32xf32>
    %247 = arith.addf %240, %246 : vector<64x32xf32>
    %c1_128 = arith.constant 1 : index
    %c0_129 = arith.constant 0 : index
    %c0_130 = arith.constant 0 : index
    %248 = vector.load %arg8[%c1_128, %c0_129, %c0_130] : memref<2x1x32xf32, #tpu.memory_space<vmem>>, vector<1x1x32xf32>
    %249 = vector.shape_cast %248 : vector<1x1x32xf32> to vector<1x32xf32>
    %250 = vector.broadcast %249 : vector<1x32xf32> to vector<64x32xf32>
    %251 = arith.addf %247, %250 : vector<64x32xf32>
    %cst_131 = arith.constant 0.000000e+00 : f32
    %252 = vector.broadcast %cst_131 : f32 to vector<64x32xf32>
    %253 = arith.maximumf %251, %252 : vector<64x32xf32>
    %c0_132 = arith.constant 0 : index
    %c0_133 = arith.constant 0 : index
    %254 = vector.load %arg12[%c0_132, %c0_133] : memref<64x32xf32, #tpu.memory_space<vmem>>, vector<64x32xf32>
    tpu.vector_store %arg12[%c0_132, %c0_133], %253 {strides = array<i32>} : memref<64x32xf32, #tpu.memory_space<vmem>>, vector<64x32xf32>,
    %c0_134 = arith.constant 0 : index
    %c0_135 = arith.constant 0 : index
    %255 = vector.load %arg12[%c0_134, %c0_135] : memref<64x32xf32, #tpu.memory_space<vmem>>, vector<64x32xf32>
    %c0_136 = arith.constant 0 : index
    %c0_137 = arith.constant 0 : index
    %c0_138 = arith.constant 0 : index
    %256 = vector.load %arg2[%c0_136, %c0_137, %c0_138] : memref<1x64x32xf32, #tpu.memory_space<vmem>>, vector<1x64x32xf32>
    %257 = vector.shape_cast %256 : vector<1x64x32xf32> to vector<64x32xf32>
    %258 = arith.mulf %255, %257 : vector<64x32xf32>
    %c0_139 = arith.constant 0 : index
    %c0_140 = arith.constant 0 : index
    %259 = vector.load %arg9[%c0_139, %c0_140] : memref<1x32xf32, #tpu.memory_space<vmem>>, vector<1x32xf32>
    %260 = tpu.transpose %258, [1, 0] : vector<64x32xf32> -> vector<32x64xf32>
    %cst_141 = arith.constant dense<0.000000e+00> : vector<1x64xf32>
    %261 = tpu.matmul %259, %260, %cst_141 {dimension_numbers = #tpu.dot_dimension_numbers<[1], [0], [0], [1], [0, 0, 1, 1], [], []>} : vector<1x32xf32>, vector<32x64xf32>, vector<1x64xf32> -> vector<1x64xf32>
    %c0_142 = arith.constant 0 : index
    %c0_143 = arith.constant 0 : index
    %262 = vector.load %arg10[%c0_142, %c0_143] : memref<1x1xf32, #tpu.memory_space<vmem>>, vector<1x1xf32>
    %263 = vector.broadcast %262 : vector<1x1xf32> to vector<1x64xf32>
    %264 = arith.addf %261, %263 : vector<1x64xf32>
    %c0_144 = arith.constant 0 : index
    %c0_145 = arith.constant 0 : index
    %c0_146 = arith.constant 0 : index
    %265 = vector.load %arg11[%c0_144, %c0_145, %c0_146] : memref<1x1x64xf32, #tpu.memory_space<vmem>>, vector<1x1x64xf32>
    %266 = vector.shape_cast %265 : vector<1x1x64xf32> to vector<1x64xf32>
    %267 = vector.shape_cast %264 : vector<1x64xf32> to vector<1x1x64xf32>
    tpu.vector_store %arg11[%c0_144, %c0_145, %c0_146], %267 {strides = array<i32>} : memref<1x1x64xf32, #tpu.memory_space<vmem>>, vector<1x1x64xf32>,
    return
  }
  func.func @transform_0(%arg0: i32) -> (i32, i32, i32) {
    %c0_i32 = arith.constant 0 : i32
    %c0_i32_0 = arith.constant 0 : i32
    %c0_i32_1 = arith.constant 0 : i32
    return %arg0, %c0_i32, %c0_i32_0 : i32, i32, i32
  }
  func.func @transform_1(%arg0: i32) -> (i32, i32, i32) {
    %c0_i32 = arith.constant 0 : i32
    %c0_i32_0 = arith.constant 0 : i32
    %c0_i32_1 = arith.constant 0 : i32
    return %arg0, %c0_i32, %c0_i32_0 : i32, i32, i32
  }
  func.func @transform_2(%arg0: i32) -> (i32, i32, i32) {
    %c0_i32 = arith.constant 0 : i32
    %c0_i32_0 = arith.constant 0 : i32
    %c0_i32_1 = arith.constant 0 : i32
    %c0_i32_2 = arith.constant 0 : i32
    return %c0_i32, %c0_i32_0, %c0_i32_1 : i32, i32, i32
  }
  func.func @transform_3(%arg0: i32) -> (i32, i32, i32) {
    %c0_i32 = arith.constant 0 : i32
    %c0_i32_0 = arith.constant 0 : i32
    %c0_i32_1 = arith.constant 0 : i32
    return %arg0, %c0_i32, %c0_i32_0 : i32, i32, i32
  }
  func.func @transform_4(%arg0: i32) -> (i32, i32) {
    %c0_i32 = arith.constant 0 : i32
    %c0_i32_0 = arith.constant 0 : i32
    %c0_i32_1 = arith.constant 0 : i32
    return %c0_i32, %c0_i32_0 : i32, i32
  }
  func.func @transform_5(%arg0: i32) -> (i32, i32) {
    %c0_i32 = arith.constant 0 : i32
    %c0_i32_0 = arith.constant 0 : i32
    %c0_i32_1 = arith.constant 0 : i32
    return %c0_i32, %c0_i32_0 : i32, i32
  }
  func.func @transform_6(%arg0: i32) -> (i32, i32, i32) {
    %c0_i32 = arith.constant 0 : i32
    %c0_i32_0 = arith.constant 0 : i32
    %c0_i32_1 = arith.constant 0 : i32
    %c0_i32_2 = arith.constant 0 : i32
    return %c0_i32, %c0_i32_0, %c0_i32_1 : i32, i32, i32
  }
  func.func @transform_7(%arg0: i32) -> (i32, i32, i32) {
    %c0_i32 = arith.constant 0 : i32
    %c0_i32_0 = arith.constant 0 : i32
    %c0_i32_1 = arith.constant 0 : i32
    %c0_i32_2 = arith.constant 0 : i32
    return %c0_i32, %c0_i32_0, %c0_i32_1 : i32, i32, i32
  }
  func.func @transform_8(%arg0: i32) -> (i32, i32) {
    %c0_i32 = arith.constant 0 : i32
    %c0_i32_0 = arith.constant 0 : i32
    %c0_i32_1 = arith.constant 0 : i32
    return %c0_i32, %c0_i32_0 : i32, i32
  }
  func.func @transform_9(%arg0: i32) -> (i32, i32) {
    %c0_i32 = arith.constant 0 : i32
    %c0_i32_0 = arith.constant 0 : i32
    %c0_i32_1 = arith.constant 0 : i32
    return %c0_i32, %c0_i32_0 : i32, i32
  }
  func.func @transform_10(%arg0: i32) -> (i32, i32, i32) {
    %c0_i32 = arith.constant 0 : i32
    %c0_i32_0 = arith.constant 0 : i32
    %c0_i32_1 = arith.constant 0 : i32
    return %arg0, %c0_i32, %c0_i32_0 : i32, i32, i32
  }
}

module attributes {stable_mosaic.version = 11 : i64} {
  func.func @_scale_kernel(%arg0: i32, %arg1: memref<1x4x32xf32, #tpu.memory_space<vmem>>, %arg2: memref<1x16x32xf32, #tpu.memory_space<vmem>>, %arg3: memref<9x16x1xf32, #tpu.memory_space<vmem>>, %arg4: memref<1x1x32xf32, #tpu.memory_space<vmem>>, %arg5: memref<32x32xbf16, #tpu.memory_space<vmem>>, %arg6: memref<1x32xf32, #tpu.memory_space<vmem>>, %arg7: memref<2x32x288xbf16, #tpu.memory_space<vmem>>, %arg8: memref<2x1x32xf32, #tpu.memory_space<vmem>>, %arg9: memref<1x32xf32, #tpu.memory_space<vmem>>, %arg10: memref<1x1xf32, #tpu.memory_space<vmem>>, %arg11: memref<1x1x16xf32, #tpu.memory_space<vmem>>, %arg12: memref<16x32xf32, #tpu.memory_space<vmem>>) attributes {dimension_semantics = [#tpu.dimension_semantics<parallel>], iteration_bounds = array<i64: 2>, scalar_prefetch = 0 : i64, scratch_operands = 1 : i64, tpu.core_type = #tpu.core_type<tc>, window_params = [{transform_indices = @transform_0, window_bounds = array<i64: 1, 4, 32>}, {transform_indices = @transform_1, window_bounds = array<i64: 1, 16, 32>}, {pipeline_mode = #tpu.pipeline_mode<synchronous>, transform_indices = @transform_2, window_bounds = array<i64: 9, 16, 1>}, {transform_indices = @transform_3, window_bounds = array<i64: 1, 1, 32>}, {pipeline_mode = #tpu.pipeline_mode<synchronous>, transform_indices = @transform_4, window_bounds = array<i64: 32, 32>}, {pipeline_mode = #tpu.pipeline_mode<synchronous>, transform_indices = @transform_5, window_bounds = array<i64: 1, 32>}, {pipeline_mode = #tpu.pipeline_mode<synchronous>, transform_indices = @transform_6, window_bounds = array<i64: 2, 32, 288>}, {pipeline_mode = #tpu.pipeline_mode<synchronous>, transform_indices = @transform_7, window_bounds = array<i64: 2, 1, 32>}, {pipeline_mode = #tpu.pipeline_mode<synchronous>, transform_indices = @transform_8, window_bounds = array<i64: 1, 32>}, {pipeline_mode = #tpu.pipeline_mode<synchronous>, transform_indices = @transform_9, window_bounds = array<i64: 1, 1>}, {transform_indices = @transform_10, window_bounds = array<i64: 1, 1, 16>}]} {
    %0 = tpu.iota {dimensions = array<i32: 0>} : vector<4x1xi32>
    %cst = arith.constant 0xFF800000 : f32
    %1 = vector.broadcast %cst : f32 to vector<4x32xf32>
    %c0 = arith.constant 0 : index
    %c3 = arith.constant 3 : index
    %c0_0 = arith.constant 0 : index
    %2 = vector.load %arg1[%c0, %c3, %c0_0] : memref<1x4x32xf32, #tpu.memory_space<vmem>>, vector<1x1x32xf32>
    %3 = vector.shape_cast %2 : vector<1x1x32xf32> to vector<1x32xf32>
    %4 = vector.broadcast %3 : vector<1x32xf32> to vector<4x32xf32>
    %5 = arith.maximumf %1, %4 : vector<4x32xf32>
    %c3_i32 = arith.constant 3 : i32
    %6 = vector.broadcast %c3_i32 : i32 to vector<4x1xi32>
    %7 = arith.cmpi sge, %0, %6 : vector<4x1xi32>
    %cst_1 = arith.constant 0.000000e+00 : f32
    %8 = vector.shape_cast %7 : vector<4x1xi1> to vector<4x1xi1>
    %9 = vector.broadcast %8 : vector<4x1xi1> to vector<4x32xi1>
    %10 = vector.broadcast %cst_1 : f32 to vector<4x32xf32>
    %11 = arith.select %9, %5, %10 : vector<4x32xi1>, vector<4x32xf32>
    %c12 = arith.constant 12 : index
    %c0_2 = arith.constant 0 : index
    %12 = vector.load %arg12[%c12, %c0_2] : memref<16x32xf32, #tpu.memory_space<vmem>>, vector<4x32xf32>
    tpu.vector_store %arg12[%c12, %c0_2], %11 {strides = array<i32>} : memref<16x32xf32, #tpu.memory_space<vmem>>, vector<4x32xf32>,
    %c0_3 = arith.constant 0 : index
    %c2 = arith.constant 2 : index
    %c0_4 = arith.constant 0 : index
    %13 = vector.load %arg1[%c0_3, %c2, %c0_4] : memref<1x4x32xf32, #tpu.memory_space<vmem>>, vector<1x1x32xf32>
    %14 = vector.shape_cast %13 : vector<1x1x32xf32> to vector<1x32xf32>
    %15 = vector.broadcast %14 : vector<1x32xf32> to vector<4x32xf32>
    %16 = arith.maximumf %5, %15 : vector<4x32xf32>
    %c2_i32 = arith.constant 2 : i32
    %17 = vector.broadcast %c2_i32 : i32 to vector<4x1xi32>
    %18 = arith.cmpi sge, %0, %17 : vector<4x1xi32>
    %cst_5 = arith.constant 0.000000e+00 : f32
    %19 = vector.shape_cast %18 : vector<4x1xi1> to vector<4x1xi1>
    %20 = vector.broadcast %19 : vector<4x1xi1> to vector<4x32xi1>
    %21 = vector.broadcast %cst_5 : f32 to vector<4x32xf32>
    %22 = arith.select %20, %16, %21 : vector<4x32xi1>, vector<4x32xf32>
    %c8 = arith.constant 8 : index
    %c0_6 = arith.constant 0 : index
    %23 = vector.load %arg12[%c8, %c0_6] : memref<16x32xf32, #tpu.memory_space<vmem>>, vector<4x32xf32>
    tpu.vector_store %arg12[%c8, %c0_6], %22 {strides = array<i32>} : memref<16x32xf32, #tpu.memory_space<vmem>>, vector<4x32xf32>,
    %c0_7 = arith.constant 0 : index
    %c1 = arith.constant 1 : index
    %c0_8 = arith.constant 0 : index
    %24 = vector.load %arg1[%c0_7, %c1, %c0_8] : memref<1x4x32xf32, #tpu.memory_space<vmem>>, vector<1x1x32xf32>
    %25 = vector.shape_cast %24 : vector<1x1x32xf32> to vector<1x32xf32>
    %26 = vector.broadcast %25 : vector<1x32xf32> to vector<4x32xf32>
    %27 = arith.maximumf %16, %26 : vector<4x32xf32>
    %c1_i32 = arith.constant 1 : i32
    %28 = vector.broadcast %c1_i32 : i32 to vector<4x1xi32>
    %29 = arith.cmpi sge, %0, %28 : vector<4x1xi32>
    %cst_9 = arith.constant 0.000000e+00 : f32
    %30 = vector.shape_cast %29 : vector<4x1xi1> to vector<4x1xi1>
    %31 = vector.broadcast %30 : vector<4x1xi1> to vector<4x32xi1>
    %32 = vector.broadcast %cst_9 : f32 to vector<4x32xf32>
    %33 = arith.select %31, %27, %32 : vector<4x32xi1>, vector<4x32xf32>
    %c4 = arith.constant 4 : index
    %c0_10 = arith.constant 0 : index
    %34 = vector.load %arg12[%c4, %c0_10] : memref<16x32xf32, #tpu.memory_space<vmem>>, vector<4x32xf32>
    tpu.vector_store %arg12[%c4, %c0_10], %33 {strides = array<i32>} : memref<16x32xf32, #tpu.memory_space<vmem>>, vector<4x32xf32>,
    %c0_11 = arith.constant 0 : index
    %c0_12 = arith.constant 0 : index
    %c0_13 = arith.constant 0 : index
    %35 = vector.load %arg1[%c0_11, %c0_12, %c0_13] : memref<1x4x32xf32, #tpu.memory_space<vmem>>, vector<1x1x32xf32>
    %36 = vector.shape_cast %35 : vector<1x1x32xf32> to vector<1x32xf32>
    %37 = vector.broadcast %36 : vector<1x32xf32> to vector<4x32xf32>
    %38 = arith.maximumf %27, %37 : vector<4x32xf32>
    %c0_i32 = arith.constant 0 : i32
    %39 = vector.broadcast %c0_i32 : i32 to vector<4x1xi32>
    %40 = arith.cmpi sge, %0, %39 : vector<4x1xi32>
    %cst_14 = arith.constant 0.000000e+00 : f32
    %41 = vector.shape_cast %40 : vector<4x1xi1> to vector<4x1xi1>
    %42 = vector.broadcast %41 : vector<4x1xi1> to vector<4x32xi1>
    %43 = vector.broadcast %cst_14 : f32 to vector<4x32xf32>
    %44 = arith.select %42, %38, %43 : vector<4x32xi1>, vector<4x32xf32>
    %c0_15 = arith.constant 0 : index
    %c0_16 = arith.constant 0 : index
    %45 = vector.load %arg12[%c0_15, %c0_16] : memref<16x32xf32, #tpu.memory_space<vmem>>, vector<4x32xf32>
    tpu.vector_store %arg12[%c0_15, %c0_16], %44 {strides = array<i32>} : memref<16x32xf32, #tpu.memory_space<vmem>>, vector<4x32xf32>,
    %c0_17 = arith.constant 0 : index
    %c0_18 = arith.constant 0 : index
    %46 = vector.load %arg12[%c0_17, %c0_18] : memref<16x32xf32, #tpu.memory_space<vmem>>, vector<16x32xf32>
    %47 = arith.truncf %46 : vector<16x32xf32> to vector<16x32xbf16>
    %c0_19 = arith.constant 0 : index
    %c0_20 = arith.constant 0 : index
    %48 = vector.load %arg5[%c0_19, %c0_20] : memref<32x32xbf16, #tpu.memory_space<vmem>>, vector<32x32xbf16>
    %cst_21 = arith.constant dense<0.000000e+00> : vector<16x32xf32>
    %49 = tpu.matmul %47, %48, %cst_21 {dimension_numbers = #tpu.dot_dimension_numbers<[1], [0], [0], [1], [0, 0, 1, 1], [], []>} : vector<16x32xbf16>, vector<32x32xbf16>, vector<16x32xf32> -> vector<16x32xf32>
    %c0_22 = arith.constant 0 : index
    %c0_23 = arith.constant 0 : index
    %50 = vector.load %arg6[%c0_22, %c0_23] : memref<1x32xf32, #tpu.memory_space<vmem>>, vector<1x32xf32>
    %51 = vector.broadcast %50 : vector<1x32xf32> to vector<16x32xf32>
    %52 = arith.addf %49, %51 : vector<16x32xf32>
    %c0_24 = arith.constant 0 : index
    %c0_25 = arith.constant 0 : index
    %c0_26 = arith.constant 0 : index
    %53 = vector.load %arg4[%c0_24, %c0_25, %c0_26] : memref<1x1x32xf32, #tpu.memory_space<vmem>>, vector<1x1x32xf32>
    %54 = vector.shape_cast %53 : vector<1x1x32xf32> to vector<1x32xf32>
    %55 = vector.broadcast %54 : vector<1x32xf32> to vector<16x32xf32>
    %56 = arith.mulf %52, %55 : vector<16x32xf32>
    %57 = arith.mulf %56, %56 : vector<16x32xf32>
    %cst_27 = arith.constant dense<0.000000e+00> : vector<16xf32>
    %58 = vector.multi_reduction <add>, %57, %cst_27 [1] : vector<16x32xf32> to vector<16xf32>
    %59 = vector.shape_cast %58 : vector<16xf32> to vector<16x1xf32>
    %cst_28 = arith.constant 1.000000e-24 : f32
    %60 = vector.broadcast %cst_28 : f32 to vector<16x1xf32>
    %61 = arith.addf %59, %60 : vector<16x1xf32>
    %62 = math.rsqrt %61 : vector<16x1xf32>
    %63 = vector.broadcast %62 : vector<16x1xf32> to vector<16x32xf32>
    %64 = arith.mulf %56, %63 : vector<16x32xf32>
    %c0_29 = arith.constant 0 : index
    %c0_30 = arith.constant 0 : index
    %c0_31 = arith.constant 0 : index
    %65 = vector.load %arg2[%c0_29, %c0_30, %c0_31] : memref<1x16x32xf32, #tpu.memory_space<vmem>>, vector<1x16x32xf32>
    %66 = vector.shape_cast %65 : vector<1x16x32xf32> to vector<16x32xf32>
    %67 = arith.mulf %64, %66 : vector<16x32xf32>
    %c0_32 = arith.constant 0 : index
    %c0_33 = arith.constant 0 : index
    %68 = vector.load %arg12[%c0_32, %c0_33] : memref<16x32xf32, #tpu.memory_space<vmem>>, vector<16x32xf32>
    tpu.vector_store %arg12[%c0_32, %c0_33], %67 {strides = array<i32>} : memref<16x32xf32, #tpu.memory_space<vmem>>, vector<16x32xf32>,
    %c0_34 = arith.constant 0 : index
    %c0_35 = arith.constant 0 : index
    %69 = vector.load %arg12[%c0_34, %c0_35] : memref<16x32xf32, #tpu.memory_space<vmem>>, vector<16x32xf32>
    %70 = arith.truncf %69 : vector<16x32xf32> to vector<16x32xbf16>
    %c0_36 = arith.constant 0 : index
    %c0_37 = arith.constant 0 : index
    %c0_38 = arith.constant 0 : index
    %71 = vector.load %arg7[%c0_36, %c0_37, %c0_38] : memref<2x32x288xbf16, #tpu.memory_space<vmem>>, vector<1x32x288xbf16>
    %72 = vector.shape_cast %71 : vector<1x32x288xbf16> to vector<32x288xbf16>
    %cst_39 = arith.constant dense<0.000000e+00> : vector<16x288xf32>
    %73 = tpu.matmul %70, %72, %cst_39 {dimension_numbers = #tpu.dot_dimension_numbers<[1], [0], [0], [1], [0, 0, 1, 1], [], []>} : vector<16x32xbf16>, vector<32x288xbf16>, vector<16x288xf32> -> vector<16x288xf32>
    %cst_40 = arith.constant 0.000000e+00 : f32
    %74 = vector.broadcast %cst_40 : f32 to vector<16x32xf32>
    %75 = vector.extract_strided_slice %73 {offsets = [0, 0], sizes = [16, 32], strides = [1, 1]} : vector<16x288xf32> to vector<16x32xf32>
    %c5_i32 = arith.constant 5 : i32
    %76 = tpu.dynamic_rotate %75 by %c5_i32 dim 0 : vector<16x32xf32>, i32 -> vector<16x32xf32>
    %c0_41 = arith.constant 0 : index
    %c0_42 = arith.constant 0 : index
    %c0_43 = arith.constant 0 : index
    %77 = vector.load %arg3[%c0_41, %c0_42, %c0_43] : memref<9x16x1xf32, #tpu.memory_space<vmem>>, vector<1x16x1xf32>
    %78 = vector.shape_cast %77 : vector<1x16x1xf32> to vector<16x1xf32>
    %79 = vector.broadcast %78 : vector<16x1xf32> to vector<16x32xf32>
    %80 = arith.mulf %76, %79 : vector<16x32xf32>
    %81 = arith.addf %74, %80 : vector<16x32xf32>
    %82 = vector.extract_strided_slice %73 {offsets = [0, 32], sizes = [16, 32], strides = [1, 1]} : vector<16x288xf32> to vector<16x32xf32>
    %c4_i32 = arith.constant 4 : i32
    %83 = tpu.dynamic_rotate %82 by %c4_i32 dim 0 : vector<16x32xf32>, i32 -> vector<16x32xf32>
    %c1_44 = arith.constant 1 : index
    %c0_45 = arith.constant 0 : index
    %c0_46 = arith.constant 0 : index
    %84 = vector.load %arg3[%c1_44, %c0_45, %c0_46] : memref<9x16x1xf32, #tpu.memory_space<vmem>>, vector<1x16x1xf32>
    %85 = vector.shape_cast %84 : vector<1x16x1xf32> to vector<16x1xf32>
    %86 = vector.broadcast %85 : vector<16x1xf32> to vector<16x32xf32>
    %87 = arith.mulf %83, %86 : vector<16x32xf32>
    %88 = arith.addf %81, %87 : vector<16x32xf32>
    %89 = vector.extract_strided_slice %73 {offsets = [0, 64], sizes = [16, 32], strides = [1, 1]} : vector<16x288xf32> to vector<16x32xf32>
    %c3_i32_47 = arith.constant 3 : i32
    %90 = tpu.dynamic_rotate %89 by %c3_i32_47 dim 0 : vector<16x32xf32>, i32 -> vector<16x32xf32>
    %c2_48 = arith.constant 2 : index
    %c0_49 = arith.constant 0 : index
    %c0_50 = arith.constant 0 : index
    %91 = vector.load %arg3[%c2_48, %c0_49, %c0_50] : memref<9x16x1xf32, #tpu.memory_space<vmem>>, vector<1x16x1xf32>
    %92 = vector.shape_cast %91 : vector<1x16x1xf32> to vector<16x1xf32>
    %93 = vector.broadcast %92 : vector<16x1xf32> to vector<16x32xf32>
    %94 = arith.mulf %90, %93 : vector<16x32xf32>
    %95 = arith.addf %88, %94 : vector<16x32xf32>
    %96 = vector.extract_strided_slice %73 {offsets = [0, 96], sizes = [16, 32], strides = [1, 1]} : vector<16x288xf32> to vector<16x32xf32>
    %c1_i32_51 = arith.constant 1 : i32
    %97 = tpu.dynamic_rotate %96 by %c1_i32_51 dim 0 : vector<16x32xf32>, i32 -> vector<16x32xf32>
    %c3_52 = arith.constant 3 : index
    %c0_53 = arith.constant 0 : index
    %c0_54 = arith.constant 0 : index
    %98 = vector.load %arg3[%c3_52, %c0_53, %c0_54] : memref<9x16x1xf32, #tpu.memory_space<vmem>>, vector<1x16x1xf32>
    %99 = vector.shape_cast %98 : vector<1x16x1xf32> to vector<16x1xf32>
    %100 = vector.broadcast %99 : vector<16x1xf32> to vector<16x32xf32>
    %101 = arith.mulf %97, %100 : vector<16x32xf32>
    %102 = arith.addf %95, %101 : vector<16x32xf32>
    %103 = vector.extract_strided_slice %73 {offsets = [0, 128], sizes = [16, 32], strides = [1, 1]} : vector<16x288xf32> to vector<16x32xf32>
    %104 = arith.addf %102, %103 : vector<16x32xf32>
    %105 = vector.extract_strided_slice %73 {offsets = [0, 160], sizes = [16, 32], strides = [1, 1]} : vector<16x288xf32> to vector<16x32xf32>
    %c15_i32 = arith.constant 15 : i32
    %106 = tpu.dynamic_rotate %105 by %c15_i32 dim 0 : vector<16x32xf32>, i32 -> vector<16x32xf32>
    %c5 = arith.constant 5 : index
    %c0_55 = arith.constant 0 : index
    %c0_56 = arith.constant 0 : index
    %107 = vector.load %arg3[%c5, %c0_55, %c0_56] : memref<9x16x1xf32, #tpu.memory_space<vmem>>, vector<1x16x1xf32>
    %108 = vector.shape_cast %107 : vector<1x16x1xf32> to vector<16x1xf32>
    %109 = vector.broadcast %108 : vector<16x1xf32> to vector<16x32xf32>
    %110 = arith.mulf %106, %109 : vector<16x32xf32>
    %111 = arith.addf %104, %110 : vector<16x32xf32>
    %112 = vector.extract_strided_slice %73 {offsets = [0, 192], sizes = [16, 32], strides = [1, 1]} : vector<16x288xf32> to vector<16x32xf32>
    %c13_i32 = arith.constant 13 : i32
    %113 = tpu.dynamic_rotate %112 by %c13_i32 dim 0 : vector<16x32xf32>, i32 -> vector<16x32xf32>
    %c6 = arith.constant 6 : index
    %c0_57 = arith.constant 0 : index
    %c0_58 = arith.constant 0 : index
    %114 = vector.load %arg3[%c6, %c0_57, %c0_58] : memref<9x16x1xf32, #tpu.memory_space<vmem>>, vector<1x16x1xf32>
    %115 = vector.shape_cast %114 : vector<1x16x1xf32> to vector<16x1xf32>
    %116 = vector.broadcast %115 : vector<16x1xf32> to vector<16x32xf32>
    %117 = arith.mulf %113, %116 : vector<16x32xf32>
    %118 = arith.addf %111, %117 : vector<16x32xf32>
    %119 = vector.extract_strided_slice %73 {offsets = [0, 224], sizes = [16, 32], strides = [1, 1]} : vector<16x288xf32> to vector<16x32xf32>
    %c12_i32 = arith.constant 12 : i32
    %120 = tpu.dynamic_rotate %119 by %c12_i32 dim 0 : vector<16x32xf32>, i32 -> vector<16x32xf32>
    %c7 = arith.constant 7 : index
    %c0_59 = arith.constant 0 : index
    %c0_60 = arith.constant 0 : index
    %121 = vector.load %arg3[%c7, %c0_59, %c0_60] : memref<9x16x1xf32, #tpu.memory_space<vmem>>, vector<1x16x1xf32>
    %122 = vector.shape_cast %121 : vector<1x16x1xf32> to vector<16x1xf32>
    %123 = vector.broadcast %122 : vector<16x1xf32> to vector<16x32xf32>
    %124 = arith.mulf %120, %123 : vector<16x32xf32>
    %125 = arith.addf %118, %124 : vector<16x32xf32>
    %126 = vector.extract_strided_slice %73 {offsets = [0, 256], sizes = [16, 32], strides = [1, 1]} : vector<16x288xf32> to vector<16x32xf32>
    %c11_i32 = arith.constant 11 : i32
    %127 = tpu.dynamic_rotate %126 by %c11_i32 dim 0 : vector<16x32xf32>, i32 -> vector<16x32xf32>
    %c8_61 = arith.constant 8 : index
    %c0_62 = arith.constant 0 : index
    %c0_63 = arith.constant 0 : index
    %128 = vector.load %arg3[%c8_61, %c0_62, %c0_63] : memref<9x16x1xf32, #tpu.memory_space<vmem>>, vector<1x16x1xf32>
    %129 = vector.shape_cast %128 : vector<1x16x1xf32> to vector<16x1xf32>
    %130 = vector.broadcast %129 : vector<16x1xf32> to vector<16x32xf32>
    %131 = arith.mulf %127, %130 : vector<16x32xf32>
    %132 = arith.addf %125, %131 : vector<16x32xf32>
    %c0_64 = arith.constant 0 : index
    %c0_65 = arith.constant 0 : index
    %c0_66 = arith.constant 0 : index
    %133 = vector.load %arg8[%c0_64, %c0_65, %c0_66] : memref<2x1x32xf32, #tpu.memory_space<vmem>>, vector<1x1x32xf32>
    %134 = vector.shape_cast %133 : vector<1x1x32xf32> to vector<1x32xf32>
    %135 = vector.broadcast %134 : vector<1x32xf32> to vector<16x32xf32>
    %136 = arith.addf %132, %135 : vector<16x32xf32>
    %cst_67 = arith.constant 0.000000e+00 : f32
    %137 = vector.broadcast %cst_67 : f32 to vector<16x32xf32>
    %138 = arith.maximumf %136, %137 : vector<16x32xf32>
    %c0_68 = arith.constant 0 : index
    %c0_69 = arith.constant 0 : index
    %139 = vector.load %arg12[%c0_68, %c0_69] : memref<16x32xf32, #tpu.memory_space<vmem>>, vector<16x32xf32>
    tpu.vector_store %arg12[%c0_68, %c0_69], %138 {strides = array<i32>} : memref<16x32xf32, #tpu.memory_space<vmem>>, vector<16x32xf32>,
    %c0_70 = arith.constant 0 : index
    %c0_71 = arith.constant 0 : index
    %140 = vector.load %arg12[%c0_70, %c0_71] : memref<16x32xf32, #tpu.memory_space<vmem>>, vector<16x32xf32>
    %141 = arith.truncf %140 : vector<16x32xf32> to vector<16x32xbf16>
    %c1_72 = arith.constant 1 : index
    %c0_73 = arith.constant 0 : index
    %c0_74 = arith.constant 0 : index
    %142 = vector.load %arg7[%c1_72, %c0_73, %c0_74] : memref<2x32x288xbf16, #tpu.memory_space<vmem>>, vector<1x32x288xbf16>
    %143 = vector.shape_cast %142 : vector<1x32x288xbf16> to vector<32x288xbf16>
    %cst_75 = arith.constant dense<0.000000e+00> : vector<16x288xf32>
    %144 = tpu.matmul %141, %143, %cst_75 {dimension_numbers = #tpu.dot_dimension_numbers<[1], [0], [0], [1], [0, 0, 1, 1], [], []>} : vector<16x32xbf16>, vector<32x288xbf16>, vector<16x288xf32> -> vector<16x288xf32>
    %cst_76 = arith.constant 0.000000e+00 : f32
    %145 = vector.broadcast %cst_76 : f32 to vector<16x32xf32>
    %146 = vector.extract_strided_slice %144 {offsets = [0, 0], sizes = [16, 32], strides = [1, 1]} : vector<16x288xf32> to vector<16x32xf32>
    %c5_i32_77 = arith.constant 5 : i32
    %147 = tpu.dynamic_rotate %146 by %c5_i32_77 dim 0 : vector<16x32xf32>, i32 -> vector<16x32xf32>
    %c0_78 = arith.constant 0 : index
    %c0_79 = arith.constant 0 : index
    %c0_80 = arith.constant 0 : index
    %148 = vector.load %arg3[%c0_78, %c0_79, %c0_80] : memref<9x16x1xf32, #tpu.memory_space<vmem>>, vector<1x16x1xf32>
    %149 = vector.shape_cast %148 : vector<1x16x1xf32> to vector<16x1xf32>
    %150 = vector.broadcast %149 : vector<16x1xf32> to vector<16x32xf32>
    %151 = arith.mulf %147, %150 : vector<16x32xf32>
    %152 = arith.addf %145, %151 : vector<16x32xf32>
    %153 = vector.extract_strided_slice %144 {offsets = [0, 32], sizes = [16, 32], strides = [1, 1]} : vector<16x288xf32> to vector<16x32xf32>
    %c4_i32_81 = arith.constant 4 : i32
    %154 = tpu.dynamic_rotate %153 by %c4_i32_81 dim 0 : vector<16x32xf32>, i32 -> vector<16x32xf32>
    %c1_82 = arith.constant 1 : index
    %c0_83 = arith.constant 0 : index
    %c0_84 = arith.constant 0 : index
    %155 = vector.load %arg3[%c1_82, %c0_83, %c0_84] : memref<9x16x1xf32, #tpu.memory_space<vmem>>, vector<1x16x1xf32>
    %156 = vector.shape_cast %155 : vector<1x16x1xf32> to vector<16x1xf32>
    %157 = vector.broadcast %156 : vector<16x1xf32> to vector<16x32xf32>
    %158 = arith.mulf %154, %157 : vector<16x32xf32>
    %159 = arith.addf %152, %158 : vector<16x32xf32>
    %160 = vector.extract_strided_slice %144 {offsets = [0, 64], sizes = [16, 32], strides = [1, 1]} : vector<16x288xf32> to vector<16x32xf32>
    %c3_i32_85 = arith.constant 3 : i32
    %161 = tpu.dynamic_rotate %160 by %c3_i32_85 dim 0 : vector<16x32xf32>, i32 -> vector<16x32xf32>
    %c2_86 = arith.constant 2 : index
    %c0_87 = arith.constant 0 : index
    %c0_88 = arith.constant 0 : index
    %162 = vector.load %arg3[%c2_86, %c0_87, %c0_88] : memref<9x16x1xf32, #tpu.memory_space<vmem>>, vector<1x16x1xf32>
    %163 = vector.shape_cast %162 : vector<1x16x1xf32> to vector<16x1xf32>
    %164 = vector.broadcast %163 : vector<16x1xf32> to vector<16x32xf32>
    %165 = arith.mulf %161, %164 : vector<16x32xf32>
    %166 = arith.addf %159, %165 : vector<16x32xf32>
    %167 = vector.extract_strided_slice %144 {offsets = [0, 96], sizes = [16, 32], strides = [1, 1]} : vector<16x288xf32> to vector<16x32xf32>
    %c1_i32_89 = arith.constant 1 : i32
    %168 = tpu.dynamic_rotate %167 by %c1_i32_89 dim 0 : vector<16x32xf32>, i32 -> vector<16x32xf32>
    %c3_90 = arith.constant 3 : index
    %c0_91 = arith.constant 0 : index
    %c0_92 = arith.constant 0 : index
    %169 = vector.load %arg3[%c3_90, %c0_91, %c0_92] : memref<9x16x1xf32, #tpu.memory_space<vmem>>, vector<1x16x1xf32>
    %170 = vector.shape_cast %169 : vector<1x16x1xf32> to vector<16x1xf32>
    %171 = vector.broadcast %170 : vector<16x1xf32> to vector<16x32xf32>
    %172 = arith.mulf %168, %171 : vector<16x32xf32>
    %173 = arith.addf %166, %172 : vector<16x32xf32>
    %174 = vector.extract_strided_slice %144 {offsets = [0, 128], sizes = [16, 32], strides = [1, 1]} : vector<16x288xf32> to vector<16x32xf32>
    %175 = arith.addf %173, %174 : vector<16x32xf32>
    %176 = vector.extract_strided_slice %144 {offsets = [0, 160], sizes = [16, 32], strides = [1, 1]} : vector<16x288xf32> to vector<16x32xf32>
    %c15_i32_93 = arith.constant 15 : i32
    %177 = tpu.dynamic_rotate %176 by %c15_i32_93 dim 0 : vector<16x32xf32>, i32 -> vector<16x32xf32>
    %c5_94 = arith.constant 5 : index
    %c0_95 = arith.constant 0 : index
    %c0_96 = arith.constant 0 : index
    %178 = vector.load %arg3[%c5_94, %c0_95, %c0_96] : memref<9x16x1xf32, #tpu.memory_space<vmem>>, vector<1x16x1xf32>
    %179 = vector.shape_cast %178 : vector<1x16x1xf32> to vector<16x1xf32>
    %180 = vector.broadcast %179 : vector<16x1xf32> to vector<16x32xf32>
    %181 = arith.mulf %177, %180 : vector<16x32xf32>
    %182 = arith.addf %175, %181 : vector<16x32xf32>
    %183 = vector.extract_strided_slice %144 {offsets = [0, 192], sizes = [16, 32], strides = [1, 1]} : vector<16x288xf32> to vector<16x32xf32>
    %c13_i32_97 = arith.constant 13 : i32
    %184 = tpu.dynamic_rotate %183 by %c13_i32_97 dim 0 : vector<16x32xf32>, i32 -> vector<16x32xf32>
    %c6_98 = arith.constant 6 : index
    %c0_99 = arith.constant 0 : index
    %c0_100 = arith.constant 0 : index
    %185 = vector.load %arg3[%c6_98, %c0_99, %c0_100] : memref<9x16x1xf32, #tpu.memory_space<vmem>>, vector<1x16x1xf32>
    %186 = vector.shape_cast %185 : vector<1x16x1xf32> to vector<16x1xf32>
    %187 = vector.broadcast %186 : vector<16x1xf32> to vector<16x32xf32>
    %188 = arith.mulf %184, %187 : vector<16x32xf32>
    %189 = arith.addf %182, %188 : vector<16x32xf32>
    %190 = vector.extract_strided_slice %144 {offsets = [0, 224], sizes = [16, 32], strides = [1, 1]} : vector<16x288xf32> to vector<16x32xf32>
    %c12_i32_101 = arith.constant 12 : i32
    %191 = tpu.dynamic_rotate %190 by %c12_i32_101 dim 0 : vector<16x32xf32>, i32 -> vector<16x32xf32>
    %c7_102 = arith.constant 7 : index
    %c0_103 = arith.constant 0 : index
    %c0_104 = arith.constant 0 : index
    %192 = vector.load %arg3[%c7_102, %c0_103, %c0_104] : memref<9x16x1xf32, #tpu.memory_space<vmem>>, vector<1x16x1xf32>
    %193 = vector.shape_cast %192 : vector<1x16x1xf32> to vector<16x1xf32>
    %194 = vector.broadcast %193 : vector<16x1xf32> to vector<16x32xf32>
    %195 = arith.mulf %191, %194 : vector<16x32xf32>
    %196 = arith.addf %189, %195 : vector<16x32xf32>
    %197 = vector.extract_strided_slice %144 {offsets = [0, 256], sizes = [16, 32], strides = [1, 1]} : vector<16x288xf32> to vector<16x32xf32>
    %c11_i32_105 = arith.constant 11 : i32
    %198 = tpu.dynamic_rotate %197 by %c11_i32_105 dim 0 : vector<16x32xf32>, i32 -> vector<16x32xf32>
    %c8_106 = arith.constant 8 : index
    %c0_107 = arith.constant 0 : index
    %c0_108 = arith.constant 0 : index
    %199 = vector.load %arg3[%c8_106, %c0_107, %c0_108] : memref<9x16x1xf32, #tpu.memory_space<vmem>>, vector<1x16x1xf32>
    %200 = vector.shape_cast %199 : vector<1x16x1xf32> to vector<16x1xf32>
    %201 = vector.broadcast %200 : vector<16x1xf32> to vector<16x32xf32>
    %202 = arith.mulf %198, %201 : vector<16x32xf32>
    %203 = arith.addf %196, %202 : vector<16x32xf32>
    %c1_109 = arith.constant 1 : index
    %c0_110 = arith.constant 0 : index
    %c0_111 = arith.constant 0 : index
    %204 = vector.load %arg8[%c1_109, %c0_110, %c0_111] : memref<2x1x32xf32, #tpu.memory_space<vmem>>, vector<1x1x32xf32>
    %205 = vector.shape_cast %204 : vector<1x1x32xf32> to vector<1x32xf32>
    %206 = vector.broadcast %205 : vector<1x32xf32> to vector<16x32xf32>
    %207 = arith.addf %203, %206 : vector<16x32xf32>
    %cst_112 = arith.constant 0.000000e+00 : f32
    %208 = vector.broadcast %cst_112 : f32 to vector<16x32xf32>
    %209 = arith.maximumf %207, %208 : vector<16x32xf32>
    %c0_113 = arith.constant 0 : index
    %c0_114 = arith.constant 0 : index
    %210 = vector.load %arg12[%c0_113, %c0_114] : memref<16x32xf32, #tpu.memory_space<vmem>>, vector<16x32xf32>
    tpu.vector_store %arg12[%c0_113, %c0_114], %209 {strides = array<i32>} : memref<16x32xf32, #tpu.memory_space<vmem>>, vector<16x32xf32>,
    %c0_115 = arith.constant 0 : index
    %c0_116 = arith.constant 0 : index
    %211 = vector.load %arg12[%c0_115, %c0_116] : memref<16x32xf32, #tpu.memory_space<vmem>>, vector<16x32xf32>
    %c0_117 = arith.constant 0 : index
    %c0_118 = arith.constant 0 : index
    %c0_119 = arith.constant 0 : index
    %212 = vector.load %arg2[%c0_117, %c0_118, %c0_119] : memref<1x16x32xf32, #tpu.memory_space<vmem>>, vector<1x16x32xf32>
    %213 = vector.shape_cast %212 : vector<1x16x32xf32> to vector<16x32xf32>
    %214 = arith.mulf %211, %213 : vector<16x32xf32>
    %c0_120 = arith.constant 0 : index
    %c0_121 = arith.constant 0 : index
    %215 = vector.load %arg9[%c0_120, %c0_121] : memref<1x32xf32, #tpu.memory_space<vmem>>, vector<1x32xf32>
    %216 = tpu.transpose %214, [1, 0] : vector<16x32xf32> -> vector<32x16xf32>
    %cst_122 = arith.constant dense<0.000000e+00> : vector<1x16xf32>
    %217 = tpu.matmul %215, %216, %cst_122 {dimension_numbers = #tpu.dot_dimension_numbers<[1], [0], [0], [1], [0, 0, 1, 1], [], []>} : vector<1x32xf32>, vector<32x16xf32>, vector<1x16xf32> -> vector<1x16xf32>
    %c0_123 = arith.constant 0 : index
    %c0_124 = arith.constant 0 : index
    %218 = vector.load %arg10[%c0_123, %c0_124] : memref<1x1xf32, #tpu.memory_space<vmem>>, vector<1x1xf32>
    %219 = vector.broadcast %218 : vector<1x1xf32> to vector<1x16xf32>
    %220 = arith.addf %217, %219 : vector<1x16xf32>
    %c0_125 = arith.constant 0 : index
    %c0_126 = arith.constant 0 : index
    %c0_127 = arith.constant 0 : index
    %221 = vector.load %arg11[%c0_125, %c0_126, %c0_127] : memref<1x1x16xf32, #tpu.memory_space<vmem>>, vector<1x1x16xf32>
    %222 = vector.shape_cast %221 : vector<1x1x16xf32> to vector<1x16xf32>
    %223 = vector.shape_cast %220 : vector<1x16xf32> to vector<1x1x16xf32>
    tpu.vector_store %arg11[%c0_125, %c0_126, %c0_127], %223 {strides = array<i32>} : memref<1x1x16xf32, #tpu.memory_space<vmem>>, vector<1x1x16xf32>,
    return
  }
  func.func @transform_0(%arg0: i32) -> (i32, i32, i32) {
    %c0_i32 = arith.constant 0 : i32
    %c0_i32_0 = arith.constant 0 : i32
    %c0_i32_1 = arith.constant 0 : i32
    return %arg0, %c0_i32, %c0_i32_0 : i32, i32, i32
  }
  func.func @transform_1(%arg0: i32) -> (i32, i32, i32) {
    %c0_i32 = arith.constant 0 : i32
    %c0_i32_0 = arith.constant 0 : i32
    %c0_i32_1 = arith.constant 0 : i32
    return %arg0, %c0_i32, %c0_i32_0 : i32, i32, i32
  }
  func.func @transform_2(%arg0: i32) -> (i32, i32, i32) {
    %c0_i32 = arith.constant 0 : i32
    %c0_i32_0 = arith.constant 0 : i32
    %c0_i32_1 = arith.constant 0 : i32
    %c0_i32_2 = arith.constant 0 : i32
    return %c0_i32, %c0_i32_0, %c0_i32_1 : i32, i32, i32
  }
  func.func @transform_3(%arg0: i32) -> (i32, i32, i32) {
    %c0_i32 = arith.constant 0 : i32
    %c0_i32_0 = arith.constant 0 : i32
    %c0_i32_1 = arith.constant 0 : i32
    return %arg0, %c0_i32, %c0_i32_0 : i32, i32, i32
  }
  func.func @transform_4(%arg0: i32) -> (i32, i32) {
    %c0_i32 = arith.constant 0 : i32
    %c0_i32_0 = arith.constant 0 : i32
    %c0_i32_1 = arith.constant 0 : i32
    return %c0_i32, %c0_i32_0 : i32, i32
  }
  func.func @transform_5(%arg0: i32) -> (i32, i32) {
    %c0_i32 = arith.constant 0 : i32
    %c0_i32_0 = arith.constant 0 : i32
    %c0_i32_1 = arith.constant 0 : i32
    return %c0_i32, %c0_i32_0 : i32, i32
  }
  func.func @transform_6(%arg0: i32) -> (i32, i32, i32) {
    %c0_i32 = arith.constant 0 : i32
    %c0_i32_0 = arith.constant 0 : i32
    %c0_i32_1 = arith.constant 0 : i32
    %c0_i32_2 = arith.constant 0 : i32
    return %c0_i32, %c0_i32_0, %c0_i32_1 : i32, i32, i32
  }
  func.func @transform_7(%arg0: i32) -> (i32, i32, i32) {
    %c0_i32 = arith.constant 0 : i32
    %c0_i32_0 = arith.constant 0 : i32
    %c0_i32_1 = arith.constant 0 : i32
    %c0_i32_2 = arith.constant 0 : i32
    return %c0_i32, %c0_i32_0, %c0_i32_1 : i32, i32, i32
  }
  func.func @transform_8(%arg0: i32) -> (i32, i32) {
    %c0_i32 = arith.constant 0 : i32
    %c0_i32_0 = arith.constant 0 : i32
    %c0_i32_1 = arith.constant 0 : i32
    return %c0_i32, %c0_i32_0 : i32, i32
  }
  func.func @transform_9(%arg0: i32) -> (i32, i32) {
    %c0_i32 = arith.constant 0 : i32
    %c0_i32_0 = arith.constant 0 : i32
    %c0_i32_1 = arith.constant 0 : i32
    return %c0_i32, %c0_i32_0 : i32, i32
  }
  func.func @transform_10(%arg0: i32) -> (i32, i32, i32) {
    %c0_i32 = arith.constant 0 : i32
    %c0_i32_0 = arith.constant 0 : i32
    %c0_i32_1 = arith.constant 0 : i32
    return %arg0, %c0_i32, %c0_i32_0 : i32, i32, i32
  }
}

</mosaic_0001>

<bundles_post_ra>
// kernel: squeeze.4
= control target key start
LH: loop header
LB: loop body
LE: loop exit
PB: predicated region body
PF: predicated region fallthrough
CT: control target
= control target key end

     0   :  { %s66_s8 = smov 122   ;;  %vm7_vm0 = vcmask 15360   ;;  %s67_s11 = smov 124   ;;  %s117_s0 = inlined_call_operand.vmem [shape: f32[2,16], index: 0, kind: input, shape index: {}]   ;;  %s118_s1 = inlined_call_operand.vmem [shape: f32[2,8,2], index: 1, kind: output, shape index: {}]  }
   0x1   :  { %v4_v0 = vld [vmem:[%s117_s0] sm:$0x3]  ;;  %s65_s0 = smov 126   ;;  %s68_s12 = smov 120  }
   0x2   :  { %5 = vst [vmem:[#allocation0] sm:$0x3] %v4_v0  ;;  %s69_s13 = smov 118   ;;  %s70_s14 = smov 116  }
   0x3   :  { %s71_s15 = smov 114  }
   0x9   :  { %v9_v1 = vld [vmem:[#allocation0] sm:$0x3]  }
   0xa   :  { %v21_v2 = vld [vmem:[#allocation0] sm:$0x3]   ;;  %10 = vrot.lane.b32.xlu0 %v9_v1, %s65_s0 }
   0xb   :  { %22 = vrot.lane.b32.xlu1 %v21_v2, %s66_s8  ;;  %v15_v3 = vld [vmem:[#allocation0] sm:$0x3]  }
   0xc   :  { %v27_v4 = vld [vmem:[#allocation0] sm:$0x3]  }
   0xd   :  { %v6_v5 = vld [vmem:[#allocation0] sm:$0x3]  }
   0xe   :  { %8 = vst.msk [vmem:[%s118_s1] ss:$8 sm:$0x3] %vm7_vm0, %v6_v5   ;;  %16 = vrot.lane.b32.xlu0 %v15_v3, %s67_s11  ;;  %v33_v6 = vld [vmem:[#allocation0] sm:$0x3]  }
   0xf   :  { %28 = vrot.lane.b32.xlu1 %v27_v4, %s68_s12  ;;  %v39_v7 = vld [vmem:[#allocation0] sm:$0x3]  }
  0x10   :  { %v45_v8 = vld [vmem:[#allocation0] sm:$0x3]  }
  0x12   :  { %34 = vrot.lane.b32.xlu0 %v33_v6, %s69_s13 }
  0x13   :  { %40 = vrot.lane.b32.xlu1 %v39_v7, %s70_s14 }
  0x16   :  { %46 = vrot.lane.b32.xlu0 %v45_v8, %s71_s15 }
  0x7c   :  { %v11_v9 = vpop.permute.xlu0 %10  }
  0x7d   :  { %v23_v10 = vpop.permute.xlu1 %22   ;;  %51 = vst.msk [vmem:[%s118_s1 + $0x1] ss:$8 sm:$0x3] %vm7_vm0, %v11_v9  }
  0x7e   :  { %53 = vst.msk [vmem:[%s118_s1 + $0x3] ss:$8 sm:$0x3] %vm7_vm0, %v23_v10  }
  0x80   :  { %v17_v11 = vpop.permute.xlu0 %16  }
  0x81   :  { %v29_v12 = vpop.permute.xlu1 %28   ;;  %52 = vst.msk [vmem:[%s118_s1 + $0x2] ss:$8 sm:$0x3] %vm7_vm0, %v17_v11  }
  0x82   :  { %54 = vst.msk [vmem:[%s118_s1 + $0x4] ss:$8 sm:$0x3] %vm7_vm0, %v29_v12  }
  0x84   :  { %v35_v13 = vpop.permute.xlu0 %34  }
  0x85   :  { %v41_v14 = vpop.permute.xlu1 %40   ;;  %55 = vst.msk [vmem:[%s118_s1 + $0x5] ss:$8 sm:$0x3] %vm7_vm0, %v35_v13  }
  0x86   :  { %56 = vst.msk [vmem:[%s118_s1 + $0x6] ss:$8 sm:$0x3] %vm7_vm0, %v41_v14  }
  0x88   :  { %v47_v15 = vpop.permute.xlu0 %46  }
  0x89   :  { %57 = vst.msk [vmem:[%s118_s1 + $0x7] ss:$8 sm:$0x3] %vm7_vm0, %v47_v15  }

// kernel: custom-call.2
= control target key start
LH: loop header
LB: loop body
LE: loop exit
PB: predicated region body
PF: predicated region fallthrough
CT: control target
= control target key end

     0   :  { %s6_s0 = inlined_call_operand.vmem [shape: f32[2,32], index: 0, kind: output, shape index: {}]  }

// kernel: custom-call.4
= control target key start
LH: loop header
LB: loop body
LE: loop exit
PB: predicated region body
PF: predicated region fallthrough
CT: control target
= control target key end

     0   :  { %s6_s0 = inlined_call_operand.vmem [shape: f32[8,2,32], index: 0, kind: output, shape index: {}]  }

// kernel: multiscale_tan_forward.3
= control target key start
LH: loop header
LB: loop body
LE: loop exit
PB: predicated region body
PF: predicated region fallthrough
CT: control target
= control target key end

     0   :  { %s1643_s15 = smov 0   ;;  %s2049_s0 = inlined_call_operand.vmem [shape: f32[2,4,32], index: 0, kind: input, shape index: {}]   ;;  %s2050_s1 = inlined_call_operand.vmem [shape: f32[2,16,32], index: 1, kind: input, shape index: {}]   ;;  %s2051_s2 = inlined_call_operand.vmem [shape: f32[9,16,1], index: 2, kind: input, shape index: {}]   ;;  %s2052_s3 = inlined_call_operand.vmem [shape: f32[2,1,32], index: 3, kind: input, shape index: {}]   ;;  %s2053_s4 = inlined_call_operand.vmem [shape: bf16[32,32], index: 4, kind: input, shape index: {}]   ;;  %s2054_s5 = inlined_call_operand.vmem [shape: f32[1,32], index: 5, kind: input, shape index: {}]   ;;  %s2055_s6 = inlined_call_operand.vmem [shape: bf16[2,32,288], index: 6, kind: input, shape index: {}]   ;;  %s2056_s7 = inlined_call_operand.vmem [shape: f32[2,1,32], index: 7, kind: input, shape index: {}]   ;;  %s2057_s8 = inlined_call_operand.vmem [shape: f32[1,32], index: 8, kind: input, shape index: {}]   ;;  %s2058_s9 = inlined_call_operand.<no memory space> [shape: f32[1,1], index: 9, kind: input, shape index: {}]   ;;  %s2059_s10 = inlined_call_operand.vmem [shape: f32[2,1,16], index: 10, kind: output, shape index: {}]  }
   0x1   :  { %v15_v0 = vstv %s2058_s9 }
   0x2   :  { %16 = vst [vmem:[#allocation3] sm:$0x1] %v15_v0 }
   0x3 LB: > { %s1406_s16 = sadd.s32 4294967295, %s1576_s15   ;;  %p1410_p0 = scmp.ge.s32.totalorder %s1576_s15, 1  ;;  %s1576_s15 = sphi %s1643_s15, %s22_s15  }
   0x4   : > { %p331_p1 = scmp.lt.s32.totalorder %s1576_s15, 3 }
   0x6   : > { %p332_p2 = pnand %p1410_p0, %p331_p1 }
   0x7   : > { %v1548_v1 = vld [vmem:[%s2053_s4] sm:$0xff] (!%p332_p2)   ;;  %v390_v2 = vlaneseq (!%p332_p2)  ;;  %v1578_v3 = vmov (!%p332_p2), 0.0   ;;  %v1549_v4 = vld [vmem:[%s2053_s4 + $0x8] sm:$0xff] (!%p332_p2)   ;;  %vm1579_vm0 = vmmov (!%p332_p2), 0   ;;  %p374_p3 = scmp.lt.s32.totalorder (!%p332_p2), %s1406_s16, 1  ;;  %vm401_vm1 = vcmask (!%p332_p2), 257024  }
   0x8   : > { %335 = sbr.rel (%p332_p2) target bundleno = 1405 (0x57d), region = 60  ;;  %1496 = vmatprep.subr.bf16.mxu0 (!%p332_p2), %v1578_v3  ;;  %1500 = vmatprep.mubr.msk.bf16.mxu0 (!%p332_p2), %vm1579_vm0, %v1578_v3  ;;  %vm462_vm5 = vcmask (!%p332_p2), 261120   ;;  %v1418_v19 = vld [vmem:[%s2054_s5] ss:$0 sm:$0xff] (!%p332_p2)  ;;  %v1550_v33 = vld [vmem:[%s2055_s6 + $0x4] ss:$12 sps:$4 sm:$0xff] (!%p332_p2)  }
   0x9   : > { %1497 = vmatpush3.bf16.msra.mxu0 (!%p332_p2), %v1548_v1  ;;  %v1660_v5 = vshrl.u32 (!%p332_p2), %v390_v2, 7  ;;  %v1552_v34 = vld [vmem:[%s2055_s6] ss:$12 sps:$4 sm:$0xff] (!%p332_p2)   ;;  %v1553_v35 = vld [vmem:[%s2055_s6 + $0x8] ss:$12 sps:$4 sm:$0xff] (!%p332_p2)   ;;  %582 = vmatprep.subr.bf16.mxu1 (!%p332_p2), %v1550_v33  ;;  %v1580_v39 = vmov (!%p332_p2), 0   ;;  %vm1529_vm11 = vmpackc.low (!%p332_p2), %vm462_vm5, %vm462_vm5 }
   0xa   : > { %1498 = vmatprep.subr.bf16.mxu0 (!%p332_p2), %v1578_v3  ;;  %v1554_v36 = vld [vmem:[%s2055_s6 + $0x1c] ss:$12 sps:$4 sm:$0xff] (!%p332_p2)   ;;  %v1557_v37 = vld [vmem:[%s2055_s6 + $0x20] ss:$12 sps:$4 sm:$0xff] (!%p332_p2)   ;;  %583 = vmatpush1.bf16.msra.mxu1 (!%p332_p2), %v1552_v34  ;;  %v1556_v38 = vld [vmem:[%s2055_s6 + $0x18] ss:$12 sps:$4 sm:$0xff] (!%p332_p2)  }
   0xb   : > { %vm397_vm2 = vcmp.ge.s32.totalorder (!%p332_p2), %v1660_v5, 3  ;;  %vm409_vm3 = vcmp.ge.s32.totalorder (!%p332_p2), %v1660_v5, 2  ;;  %vm420_vm4 = vcmp.ge.s32.totalorder (!%p332_p2), %v1660_v5, 1  ;;  %584 = vmatprep.subr.bf16.mxu1 (!%p332_p2), %v1554_v36  ;;  %614 = vmatprep.mubr.bf16.mxu1 (!%p332_p2), %v1580_v39  ;;  %v1720_v40 = vld [vmem:[%s2051_s2] sm:$0xff] (!%p332_p2)  ;;  %v1726_v41 = vld [vmem:[%s2051_s2 + $0x8] sm:$0xff] (!%p332_p2)  ;;  %v1731_v42 = vld [vmem:[%s2051_s2 + $0x10] sm:$0xff] (!%p332_p2) }
   0xc   : > { %1546 = vset.pattern.permute.xlu1 (!%p332_p2), %v1580_v39  ;;  %1547 = vset.pattern.permute.xlu0 (!%p332_p2), %v1580_v39  ;;  %v1737_v43 = vld [vmem:[%s2051_s2 + $0x50] sm:$0xff] (!%p332_p2)  ;;  %v1743_v44 = vld [vmem:[%s2051_s2 + $0x18] sm:$0xff] (!%p332_p2)  ;;  %v1749_v45 = vld [vmem:[%s2051_s2 + $0x60] sm:$0xff] (!%p332_p2)  ;;  %vm668_vm6 = vcmp.lt.s32.totalorder (!%p332_p2), %v1660_v5, 5  ;;  %vm725_vm7 = vcmp.lt.s32.totalorder (!%p332_p2), %v1660_v5, 3  ;;  %s1582_s21 = smov (!%p332_p2), 64  }
   0xd   : > { %1499 = vmatpush3.bf16.msra.mxu0 (!%p332_p2), %v1549_v4  ;;  %675 = vperm.xlu1 (!%p332_p2), %1546, %v1720_v40   ;;  %v1755_v46 = vld [vmem:[%s2051_s2 + $0x20] sm:$0xff] (!%p332_p2)  ;;  %v1761_v47 = vld [vmem:[%s2051_s2 + $0x70] sm:$0xff] (!%p332_p2)  ;;  %v1767_v48 = vld [vmem:[%s2051_s2 + $0x28] sm:$0xff] (!%p332_p2)  ;;  %s1583_s22 = smov (!%p332_p2), 32   ;;  %vm697_vm8 = vcmp.lt.s32.totalorder (!%p332_p2), %v1660_v5, 4  ;;  %vm753_vm9 = vcmp.lt.s32.totalorder (!%p332_p2), %v1660_v5, 1 }
   0xe   : > { %1504 = vmatprep.subr.bf16.mxu0 (!%p332_p2), %v1578_v3  ;;  %585 = vmatpush1.bf16.msra.mxu1 (!%p332_p2), %v1556_v38  ;;  %v1773_v49 = vld [vmem:[%s2051_s2 + $0x80] sm:$0xff] (!%p332_p2)  ;;  %v1779_v50 = vld [vmem:[%s2051_s2 + $0x30] sm:$0xff] (!%p332_p2)  ;;  %v1786_v51 = vld [vmem:[%s2051_s2 + $0x38] sm:$0xff] (!%p332_p2)  ;;  %vm785_vm10 = vcmp.lt.s32.totalorder (!%p332_p2), %v1660_v5, 7  ;;  %vm1336_vm12 = vcmask (!%p332_p2), 122880  }
   0xf   : > { %s2061_s16 = smov (!%p374_p3, %s1406_s16), 1  ;;  %v1792_v52 = vld [vmem:[%s2051_s2 + $0x58] sm:$0xff]  ;;  %v1798_v53 = vld [vmem:[%s2051_s2 + $0x68] sm:$0xff] }
  0x10   : > { %s1411_s20 = sshll.u32 %s2061_s16, 2  ;;  %s385_s26 = scalar_lea.vmem %s2052_s3, %s2061_s16  ;;  %v1804_v54 = vld [vmem:[%s2051_s2 + $0x78] sm:$0xff]  ;;  %v1810_v55 = vld [vmem:[%s2051_s2 + $0x88] sm:$0xff] }
  0x11   : > { %s377_s23 = scalar_lea.vmem %s2049_s0, %s1411_s20  ;;  %v1422_v21 = vld [vmem:[%s385_s26] ss:$0 sm:$0xff]  ;;  %680 = vperm.xlu1 %1546, %v1726_v41   ;;  %s1483_s17 = sshll.u32 %s2061_s16, 4 }
  0x12   : > { %v1414_v6 = vld [vmem:[%s377_s23 + $0x3] ss:$0 sm:$0xff]  ;;  %v1415_v7 = vld [vmem:[%s377_s23 + $0x2] ss:$0 sm:$0xff]  ;;  %v1416_v8 = vld [vmem:[%s377_s23 + $0x1] ss:$0 sm:$0xff]  ;;  %s382_s19 = scalar_lea.vmem %s2050_s1, %s1483_s17  ;;  %s388_s24 = scalar_lea.vmem %s2059_s10, %s2061_s16 }
  0x13   : > { %v400_v9 = vsel %vm397_vm2, %v1414_v6, 0.0  ;;  %v408_v10 = vmax.f32 %v1414_v6, %v1415_v7  ;;  %v1417_v11 = vld [vmem:[%s377_s23] ss:$0 sm:$0xff]  ;;  %v1821_v1 = vld [vmem:[%s382_s19 + $0x8] sm:$0xff]  ;;  %s1581_s20 = smov 96  }
  0x14   : > { %402 = vst.msk [vmem:[#allocation2 + $0xc] sm:$0xf] %vm401_vm1, %v400_v9  ;;  %v1817_v61 = vld [vmem:[%s382_s19] sm:$0xff] }
  0x15   : > { %v412_v12 = vsel %vm409_vm3, %v408_v10, 0.0  ;;  %v419_v13 = vmax.f32 %v408_v10, %v1416_v8  ;;  %710 = vperm.xlu1 %1546, %v1743_v44  }
  0x16   : > { %413 = vst.msk [vmem:[#allocation2 + $0x8] sm:$0xf] %vm401_vm1, %v412_v12 }
  0x17   : > { %v423_v14 = vsel %vm420_vm4, %v419_v13, 0.0  ;;  %v430_v15 = vmax.f32 %v419_v13, %v1417_v11 }
  0x18   : > { %424 = vst.msk [vmem:[#allocation2 + $0x4] sm:$0xf] %vm401_vm1, %v423_v14 }
  0x19   : > { %435 = vst.msk [vmem:[#allocation2] sm:$0xf] %vm401_vm1, %v430_v15  ;;  %733 = vperm.xlu1 %1546, %v1755_v46  }
  0x1d   : > { %v437_v16 = vld [vmem:[#allocation2 + $0x8] sm:$0xff]  ;;  %738 = vperm.xlu1 %1546, %v1767_v48  }
  0x20   : > { %v436_v17 = vld [vmem:[#allocation2] sm:$0xff] }
  0x21   : > { %v438_v18 = vpack.c.bf16 %v437_v16, %v436_v17  ;;  %761 = vperm.xlu1 %1546, %v1779_v50  }
  0x23   : > { %1501 = vmatmul.mubr.msk.bf16.vlgmr.msra.gmra.mrb[0].mxu0 %vm462_vm5, %v438_v18 }
  0x24   : > { %1508 = vmatprep.mubr.msk.bf16.mxu0 %vm1579_vm0, %v1578_v3  ;;  %1505 = vmatpush3.bf16.msra.mxu0 %v1553_v35 }
  0x25   : > { %1506 = vmatprep.subr.bf16.mxu0 %v1578_v3  ;;  %766 = vperm.xlu1 %1546, %v1786_v51  }
  0x28   : > { %1507 = vmatpush3.bf16.msra.mxu0 %v1557_v37 }
  0x29   : > { %1512 = vmatprep.subr.bf16.mxu0 %v1578_v3  ;;  %798 = vperm.xlu1 %1546, %v1792_v52  }
  0x2d   : > { %825 = vperm.xlu1 %1546, %v1798_v53  }
  0x31   : > { %852 = vperm.xlu1 %1546, %v1804_v54  }
  0x35   : > { %873 = vperm.xlu1 %1546, %v1810_v55  }
  0xf6   : > { %v500_v20 = vpop.f32.mrb[0].mxu0 }
  0xf7   : > { %v501_v22 = vadd.f32 %v1418_v19, %v500_v20  ;;  %v1502_v23 = vpop.f32.mrb[1].mxu0 }
  0xf8   : > { %v503_v24 = vpop.f32.mrb[2].mxu0 }
  0xf9   : > { %v1687_v25 = vmul.f32 %v1422_v21, %v501_v22  ;;  %v504_v26 = vadd.f32 %v1418_v19, %v503_v24  ;;  %v1503_v27 = vpop.f32.mrb[3].mxu0 }
  0xfa   : > { %v1558_v27 = vld [vmem:[%s2055_s6 + $0x30] ss:$12 sps:$4 sm:$0xff]  }
  0xfb   : > { %v1689_v28 = vmul.f32 %v1422_v21, %v504_v26  ;;  %v516_v29 = vmul.f32 %v1687_v25, %v1687_v25  ;;  %v676_v21 = vpop.permute.xlu1 %675 }
  0xfd   : > { %v518_v30 = vsel %vm462_vm5, %v516_v29, 0.0  ;;  %v517_v31 = vmul.f32 %v1689_v28, %v1689_v28  ;;  %v1561_v29 = vld [vmem:[%s2055_s6 + $0x38] ss:$12 sps:$4 sm:$0xff]  }
  0xfe   : > { %519 = vadd.xlane.f32.xlu0 %v518_v30  ;;  %v1562_v30 = vld [vmem:[%s2055_s6 + $0x48] ss:$12 sps:$4 sm:$0xff]  }
  0xff   : > { %v521_v32 = vsel %vm462_vm5, %v517_v31, 0.0  ;;  %v1564_v31 = vld [vmem:[%s2055_s6 + $0x4c] ss:$12 sps:$4 sm:$0xff]   ;;  %v681_v33 = vpop.permute.xlu1 %680 }
 0x102   : > { %522 = vadd.xlane.f32.xlu0 %v521_v32  ;;  %v1565_v32 = vld [vmem:[%s2055_s6 + $0x50] ss:$12 sps:$4 sm:$0xff]  }
 0x103   : > { %v711_v34 = vpop.permute.xlu1 %710 }
 0x107   : > { %v734_v35 = vpop.permute.xlu1 %733 }
 0x10b   : > { %v739_v36 = vpop.permute.xlu1 %738 }
 0x10f   : > { %v762_v37 = vpop.permute.xlu1 %761 }
 0x113   : > { %v767_v38 = vpop.permute.xlu1 %766 }
 0x118   : > { %705 = vperm.xlu0 %1547, %v1731_v42  }
 0x11c   : > { %793 = vperm.xlu0 %1547, %v1737_v43  }
 0x120   : > { %820 = vperm.xlu0 %1547, %v1749_v45  }
 0x124   : > { %847 = vperm.xlu0 %1547, %v1761_v47  }
 0x128   : > { %868 = vperm.xlu0 %1547, %v1773_v49  }
 0x18b   : > { %v520_v56 = vpop.xlane.xlu0 %519 }
 0x18c   : > { %v524_v57 = vadd.f32 1e-24, %v520_v56 }
 0x18e   : > { %1566 = vrsqrt.f32 %v524_v57 }
 0x18f   : > { %v523_v58 = vpop.xlane.xlu0 %522 }
 0x190   : > { %v525_v59 = vadd.f32 1e-24, %v523_v58 }
 0x192   : > { %1568 = vrsqrt.f32 %v525_v59 }
 0x198   : > { %v1567_v60 = vpop.eup %1566 }
 0x199   : > { %v528_v62 = vmul.f32 %v1567_v60, %v1687_v25 }
 0x19b   : > { %v532_v63 = vmul.f32 %v1817_v61, %v528_v62 }
 0x19c   : > { %v1569_v0 = vpop.eup %1568 }
 0x19d   : > { %534 = vst.msk [vmem:[#allocation2] sm:$0xff] %vm462_vm5, %v532_v63  ;;  %v529_v2 = vmul.f32 %v1569_v0, %v1689_v28  ;;  %v1560_v28 = vld [vmem:[%s2055_s6 + $0x34] ss:$12 sps:$4 sm:$0xff]  }
 0x19e   : > { %940 = vmatprep.subr.bf16.mxu1 %v1560_v28 }
 0x19f   : > { %v533_v4 = vmul.f32 %v1821_v1, %v529_v2 }
 0x1a1   : > { %535 = vst.msk [vmem:[#allocation2 + $0x8] sm:$0xff] %vm462_vm5, %v533_v4 }
 0x1a4   : > { %v536_v6 = vld [vmem:[#allocation2] sm:$0xff] }
 0x1a8   : > { %v537_v7 = vld [vmem:[#allocation2 + $0x8] sm:$0xff] }
 0x1a9   : > { %v538_v8 = vpack.c.bf16 %v537_v7, %v536_v6 }
 0x1ab   : > { %1429 = vmatmul.mubr.msk.bf16.vlgmr.msra.gmra.mrb[0].mxu1 %vm462_vm5, %v538_v8  ;;  %1509 = vmatmul.mubr.msk.bf16.vlgmr.msra.gmra.mrb[4].mxu0 %vm462_vm5, %v538_v8 }
 0x1ac   : > { %972 = vmatprep.mubr.bf16.mxu1 %v1580_v39  ;;  %1516 = vmatprep.mubr.msk.bf16.mxu0 %vm1579_vm0, %v1578_v3  ;;  %v799_v39 = vpop.permute.xlu1 %798 }
 0x1ad   : > { %1513 = vmatpush3.bf16.msra.mxu0 %v1561_v29  ;;  %941 = vmatpush1.bf16.msra.mxu1 %v1558_v27 }
 0x1ae   : > { %1514 = vmatprep.subr.bf16.mxu0 %v1578_v3  ;;  %942 = vmatprep.subr.bf16.mxu1 %v1564_v31 }
 0x1b1   : > { %1515 = vmatpush3.bf16.msra.mxu0 %v1565_v32  ;;  %943 = vmatpush1.bf16.msra.mxu1 %v1562_v30 }
 0x27e   : > { %v616_v9 = vpop.f32.mrb[0].mxu1  ;;  %v659_v10 = vpop.f32.mrb[4].mxu0 }
 0x27f   : > { %689 = vrot.lane.b32.xlu1 %v616_v9, %s1581_s20  ;;  %v1832_v11 = vpop.f32.mrb[1].mxu1  ;;  %v1510_v12 = vpop.f32.mrb[5].mxu0  ;;  %v666_v15 = vrot.slane %v616_v9, 3  ;;  %v859_v16 = vrot.slane %v659_v10, 5 }
 0x280   : > { %777 = vrot.lane.b32.xlu0 %v1832_v11, %s1581_s20  ;;  %v620_v13 = vpop.f32.mrb[2].mxu1  ;;  %v662_v14 = vpop.f32.mrb[6].mxu0 }
 0x281   : > { %v667_v17 = vrot.slane %v620_v13, 3  ;;  %v860_v18 = vrot.slane %v662_v14, 5  ;;  %v1838_v19 = vpop.f32.mrb[3].mxu1  ;;  %v1511_v20 = vpop.f32.mrb[7].mxu0 }
 0x283   : > { %v1842_v22 = vsel %vm668_vm6, %v666_v15, %v667_v17  ;;  %v670_v23 = vsel %vm668_vm6, %v667_v17, %v666_v15  ;;  %v1848_v24 = vsel %vm725_vm7, %v860_v18, %v859_v16  ;;  %717 = vrot.lane.b32.xlu1 %v616_v9, %s1582_s21  ;;  %v1853_v25 = vsel %vm725_vm7, %v859_v16, %v860_v18 }
 0x284   : > { %805 = vrot.lane.b32.xlu0 %v1832_v11, %s1582_s21  ;;  %v1857_v26 = vmul.f32 %v676_v21, %v670_v23  ;;  %v684_v2 = vmul.f32 %v681_v33, %v1842_v22 }
 0x287   : > { %745 = vrot.lane.b32.xlu1 %v616_v9, %s1583_s22 }
 0x288   : > { %832 = vrot.lane.b32.xlu0 %v1832_v11, %s1583_s22 }
 0x28b   : > { %691 = vrot.lane.b32.xlu1 %v620_v13, %s1581_s20 }
 0x28c   : > { %1032 = vperm.xlu0 %1547, %v1720_v40   ;;  %v826_v40 = vpop.permute.xlu1 %825 }
 0x28f   : > { %719 = vrot.lane.b32.xlu1 %v620_v13, %s1582_s21 }
 0x290   : > { %1060 = vperm.xlu0 %1547, %v1731_v42   ;;  %v1906_v42 = vpop.permute.xlu1 %852 }
 0x293   : > { %747 = vrot.lane.b32.xlu1 %v620_v13, %s1583_s22 }
 0x294   : > { %1086 = vperm.xlu0 %1547, %v1755_v46  }
 0x297   : > { %779 = vrot.lane.b32.xlu1 %v1838_v19, %s1581_s20 }
 0x298   : > { %1112 = vperm.xlu0 %1547, %v1779_v50  }
 0x29b   : > { %807 = vrot.lane.b32.xlu1 %v1838_v19, %s1582_s21 }
 0x29c   : > { %1142 = vperm.xlu0 %1547, %v1737_v43  }
 0x29f   : > { %834 = vrot.lane.b32.xlu1 %v1838_v19, %s1583_s22 }
 0x2a0   : > { %1168 = vperm.xlu0 %1547, %v1749_v45  }
 0x2a3   : > { %1037 = vperm.xlu1 %1546, %v1726_v41   ;;  %v706_v41 = vpop.permute.xlu0 %705 }
 0x2a4   : > { %1194 = vperm.xlu0 %1547, %v1761_v47  }
 0x2a7   : > { %1065 = vperm.xlu1 %1546, %v1743_v44   ;;  %v794_v43 = vpop.permute.xlu0 %793  ;;  %v1908_v44 = vpop.permute.xlu1 %873 }
 0x2a8   : > { %1214 = vperm.xlu0 %1547, %v1773_v49  }
 0x2ab   : > { %1091 = vperm.xlu1 %1546, %v1767_v48   ;;  %v821_v46 = vpop.permute.xlu0 %820 }
 0x2af   : > { %1117 = vperm.xlu1 %1546, %v1786_v51   ;;  %v848_v48 = vpop.permute.xlu0 %847 }
 0x2b3   : > { %1147 = vperm.xlu1 %1546, %v1792_v52  }
 0x2b7   : > { %1173 = vperm.xlu1 %1546, %v1798_v53   ;;  %v869_v53 = vpop.permute.xlu0 %868 }
 0x2bb   : > { %1199 = vperm.xlu1 %1546, %v1804_v54  }
 0x2bf   : > { %1219 = vperm.xlu1 %1546, %v1810_v55  }
 0x2f1   : > { %v690_v45 = vpop.permute.xlu1 %689 }
 0x2f2   : > { %v695_v51 = vrot.slane %v690_v45, 4  ;;  %v778_v59 = vpop.permute.xlu0 %777 }
 0x2f3   : > { %v783_v22 = vrot.slane %v778_v59, 1  ;;  %v1445_v59 = vld [vmem:[%s2056_s7] ss:$0 sm:$0xff] }
 0x2f5   : > { %v718_v47 = vpop.permute.xlu1 %717 }
 0x2f6   : > { %v723_v57 = vrot.slane %v718_v47, 5  ;;  %v806_v15 = vpop.permute.xlu0 %805 }
 0x2f7   : > { %v811_v33 = vrot.slane %v806_v15, 3 }
 0x2f9   : > { %v746_v49 = vpop.permute.xlu1 %745 }
 0x2fa   : > { %v751_v8 = vrot.slane %v746_v49, 7 }
 0x2fd   : > { %v692_v50 = vpop.permute.xlu1 %691 }
 0x2fe   : > { %v696_v52 = vrot.slane %v692_v50, 4 }
 0x300   : > { %v698_v54 = vsel %vm697_vm8, %v695_v51, %v696_v52  ;;  %v699_v55 = vsel %vm697_vm8, %v696_v52, %v695_v51 }
 0x301   : > { %v720_v56 = vpop.permute.xlu1 %719  ;;  %v713_v60 = vmul.f32 %v706_v41, %v699_v55  ;;  %v714_v62 = vmul.f32 %v711_v34, %v698_v54 }
 0x302   : > { %v724_v58 = vrot.slane %v720_v56, 5 }
 0x303   : > { %v715_v10 = vadd.f32 %v713_v60, %v1857_v26  ;;  %v716_v12 = vadd.f32 %v714_v62, %v684_v2 }
 0x304   : > { %v726_v63 = vsel %vm725_vm7, %v723_v57, %v724_v58  ;;  %v727_v0 = vsel %vm725_vm7, %v724_v58, %v723_v57 }
 0x305   : > { %v741_v4 = vmul.f32 %v734_v35, %v727_v0  ;;  %v742_v6 = vmul.f32 %v739_v36, %v726_v63  ;;  %v748_v7 = vpop.permute.xlu1 %747  ;;  %v833_v35 = vpop.permute.xlu0 %832 }
 0x306   : > { %v752_v9 = vrot.slane %v748_v7, 7  ;;  %v838_v50 = vrot.slane %v833_v35, 4 }
 0x307   : > { %v743_v16 = vadd.f32 %v741_v4, %v715_v10  ;;  %v744_v17 = vadd.f32 %v742_v6, %v716_v12 }
 0x308   : > { %v754_v13 = vsel %vm753_vm9, %v751_v8, %v752_v9  ;;  %v755_v14 = vsel %vm753_vm9, %v752_v9, %v751_v8 }
 0x309   : > { %v769_v18 = vmul.f32 %v762_v37, %v755_v14  ;;  %v770_v20 = vmul.f32 %v767_v38, %v754_v13  ;;  %v780_v21 = vpop.permute.xlu1 %779 }
 0x30a   : > { %v784_v23 = vrot.slane %v780_v21, 1  ;;  %v1584_v21 = vmov 0.0|0.0  }
 0x30b   : > { %v771_v27 = vadd.f32 %v769_v18, %v743_v16  ;;  %v772_v28 = vadd.f32 %v770_v20, %v744_v17  ;;  %v1247_v20 = vld [vmem:[#allocation3] sm:$0x1]  ;;  %1527 = vmatprep.subr.bf16.mxu1 %v1584_v21 }
 0x30c   : > { %v786_v26 = vsel %vm785_vm10, %v783_v22, %v784_v23  ;;  %v787_v29 = vsel %vm785_vm10, %v784_v23, %v783_v22  ;;  %v1033_v22 = vpop.permute.xlu0 %1032 }
 0x30d   : > { %v773_v30 = vadd.f32 %v771_v27, %v1832_v11  ;;  %v774_v31 = vadd.f32 %v772_v28, %v1838_v19  ;;  %v808_v32 = vpop.permute.xlu1 %807  ;;  %v801_v36 = vmul.f32 %v794_v43, %v786_v26  ;;  %v802_v37 = vmul.f32 %v799_v39, %v787_v29 }
 0x30e   : > { %v812_v34 = vrot.slane %v808_v32, 3 }
 0x30f   : > { %v803_v11 = vadd.f32 %v801_v36, %v773_v30  ;;  %v804_v52 = vadd.f32 %v802_v37, %v774_v31 }
 0x310   : > { %v813_v38 = vsel %vm668_vm6, %v811_v33, %v812_v34  ;;  %v814_v41 = vsel %vm668_vm6, %v812_v34, %v811_v33  ;;  %v1061_v27 = vpop.permute.xlu0 %1060 }
 0x311   : > { %v828_v45 = vmul.f32 %v821_v46, %v813_v38  ;;  %v829_v47 = vmul.f32 %v826_v40, %v814_v41  ;;  %v835_v49 = vpop.permute.xlu1 %834  ;;  %v877_v46 = vmul.f32 %v1908_v44, %v1848_v24  ;;  %v876_v40 = vmul.f32 %v869_v53, %v1853_v25 }
 0x312   : > { %v839_v51 = vrot.slane %v835_v49, 4 }
 0x313   : > { %v830_v39 = vadd.f32 %v828_v45, %v803_v11  ;;  %v831_v54 = vadd.f32 %v829_v47, %v804_v52 }
 0x314   : > { %v840_v19 = vsel %vm697_vm8, %v838_v50, %v839_v51  ;;  %v841_v43 = vsel %vm697_vm8, %v839_v51, %v838_v50  ;;  %v1087_v26 = vpop.permute.xlu0 %1086 }
 0x315   : > { %v855_v55 = vmul.f32 %v848_v48, %v840_v19  ;;  %v856_v56 = vmul.f32 %v1906_v42, %v841_v43 }
 0x317   : > { %v857_v57 = vadd.f32 %v855_v55, %v830_v39  ;;  %v858_v58 = vadd.f32 %v856_v56, %v831_v54 }
 0x318   : > { %v1113_v30 = vpop.permute.xlu0 %1112 }
 0x319   : > { %v878_v60 = vadd.f32 %v876_v40, %v857_v57  ;;  %v879_v62 = vadd.f32 %v877_v46, %v858_v58 }
 0x31b   : > { %v887_v63 = vadd.f32 %v1445_v59, %v878_v60  ;;  %v888_v0 = vadd.f32 %v1445_v59, %v879_v62 }
 0x31c   : > { %v1143_v32 = vpop.permute.xlu0 %1142 }
 0x31d   : > { %v889_v2 = vmax.f32 %v887_v63, 0.0  ;;  %v890_v4 = vmax.f32 %v888_v0, 0.0 }
 0x31f   : > { %891 = vst.msk [vmem:[#allocation2] sm:$0xff] %vm462_vm5, %v889_v2  ;;  %892 = vst.msk [vmem:[#allocation2 + $0x8] sm:$0xff] %vm462_vm5, %v890_v4 }
 0x320   : > { %v1169_v34 = vpop.permute.xlu0 %1168 }
 0x322   : > { %v1038_v23 = vpop.permute.xlu1 %1037 }
 0x324   : > { %v1988_v36 = vpop.permute.xlu0 %1194 }
 0x326   : > { %v893_v42 = vld [vmem:[#allocation2] sm:$0xff]  ;;  %v894_v24 = vld [vmem:[#allocation2 + $0x8] sm:$0xff]  ;;  %v1066_v28 = vpop.permute.xlu1 %1065 }
 0x327   : > { %v895_v44 = vpack.c.bf16 %v894_v24, %v893_v42 }
 0x328   : > { %v1992_v38 = vpop.permute.xlu0 %1214 }
 0x329   : > { %1460 = vmatmul.mubr.msk.bf16.vlgmr.msra.gmra.mrb[4].mxu1 %vm462_vm5, %v895_v44  ;;  %1517 = vmatmul.mubr.msk.bf16.vlgmr.msra.gmra.mrb[8].mxu0 %vm462_vm5, %v895_v44 }
 0x32a   : > { %1524 = vmatprep.mubr.msk.f32.mxu1 %vm1579_vm0, %v1578_v3  ;;  %v1092_v29 = vpop.permute.xlu1 %1091 }
 0x32e   : > { %v1118_v31 = vpop.permute.xlu1 %1117 }
 0x332   : > { %v1148_v33 = vpop.permute.xlu1 %1147 }
 0x336   : > { %v1174_v35 = vpop.permute.xlu1 %1173 }
 0x33a   : > { %v1990_v37 = vpop.permute.xlu1 %1199 }
 0x33e   : > { %v1994_v41 = vpop.permute.xlu1 %1219 }
 0x3fc   : > { %v974_v25 = vpop.f32.mrb[4].mxu1  ;;  %v1017_v48 = vpop.f32.mrb[8].mxu0 }
 0x3fd   : > { %1046 = vrot.lane.b32.xlu0 %v974_v25, %s1581_s20  ;;  %v1955_v53 = vpop.f32.mrb[5].mxu1  ;;  %v1518_v6 = vpop.f32.mrb[9].mxu0  ;;  %v1024_v9 = vrot.slane %v974_v25, 3  ;;  %v1206_v10 = vrot.slane %v1017_v48, 5 }
 0x3fe   : > { %v978_v7 = vpop.f32.mrb[6].mxu1  ;;  %v1020_v8 = vpop.f32.mrb[10].mxu0 }
 0x3ff   : > { %v1025_v12 = vrot.slane %v978_v7, 3  ;;  %v1207_v13 = vrot.slane %v1020_v8, 5  ;;  %1048 = vrot.lane.b32.xlu1 %v978_v7, %s1581_s20  ;;  %v1958_v14 = vpop.f32.mrb[7].mxu1  ;;  %v1519_v15 = vpop.f32.mrb[11].mxu0 }
 0x401   : > { %v1026_v3 = vsel %vm668_vm6, %v1024_v9, %v1025_v12  ;;  %v1027_v16 = vsel %vm668_vm6, %v1025_v12, %v1024_v9  ;;  %v1966_v17 = vsel %vm725_vm7, %v1206_v10, %v1207_v13  ;;  %v1970_v18 = vsel %vm725_vm7, %v1207_v13, %v1206_v10  ;;  %1072 = vrot.lane.b32.xlu0 %v974_v25, %s1582_s21 }
 0x402   : > { %v1040_v57 = vmul.f32 %v1033_v22, %v1027_v16  ;;  %v1041_v58 = vmul.f32 %v1038_v23, %v1026_v3 }
 0x403   : > { %1074 = vrot.lane.b32.xlu1 %v978_v7, %s1582_s21 }
 0x405   : > { %1098 = vrot.lane.b32.xlu0 %v974_v25, %s1583_s22 }
 0x407   : > { %1100 = vrot.lane.b32.xlu1 %v978_v7, %s1583_s22 }
 0x409   : > { %1128 = vrot.lane.b32.xlu0 %v1955_v53, %s1581_s20 }
 0x40b   : > { %1130 = vrot.lane.b32.xlu1 %v1958_v14, %s1581_s20 }
 0x40d   : > { %1154 = vrot.lane.b32.xlu0 %v1955_v53, %s1582_s21 }
 0x40f   : > { %1156 = vrot.lane.b32.xlu1 %v1958_v14, %s1582_s21 }
 0x411   : > { %1180 = vrot.lane.b32.xlu0 %v1955_v53, %s1583_s22 }
 0x413   : > { %1182 = vrot.lane.b32.xlu1 %v1958_v14, %s1583_s22 }
 0x415   : > { %1250 = vperm.xlu0 %1547, %v1247_v20  }
 0x46f   : > { %v1047_v45 = vpop.permute.xlu0 %1046 }
 0x470   : > { %v1052_v49 = vrot.slane %v1047_v45, 4 }
 0x471   : > { %v1049_v47 = vpop.permute.xlu1 %1048 }
 0x472   : > { %v1053_v50 = vrot.slane %v1049_v47, 4 }
 0x473   : > { %v1073_v51 = vpop.permute.xlu0 %1072 }
 0x474   : > { %v1054_v11 = vsel %vm697_vm8, %v1052_v49, %v1053_v50  ;;  %v1055_v52 = vsel %vm697_vm8, %v1053_v50, %v1052_v49  ;;  %v1078_v43 = vrot.slane %v1073_v51, 5 }
 0x475   : > { %v1075_v19 = vpop.permute.xlu1 %1074  ;;  %v1068_v54 = vmul.f32 %v1061_v27, %v1055_v52  ;;  %v1069_v55 = vmul.f32 %v1066_v28, %v1054_v11 }
 0x476   : > { %v1079_v39 = vrot.slane %v1075_v19, 5 }
 0x477   : > { %v1099_v56 = vpop.permute.xlu0 %1098  ;;  %v1070_v2 = vadd.f32 %v1068_v54, %v1040_v57  ;;  %v1071_v4 = vadd.f32 %v1069_v55, %v1041_v58  ;;  %v1477_v55 = vld [vmem:[%s2056_s7 + $0x1] ss:$0 sm:$0xff] }
 0x478   : > { %v1080_v46 = vsel %vm725_vm7, %v1078_v43, %v1079_v39  ;;  %v1081_v40 = vsel %vm725_vm7, %v1079_v39, %v1078_v43  ;;  %v1104_v63 = vrot.slane %v1099_v56, 7 }
 0x479   : > { %v1094_v59 = vmul.f32 %v1087_v26, %v1081_v40  ;;  %v1095_v60 = vmul.f32 %v1092_v29, %v1080_v46  ;;  %v1101_v62 = vpop.permute.xlu1 %1100 }
 0x47a   : > { %v1105_v0 = vrot.slane %v1101_v62, 7 }
 0x47b   : > { %v1129_v42 = vpop.permute.xlu0 %1128  ;;  %v1096_v25 = vadd.f32 %v1094_v59, %v1070_v2  ;;  %v1097_v48 = vadd.f32 %v1095_v60, %v1071_v4  ;;  %v1246_v59 = vld [vmem:[%s2057_s8] sm:$0x1]  ;;  %v1255_v60 = vsub.s32 0, %v1660_v5 }
 0x47c   : > { %v1106_v24 = vsel %vm753_vm9, %v1104_v63, %v1105_v0  ;;  %v1107_v44 = vsel %vm753_vm9, %v1105_v0, %v1104_v63  ;;  %v1134_v9 = vrot.slane %v1129_v42, 1 }
 0x47d   : > { %v1120_v6 = vmul.f32 %v1113_v30, %v1107_v44  ;;  %v1121_v7 = vmul.f32 %v1118_v31, %v1106_v24  ;;  %v1131_v8 = vpop.permute.xlu1 %1130 }
 0x47e   : > { %v1135_v10 = vrot.slane %v1131_v8, 1 }
 0x47f   : > { %v1122_v12 = vadd.f32 %v1120_v6, %v1096_v25  ;;  %v1123_v13 = vadd.f32 %v1121_v7, %v1097_v48  ;;  %v1155_v15 = vpop.permute.xlu0 %1154 }
 0x480   : > { %v1136_v3 = vsel %vm785_vm10, %v1134_v9, %v1135_v10  ;;  %v1137_v16 = vsel %vm785_vm10, %v1135_v10, %v1134_v9  ;;  %v1160_v23 = vrot.slane %v1155_v15, 3 }
 0x481   : > { %v1124_v20 = vadd.f32 %v1122_v12, %v1955_v53  ;;  %v1125_v21 = vadd.f32 %v1123_v13, %v1958_v14  ;;  %v1157_v22 = vpop.permute.xlu1 %1156  ;;  %v1150_v28 = vmul.f32 %v1143_v32, %v1136_v3  ;;  %v1151_v26 = vmul.f32 %v1148_v33, %v1137_v16 }
 0x482   : > { %v1161_v27 = vrot.slane %v1157_v22, 3 }
 0x483   : > { %v1181_v29 = vpop.permute.xlu0 %1180  ;;  %v1152_v53 = vadd.f32 %v1150_v28, %v1124_v20  ;;  %v1153_v11 = vadd.f32 %v1151_v26, %v1125_v21 }
 0x484   : > { %v1162_v30 = vsel %vm668_vm6, %v1160_v23, %v1161_v27  ;;  %v1163_v31 = vsel %vm668_vm6, %v1161_v27, %v1160_v23  ;;  %v1186_v50 = vrot.slane %v1181_v29, 4 }
 0x485   : > { %v1176_v45 = vmul.f32 %v1169_v34, %v1162_v30  ;;  %v1177_v47 = vmul.f32 %v1174_v35, %v1163_v31  ;;  %v1183_v49 = vpop.permute.xlu1 %1182  ;;  %v1222_v34 = vmul.f32 %v1992_v38, %v1966_v17  ;;  %v1223_v35 = vmul.f32 %v1994_v41, %v1970_v18 }
 0x486   : > { %v1187_v51 = vrot.slane %v1183_v49, 4 }
 0x487   : > { %v1178_v33 = vadd.f32 %v1176_v45, %v1152_v53  ;;  %v1179_v52 = vadd.f32 %v1177_v47, %v1153_v11 }
 0x488   : > { %v1188_v14 = vsel %vm697_vm8, %v1186_v50, %v1187_v51  ;;  %v1189_v32 = vsel %vm697_vm8, %v1187_v51, %v1186_v50 }
 0x489   : > { %v1202_v19 = vmul.f32 %v1988_v36, %v1188_v14  ;;  %v1203_v43 = vmul.f32 %v1990_v37, %v1189_v32 }
 0x48b   : > { %v1204_v39 = vadd.f32 %v1202_v19, %v1178_v33  ;;  %v1205_v54 = vadd.f32 %v1203_v43, %v1179_v52 }
 0x48d   : > { %v1224_v56 = vadd.f32 %v1222_v34, %v1204_v39  ;;  %v1225_v46 = vadd.f32 %v1223_v35, %v1205_v54 }
 0x48f   : > { %v1234_v40 = vadd.f32 %v1477_v55, %v1224_v56  ;;  %v1235_v57 = vadd.f32 %v1477_v55, %v1225_v46 }
 0x491   : > { %v1236_v58 = vmax.f32 %v1234_v40, 0.0  ;;  %v1237_v36 = vmax.f32 %v1235_v57, 0.0 }
 0x493   : > { %1238 = vst.msk [vmem:[#allocation2] sm:$0xff] %vm462_vm5, %v1236_v58  ;;  %1239 = vst.msk [vmem:[#allocation2 + $0x8] sm:$0xff] %vm462_vm5, %v1237_v36 }
 0x494   : > { %v1251_v62 = vpop.permute.xlu0 %1250 }
 0x495   : > { %v1256_v63 = vrot.slane %v1251_v62, %v1255_v60 }
 0x49a   : > { %v1240_v17 = vld [vmem:[#allocation2] sm:$0xff]  ;;  %v1241_v37 = vld [vmem:[#allocation2 + $0x8] sm:$0xff] }
 0x49b   : > { %v1244_v18 = vmul.f32 %v1240_v17, %v1817_v61  ;;  %v1245_v38 = vmul.f32 %v1241_v37, %v1821_v1 }
 0x49d   : > { %v1528_v41 = vpack.c.bf16 %v1245_v38, %v1244_v18 }
 0x49f   : > { %1530 = vmatpush3.bf16.xpose.msk.msra.mxu1 %vm1529_vm11, %v1528_v41 }
 0x4a6   : > { %1525 = vmatmul.mubr.msk.f32.vlgmr.msra.gmra.mrb[8].mxu1 %vm462_vm5, %v1246_v59 }
 0x579   : > { %v1332_v61 = vpop.f32.mrb[8].mxu1 }
 0x57a   : > { %v1333_v1 = vadd.f32 %v1332_v61, %v1256_v63  ;;  %v1526_v0 = vpop.f32.mrb[9].mxu1 }
 0x57c   : > { %1337 = vst.msk [vmem:[%s388_s24] sm:$0x1] %vm1336_vm12, %v1333_v1 }
 0x57d PF: > { %s22_s15 = sadd.s32 1, %s1576_s15  }
 0x57e   : > { %p19_p4 = scmp.ge.s32.totalorder %s22_s15, 4  }
 0x580   :  { %21 = sbr.rel (!%p19_p4) target bundleno = 3 (0x3), region = 105 }

// kernel: multiscale_tan_forward.2
= control target key start
LH: loop header
LB: loop body
LE: loop exit
PB: predicated region body
PF: predicated region fallthrough
CT: control target
= control target key end

     0   :  { %s3340_s15 = smov 0   ;;  %s5122_s0 = inlined_call_operand.vmem [shape: f32[2,8,32], index: 0, kind: input, shape index: {}]   ;;  %s5123_s1 = inlined_call_operand.vmem [shape: f32[2,64,32], index: 1, kind: input, shape index: {}]   ;;  %s5124_s2 = inlined_call_operand.vmem [shape: f32[9,64,1], index: 2, kind: input, shape index: {}]   ;;  %s5125_s3 = inlined_call_operand.vmem [shape: f32[2,1,32], index: 3, kind: input, shape index: {}]   ;;  %s5126_s4 = inlined_call_operand.vmem [shape: bf16[32,32], index: 4, kind: input, shape index: {}]   ;;  %s5127_s5 = inlined_call_operand.vmem [shape: f32[1,32], index: 5, kind: input, shape index: {}]   ;;  %s5128_s6 = inlined_call_operand.vmem [shape: bf16[2,32,288], index: 6, kind: input, shape index: {}]   ;;  %s5129_s7 = inlined_call_operand.vmem [shape: f32[2,1,32], index: 7, kind: input, shape index: {}]   ;;  %s5130_s8 = inlined_call_operand.vmem [shape: f32[1,32], index: 8, kind: input, shape index: {}]   ;;  %s5131_s9 = inlined_call_operand.<no memory space> [shape: f32[1,1], index: 9, kind: input, shape index: {}]   ;;  %s5132_s10 = inlined_call_operand.vmem [shape: f32[2,1,64], index: 10, kind: output, shape index: {}]  }
   0x1   :  { %v15_v0 = vstv %s5131_s9 }
   0x2   :  { %16 = vst [vmem:[#allocation3] sm:$0x1] %v15_v0 }
   0x3 LB: > { %s2918_s16 = sadd.s32 4294967295, %s3273_s15   ;;  %p2922_p0 = scmp.ge.s32.totalorder %s3273_s15, 1  ;;  %s3273_s15 = sphi %s3340_s15, %s22_s15  }
   0x4   : > { %p331_p1 = scmp.lt.s32.totalorder %s3273_s15, 3 }
   0x6   : > { %p332_p2 = pnand %p2922_p0, %p331_p1 }
   0x8   : > { %335 = sbr.rel (%p332_p2) target bundleno = 1569 (0x621), region = 60 }
   0xf   : > { %v3224_v1 = vld [vmem:[%s5126_s4] sm:$0xff]   ;;  %p374_p3 = scmp.lt.s32.totalorder %s2918_s16, 1  ;;  %v390_v2 = vlaneseq  ;;  %v3225_v3 = vld [vmem:[%s5126_s4 + $0x8] sm:$0xff]   ;;  %vm401_vm1 = vcmask 261120   ;;  %v5133_v39 = vmov 0   ;;  %s3276_s22 = smov 96  }
  0x10   : > { %3132 = vmatprep.subr.bf16.mxu0 %v3224_v1  ;;  %3203 = vmatprep.subr.bf16.mxu1 %v3224_v1  ;;  %v2934_v44 = vld [vmem:[%s5127_s5] ss:$0 sm:$0xff]  ;;  %s3278_s24 = smov 32   ;;  %vm3280_vm10 = vmmov 0   ;;  %vm5063_vm11 = vmpackc.low %vm401_vm1, %vm401_vm1  ;;  %vm2848_vm12 = vcmask 516096  }
  0x11   : > { %s5382_s16 = smov (!%p374_p3, %s2918_s16), 1  ;;  %3133 = vmatpush3.bf16.msra.mxu0 %v3224_v1  ;;  %3205 = vmatpush3.bf16.msra.mxu1 %v3224_v1  ;;  %v3356_v4 = vshrl.u32 %v390_v2, 7 }
  0x12   : > { %3134 = vmatprep.subr.bf16.mxu0 %v3225_v3  ;;  %s2923_s20 = sshll.u32 %s5382_s16, 3  ;;  %3204 = vmatprep.subr.bf16.mxu1 %v3225_v3  ;;  %s385_s26 = scalar_lea.vmem %s5125_s3, %s5382_s16 }
  0x13   : > { %s3362_s23 = scalar_lea.vmem %s5122_s0, %s2923_s20  ;;  %vm397_vm0 = vcmp.ge.s32.totalorder %v3356_v4, 7  ;;  %vm420_vm2 = vcmp.ge.s32.totalorder %v3356_v4, 5  ;;  %vm409_vm3 = vcmp.ge.s32.totalorder %v3356_v4, 6  ;;  %vm431_vm4 = vcmp.ge.s32.totalorder %v3356_v4, 4  ;;  %3223 = vset.pattern.permute.xlu1 %v5133_v39  ;;  %3222 = vset.pattern.permute.xlu0 %v5133_v39  ;;  %v2941_v46 = vld [vmem:[%s385_s26] ss:$0 sm:$0xff] }
  0x14   : > { %v2926_v5 = vld [vmem:[%s3362_s23 + $0x7] ss:$0 sm:$0xff]  ;;  %v2927_v6 = vld [vmem:[%s3362_s23 + $0x6] ss:$0 sm:$0xff]  ;;  %v2928_v7 = vld [vmem:[%s3362_s23 + $0x5] ss:$0 sm:$0xff] }
  0x15   : > { %3135 = vmatpush3.bf16.msra.mxu0 %v3225_v3  ;;  %v408_v8 = vmax.f32 %v2926_v5, %v2927_v6  ;;  %3206 = vmatpush3.bf16.msra.mxu1 %v3225_v3  ;;  %v2929_v9 = vld [vmem:[%s3362_s23 + $0x4] ss:$0 sm:$0xff]  ;;  %v2930_v10 = vld [vmem:[%s3362_s23 + $0x3] ss:$0 sm:$0xff]  ;;  %v400_v11 = vsel %vm397_vm0, %v2926_v5, 0.0  ;;  %vm442_vm5 = vcmp.ge.s32.totalorder %v3356_v4, 3 }
  0x16   : > { %402 = vst.msk [vmem:[#allocation2 + $0x38] sm:$0xff] %vm401_vm1, %v400_v11  ;;  %v2931_v16 = vld [vmem:[%s3362_s23 + $0x2] ss:$0 sm:$0xff]  ;;  %v2932_v19 = vld [vmem:[%s3362_s23 + $0x1] ss:$0 sm:$0xff]  ;;  %vm453_vm6 = vcmp.ge.s32.totalorder %v3356_v4, 2 }
  0x17   : > { %v419_v12 = vmax.f32 %v408_v8, %v2928_v7  ;;  %v412_v13 = vsel %vm409_vm3, %v408_v8, 0.0  ;;  %vm464_vm7 = vcmp.ge.s32.totalorder %v3356_v4, 1  ;;  %v2933_v22 = vld [vmem:[%s3362_s23] ss:$0 sm:$0xff]  ;;  %s3104_s9 = sshll.u32 %s5382_s16, 6  ;;  %vm897_vm8 = vcmp.lt.s32.totalorder %v3356_v4, 1 }
  0x18   : > { %413 = vst.msk [vmem:[#allocation2 + $0x30] sm:$0xff] %vm401_vm1, %v412_v13  ;;  %s3739_s21 = scalar_lea.vmem %s5123_s1, %s3104_s9  ;;  %vm1099_vm9 = vcmp.lt.s32.totalorder %v3356_v4, 7  ;;  %s3277_s23 = smov 64  }
  0x19   : > { %v430_v14 = vmax.f32 %v419_v12, %v2929_v9  ;;  %v423_v15 = vsel %vm420_vm2, %v419_v12, 0.0 }
  0x1a   : > { %424 = vst.msk [vmem:[#allocation2 + $0x28] sm:$0xff] %vm401_vm1, %v423_v15 }
  0x1b   : > { %v441_v17 = vmax.f32 %v430_v14, %v2930_v10  ;;  %v434_v18 = vsel %vm431_vm4, %v430_v14, 0.0 }
  0x1c   : > { %435 = vst.msk [vmem:[#allocation2 + $0x20] sm:$0xff] %vm401_vm1, %v434_v18 }
  0x1d   : > { %v452_v20 = vmax.f32 %v441_v17, %v2931_v16  ;;  %v445_v21 = vsel %vm442_vm5, %v441_v17, 0.0  ;;  %v487_v26 = vld [vmem:[#allocation2 + $0x38] sm:$0xff] }
  0x1e   : > { %446 = vst.msk [vmem:[#allocation2 + $0x18] sm:$0xff] %vm401_vm1, %v445_v21  ;;  %v3456_v21 = vld [vmem:[%s5124_s2 + $0x18] sm:$0xff] }
  0x1f   : > { %v463_v23 = vmax.f32 %v452_v20, %v2932_v19  ;;  %v456_v24 = vsel %vm453_vm6, %v452_v20, 0.0  ;;  %v486_v25 = vld [vmem:[#allocation2 + $0x30] sm:$0xff]  ;;  %v3444_v19 = vld [vmem:[%s5124_s2 + $0x8] sm:$0xff] }
  0x20   : > { %457 = vst.msk [vmem:[#allocation2 + $0x10] sm:$0xff] %vm401_vm1, %v456_v24  ;;  %v491_v31 = vpack.c.bf16 %v487_v26, %v486_v25  ;;  %v3450_v20 = vld [vmem:[%s5124_s2 + $0x10] sm:$0xff]  ;;  %v910_v25 = vld [vmem:[%s5124_s2 + $0x20] sm:$0xff]  ;;  %v3232_v26 = vld [vmem:[%s5128_s6 + $0x1c] ss:$12 sps:$4 sm:$0xff]  }
  0x21   : > { %v467_v27 = vsel %vm464_vm7, %v463_v23, 0.0  ;;  %v474_v28 = vmax.f32 %v463_v23, %v2933_v22  ;;  %v485_v29 = vld [vmem:[#allocation2 + $0x28] sm:$0xff]  ;;  %v3228_v22 = vld [vmem:[%s5128_s6 + $0x4] ss:$12 sps:$4 sm:$0xff]  }
  0x22   : > { %468 = vst.msk [vmem:[#allocation2 + $0x8] sm:$0xff] %vm401_vm1, %v467_v27  ;;  %v3226_v23 = vld [vmem:[%s5128_s6] ss:$12 sps:$4 sm:$0xff]   ;;  %v3229_v24 = vld [vmem:[%s5128_s6 + $0x8] ss:$12 sps:$4 sm:$0xff]   ;;  %751 = vmatprep.subr.bf16.mxu1 %v3228_v22 }
  0x23   : > { %479 = vst.msk [vmem:[#allocation2] sm:$0xff] %vm401_vm1, %v474_v28  ;;  %v484_v30 = vld [vmem:[#allocation2 + $0x20] sm:$0xff]  ;;  %3144 = vmatprep.subr.bf16.mxu0 %v3229_v24  ;;  %v2970_v22 = vld [vmem:[%s5124_s2 + $0xb0] sm:$0xff] }
  0x24   : > { %v490_v32 = vpack.c.bf16 %v485_v29, %v484_v30  ;;  %v3230_v27 = vld [vmem:[%s5128_s6 + $0x18] ss:$12 sps:$4 sm:$0xff]   ;;  %v3233_v28 = vld [vmem:[%s5128_s6 + $0x20] ss:$12 sps:$4 sm:$0xff]   ;;  %v912_v30 = vld [vmem:[%s5124_s2 + $0x30] sm:$0xff] }
  0x25   : > { %v483_v34 = vld [vmem:[#allocation2 + $0x18] sm:$0xff]  ;;  %v3483_v29 = vld [vmem:[%s5124_s2 + $0x28] sm:$0xff] }
  0x26   : > { %3140 = vmatprep.mubr.msk.bf16.mxu1 %vm401_vm1, %v490_v32  ;;  %5170 = vst [vmem:[#allocation4_spill] sm:$0xff] %v3483_v29  ;;  %v913_v32 = vld [vmem:[%s5124_s2 + $0x38] sm:$0xff] }
  0x27   : > { %v482_v33 = vld [vmem:[#allocation2 + $0x10] sm:$0xff]  ;;  %3141 = vmatmul.mubr.msk.bf16.vlgmr.msra.gmra.mrb[0].mxu1 %vm401_vm1, %v491_v31  ;;  %v3492_v31 = vld [vmem:[%s5124_s2] sm:$0xff] }
  0x28   : > { %v489_v37 = vpack.c.bf16 %v483_v34, %v482_v33  ;;  %783 = vmatprep.mubr.bf16.mxu1 %v5133_v39  ;;  %752 = vmatpush1.bf16.msra.mxu1 %v3226_v23  ;;  %v3501_v33 = vld [vmem:[%s5124_s2 + $0x48] sm:$0xff]  ;;  %v3507_v34 = vld [vmem:[%s5124_s2 + $0x40] sm:$0xff]  ;;  %v2979_v23 = vld [vmem:[%s5124_s2 + $0xf8] sm:$0xff] }
  0x29   : > { %v481_v35 = vld [vmem:[#allocation2 + $0x8] sm:$0xff]  ;;  %753 = vmatprep.subr.bf16.mxu1 %v3232_v26  ;;  %v2978_v26 = vld [vmem:[%s5124_s2 + $0xf0] sm:$0xff] }
  0x2a   : > { %v480_v36 = vld [vmem:[#allocation2] sm:$0xff] }
  0x2b   : > { %v488_v38 = vpack.c.bf16 %v481_v35, %v480_v36  ;;  %v3512_v35 = vld [vmem:[%s5124_s2 + $0x88] sm:$0xff] }
  0x2c   : > { %754 = vmatpush1.bf16.msra.mxu1 %v3230_v27  ;;  %v3519_v36 = vld [vmem:[%s5124_s2 + $0xc8] sm:$0xff] }
  0x2d   : > { %3136 = vmatprep.mubr.msk.bf16.mxu0 %vm401_vm1, %v488_v38  ;;  %v3531_v38 = vld [vmem:[%s5124_s2 + $0xc0] sm:$0xff] }
  0x2e   : > { %3137 = vmatmul.mubr.msk.bf16.vlgmr.msra.gmra.mrb[0].mxu0 %vm401_vm1, %v489_v37  ;;  %v3524_v37 = vld [vmem:[%s5124_s2 + $0x80] sm:$0xff] }
  0x2f   : > { %3145 = vmatpush3.bf16.msra.mxu0 %v3229_v24  ;;  %v2992_v24 = vld [vmem:[%s5124_s2 + $0x1a0] sm:$0xff] }
  0x30   : > { %3146 = vmatprep.subr.bf16.mxu0 %v3233_v28 }
  0x33   : > { %3147 = vmatpush3.bf16.msra.mxu0 %v3233_v28  ;;  %v3008_v28 = vld [vmem:[%s5124_s2 + $0x220] sm:$0xff] }
  0xfa   : > { %v3142_v40 = vpop.f32.mrb[0].mxu1 }
  0xfb   : > { %v577_v41 = vpop.f32.mrb[1].mxu1  ;;  %v586_v63 = vadd.f32 %v3142_v40, %v2934_v44  ;;  %v3536_v40 = vld [vmem:[%s5124_s2 + $0x58] sm:$0xff] }
  0xfc   : > { %v3143_v42 = vpop.f32.mrb[2].mxu1  ;;  %v578_v52 = vadd.f32 %v2934_v44, %v577_v41  ;;  %v3543_v41 = vld [vmem:[%s5124_s2 + $0x140] sm:$0xff] }
  0xfd   : > { %v580_v43 = vpop.f32.mrb[3].mxu1  ;;  %v589_v59 = vadd.f32 %v3143_v42, %v2934_v44  ;;  %v3427_v9 = vmul.f32 %v2941_v46, %v586_v63  ;;  %v3548_v42 = vld [vmem:[%s5124_s2 + $0x50] sm:$0xff] }
  0xfe   : > { %v581_v49 = vadd.f32 %v2934_v44, %v580_v43  ;;  %v3413_v0 = vmul.f32 %v2941_v46, %v578_v52  ;;  %v3555_v43 = vld [vmem:[%s5124_s2 + $0x148] sm:$0xff]  ;;  %v3608_v52 = vld [vmem:[%s5124_s2 + $0x1c0] sm:$0xff]  ;;  %v3644_v63 = vld [vmem:[%s5124_s2 + $0x150] sm:$0xff] }
  0xff   : > { %v3423_v7 = vmul.f32 %v2941_v46, %v589_v59  ;;  %v613_v16 = vmul.f32 %v3427_v9, %v3427_v9  ;;  %v3632_v59 = vld [vmem:[%s5124_s2 + $0x60] sm:$0xff]  ;;  %5178 = vst [vmem:[#allocation12_spill] sm:$0xff] %v3644_v63 }
 0x100   : > { %v3409_v61 = vmul.f32 %v2941_v46, %v581_v49  ;;  %v611_v10 = vmul.f32 %v3413_v0, %v3413_v0  ;;  %v3591_v49 = vld [vmem:[%s5124_s2 + $0x1c8] sm:$0xff]  ;;  %5176 = vst [vmem:[#allocation10_spill] sm:$0xff] %v3632_v59 }
 0x101   : > { %v3138_v45 = vpop.f32.mrb[0].mxu0  ;;  %v614_v14 = vmul.f32 %v3423_v7, %v3423_v7  ;;  %v633_v18 = vsel %vm401_vm1, %v613_v16, 0.0  ;;  %5172 = vst [vmem:[#allocation6_spill] sm:$0xff] %v3591_v49  ;;  %v2971_v16 = vld [vmem:[%s5124_s2 + $0xb8] sm:$0xff] }
 0x102   : > { %v570_v47 = vadd.f32 %v3138_v45, %v2934_v44  ;;  %v561_v48 = vpop.f32.mrb[1].mxu0  ;;  %v612_v8 = vmul.f32 %v3409_v61, %v3409_v61  ;;  %v627_v15 = vsel %vm401_vm1, %v611_v10, 0.0  ;;  %v3567_v45 = vld [vmem:[%s5124_s2 + $0x180] sm:$0xff]  ;;  %v3687_v10 = vld [vmem:[%s5124_s2 + $0x218] sm:$0xff] }
 0x103   : > { %v562_v50 = vadd.f32 %v2934_v44, %v561_v48  ;;  %v3139_v51 = vpop.f32.mrb[2].mxu0  ;;  %v636_v17 = vsel %vm401_vm1, %v614_v14, 0.0  ;;  %v3584_v48 = vld [vmem:[%s5124_s2 + $0x188] sm:$0xff]  ;;  %5185 = vst [vmem:[#allocation19_spill] sm:$0xff] %v3687_v10 }
 0x104   : > { %v3401_v53 = vmul.f32 %v2941_v46, %v570_v47  ;;  %v573_v54 = vadd.f32 %v3139_v51, %v2934_v44  ;;  %v564_v55 = vpop.f32.mrb[3].mxu0  ;;  %v630_v13 = vsel %vm401_vm1, %v612_v8, 0.0  ;;  %v3579_v47 = vld [vmem:[%s5124_s2 + $0xd0] sm:$0xff]  ;;  %v3603_v51 = vld [vmem:[%s5124_s2 + $0x200] sm:$0xff]  ;;  %v2985_v14 = vld [vmem:[%s5124_s2 + $0x168] sm:$0xff] }
 0x105   : > { %v3403_v56 = vmul.f32 %v2941_v46, %v562_v50  ;;  %v565_v57 = vadd.f32 %v2934_v44, %v564_v55  ;;  %v3560_v44 = vld [vmem:[%s5124_s2 + $0x90] sm:$0xff]  ;;  %5171 = vst [vmem:[#allocation5_spill] sm:$0xff] %v3579_v47  ;;  %v3596_v50 = vld [vmem:[%s5124_s2 + $0xd8] sm:$0xff]  ;;  %5173 = vst [vmem:[#allocation7_spill] sm:$0xff] %v3603_v51 }
 0x106   : > { %v3405_v58 = vmul.f32 %v2941_v46, %v573_v54  ;;  %v609_v60 = vmul.f32 %v3401_v53, %v3401_v53  ;;  %v3615_v54 = vld [vmem:[%s5124_s2 + $0x68] sm:$0xff]  ;;  %v3680_v8 = vld [vmem:[%s5124_s2 + $0xe0] sm:$0xff] }
 0x107   : > { %v3411_v62 = vmul.f32 %v2941_v46, %v565_v57  ;;  %v607_v1 = vmul.f32 %v3403_v56, %v3403_v56  ;;  %v3572_v46 = vld [vmem:[%s5124_s2 + $0x98] sm:$0xff]  ;;  %5174 = vst [vmem:[#allocation8_spill] sm:$0xff] %v3615_v54  ;;  %v3620_v55 = vld [vmem:[%s5124_s2 + $0x208] sm:$0xff]  ;;  %5184 = vst [vmem:[#allocation18_spill] sm:$0xff] %v3680_v8 }
 0x108   : > { %v621_v2 = vsel %vm401_vm1, %v609_v60, 0.0  ;;  %v610_v3 = vmul.f32 %v3405_v58, %v3405_v58  ;;  %v3627_v57 = vld [vmem:[%s5124_s2 + $0x158] sm:$0xff]  ;;  %v3639_v60 = vld [vmem:[%s5124_s2 + $0xa8] sm:$0xff] }
 0x109   : > { %622 = vadd.xlane.f32.xlu1 %v621_v2  ;;  %v615_v5 = vsel %vm401_vm1, %v607_v1, 0.0  ;;  %v608_v6 = vmul.f32 %v3411_v62, %v3411_v62  ;;  %5175 = vst [vmem:[#allocation9_spill] sm:$0xff] %v3627_v57  ;;  %5177 = vst [vmem:[#allocation11_spill] sm:$0xff] %v3639_v60  ;;  %v3651_v1 = vld [vmem:[%s5124_s2 + $0x198] sm:$0xff]  ;;  %v3656_v2 = vld [vmem:[%s5124_s2 + $0xa0] sm:$0xff] }
 0x10a   : > { %616 = vadd.xlane.f32.xlu0 %v615_v5  ;;  %v624_v11 = vsel %vm401_vm1, %v610_v3, 0.0  ;;  %5179 = vst [vmem:[#allocation13_spill] sm:$0xff] %v3651_v1  ;;  %5180 = vst [vmem:[#allocation14_spill] sm:$0xff] %v3656_v2  ;;  %v3663_v3 = vld [vmem:[%s5124_s2 + $0xe8] sm:$0xff]  ;;  %v3668_v5 = vld [vmem:[%s5124_s2 + $0x190] sm:$0xff] }
 0x10b   : > { %v618_v12 = vsel %vm401_vm1, %v608_v6, 0.0  ;;  %5181 = vst [vmem:[#allocation15_spill] sm:$0xff] %v3663_v3  ;;  %5182 = vst [vmem:[#allocation16_spill] sm:$0xff] %v3668_v5  ;;  %v3675_v6 = vld [vmem:[%s5124_s2 + $0x1d8] sm:$0xff] }
 0x10c   : > { %5183 = vst [vmem:[#allocation17_spill] sm:$0xff] %v3675_v6 }
 0x10d   : > { %625 = vadd.xlane.f32.xlu1 %v624_v11  ;;  %v2998_v11 = vld [vmem:[%s5124_s2 + $0x1d0] sm:$0xff] }
 0x10e   : > { %619 = vadd.xlane.f32.xlu0 %v618_v12  ;;  %v2963_v12 = vld [vmem:[%s5124_s2 + $0x78] sm:$0xff] }
 0x111   : > { %631 = vadd.xlane.f32.xlu1 %v630_v13  ;;  %v3006_v13 = vld [vmem:[%s5124_s2 + $0x210] sm:$0xff] }
 0x112   : > { %628 = vadd.xlane.f32.xlu0 %v627_v15  ;;  %v2962_v15 = vld [vmem:[%s5124_s2 + $0x70] sm:$0xff] }
 0x115   : > { %637 = vadd.xlane.f32.xlu1 %v636_v17  ;;  %v2984_v17 = vld [vmem:[%s5124_s2 + $0x160] sm:$0xff] }
 0x116   : > { %634 = vadd.xlane.f32.xlu0 %v633_v18  ;;  %v2993_v18 = vld [vmem:[%s5124_s2 + $0x1a8] sm:$0xff] }
 0x126   : > { %921 = vperm.xlu1 %3223, %v3444_v19  }
 0x12a   : > { %926 = vperm.xlu1 %3223, %v3450_v20  }
 0x12c   : > { %916 = vperm.xlu0 %3222, %v3492_v31  }
 0x12e   : > { %931 = vperm.xlu1 %3223, %v3456_v21  }
 0x130   : > { %1018 = vperm.xlu0 %3222, %v3501_v33  }
 0x132   : > { %936 = vperm.xlu1 %3223, %v910_v25   ;;  %v3001_v25 = vld [vmem:[%s5124_s2 + $0x1e8] sm:$0xff] }
 0x134   : > { %1124 = vperm.xlu0 %3222, %v3512_v35  }
 0x136   : > { %941 = vperm.xlu1 %3223, %v3483_v29  }
 0x138   : > { %1229 = vperm.xlu0 %3222, %v3519_v36  }
 0x13a   : > { %946 = vperm.xlu1 %3223, %v912_v30  }
 0x13c   : > { %1028 = vperm.xlu0 %3222, %v3536_v40  }
 0x13e   : > { %951 = vperm.xlu1 %3223, %v913_v32  }
 0x140   : > { %1345 = vperm.xlu0 %3222, %v3543_v41  }
 0x142   : > { %1013 = vperm.xlu1 %3223, %v3507_v34  }
 0x144   : > { %1129 = vperm.xlu0 %3222, %v3560_v44  }
 0x146   : > { %1119 = vperm.xlu1 %3223, %v3524_v37  }
 0x148   : > { %1450 = vperm.xlu0 %3222, %v3567_v45  }
 0x14a   : > { %1224 = vperm.xlu1 %3223, %v3531_v38  }
 0x14c   : > { %1234 = vperm.xlu0 %3222, %v3579_v47  }
 0x14e   : > { %1023 = vperm.xlu1 %3223, %v3548_v42  }
 0x150   : > { %1544 = vperm.xlu0 %3222, %v3591_v49  }
 0x152   : > { %1350 = vperm.xlu1 %3223, %v3555_v43  }
 0x154   : > { %1620 = vperm.xlu0 %3222, %v3603_v51  }
 0x156   : > { %1134 = vperm.xlu1 %3223, %v3572_v46  }
 0x158   : > { %1038 = vperm.xlu0 %3222, %v3615_v54  }
 0x15a   : > { %1455 = vperm.xlu1 %3223, %v3584_v48  }
 0x15c   : > { %1360 = vperm.xlu0 %3222, %v3627_v57  }
 0x15e   : > { %1239 = vperm.xlu1 %3223, %v3596_v50  }
 0x160   : > { %1144 = vperm.xlu0 %3222, %v3639_v60  }
 0x162   : > { %1539 = vperm.xlu1 %3223, %v3608_v52  }
 0x164   : > { %1465 = vperm.xlu0 %3222, %v3651_v1  }
 0x166   : > { %1625 = vperm.xlu1 %3223, %v3620_v55  }
 0x168   : > { %1249 = vperm.xlu0 %3222, %v3663_v3  }
 0x16a   : > { %1033 = vperm.xlu1 %3223, %v3632_v59  }
 0x16c   : > { %1554 = vperm.xlu0 %3222, %v3675_v6  }
 0x16e   : > { %1355 = vperm.xlu1 %3223, %v3644_v63  }
 0x170   : > { %1635 = vperm.xlu0 %3222, %v3687_v10  }
 0x172   : > { %1139 = vperm.xlu1 %3223, %v3656_v2  }
 0x174   : > { %1048 = vperm.xlu0 %3222, %v2963_v12  }
 0x176   : > { %1460 = vperm.xlu1 %3223, %v3668_v5  }
 0x178   : > { %1370 = vperm.xlu0 %3222, %v2985_v14  }
 0x17a   : > { %1244 = vperm.xlu1 %3223, %v3680_v8  }
 0x17c   : > { %1154 = vperm.xlu0 %3222, %v2971_v16  }
 0x17e   : > { %1549 = vperm.xlu1 %3223, %v2998_v11   ;;  %v3000_v11 = vld [vmem:[%s5124_s2 + $0x1e0] sm:$0xff] }
 0x180   : > { %1475 = vperm.xlu0 %3222, %v2993_v18  }
 0x182   : > { %1630 = vperm.xlu1 %3223, %v3006_v13  }
 0x184   : > { %1259 = vperm.xlu0 %3222, %v2979_v23  }
 0x186   : > { %1043 = vperm.xlu1 %3223, %v2962_v15  }
 0x188   : > { %1564 = vperm.xlu0 %3222, %v3001_v25  }
 0x18a   : > { %1365 = vperm.xlu1 %3223, %v2984_v17  }
 0x18c   : > { %1640 = vperm.xlu0 %3222, %v3008_v28  }
 0x18e   : > { %1149 = vperm.xlu1 %3223, %v2970_v22  }
 0x192   : > { %1470 = vperm.xlu1 %3223, %v2992_v24  }
 0x196   : > { %v623_v27 = vpop.xlane.xlu1 %622  ;;  %1254 = vperm.xlu1 %3223, %v2978_v26   ;;  %v665_v26 = vld [vmem:[%s3739_s21 + $0x10] sm:$0xff] }
 0x197   : > { %v641_v30 = vadd.f32 1e-24, %v623_v27  ;;  %v617_v32 = vpop.xlane.xlu0 %616 }
 0x198   : > { %v639_v12 = vadd.f32 1e-24, %v617_v32 }
 0x199   : > { %3242 = vrsqrt.f32 %v641_v30 }
 0x19a   : > { %3244 = vrsqrt.f32 %v639_v12  ;;  %v626_v13 = vpop.xlane.xlu1 %625  ;;  %1559 = vperm.xlu1 %3223, %v3000_v11   ;;  %v663_v11 = vld [vmem:[%s3739_s21] sm:$0xff] }
 0x19b   : > { %v642_v14 = vadd.f32 1e-24, %v626_v13  ;;  %v620_v15 = vpop.xlane.xlu0 %619 }
 0x19c   : > { %v640_v16 = vadd.f32 1e-24, %v620_v15 }
 0x19d   : > { %3246 = vrsqrt.f32 %v642_v14 }
 0x19e   : > { %3248 = vrsqrt.f32 %v640_v16  ;;  %v632_v17 = vpop.xlane.xlu1 %631 }
 0x19f   : > { %v644_v18 = vadd.f32 1e-24, %v632_v17  ;;  %v629_v22 = vpop.xlane.xlu0 %628  ;;  %v666_v17 = vld [vmem:[%s3739_s21 + $0x18] sm:$0xff] }
 0x1a0   : > { %v643_v23 = vadd.f32 1e-24, %v629_v22 }
 0x1a1   : > { %3250 = vrsqrt.f32 %v644_v18 }
 0x1a2   : > { %3252 = vrsqrt.f32 %v643_v23  ;;  %v638_v24 = vpop.xlane.xlu1 %637  ;;  %v664_v23 = vld [vmem:[%s3739_s21 + $0x8] sm:$0xff] }
 0x1a3   : > { %v3243_v25 = vpop.eup %3242  ;;  %v646_v27 = vadd.f32 1e-24, %v638_v24  ;;  %v635_v28 = vpop.xlane.xlu0 %634 }
 0x1a4   : > { %v3245_v30 = vpop.eup %3244  ;;  %v657_v32 = vmul.f32 %v3243_v25, %v3401_v53  ;;  %v645_v12 = vadd.f32 1e-24, %v635_v28 }
 0x1a5   : > { %v655_v13 = vmul.f32 %v3245_v30, %v3403_v56  ;;  %3254 = vrsqrt.f32 %v646_v27  ;;  %v667_v30 = vld [vmem:[%s3739_s21 + $0x20] sm:$0xff] }
 0x1a6   : > { %v673_v14 = vmul.f32 %v665_v26, %v657_v32  ;;  %3256 = vrsqrt.f32 %v645_v12  ;;  %v668_v26 = vld [vmem:[%s3739_s21 + $0x28] sm:$0xff] }
 0x1a7   : > { %v3247_v15 = vpop.eup %3246  ;;  %v671_v16 = vmul.f32 %v663_v11, %v655_v13  ;;  %v670_v13 = vld [vmem:[%s3739_s21 + $0x38] sm:$0xff] }
 0x1a8   : > { %v3249_v18 = vpop.eup %3248  ;;  %681 = vst.msk [vmem:[#allocation2 + $0x10] sm:$0xff] %vm401_vm1, %v673_v14  ;;  %v658_v22 = vmul.f32 %v3247_v15, %v3405_v58  ;;  %v669_v15 = vld [vmem:[%s3739_s21 + $0x30] sm:$0xff] }
 0x1a9   : > { %679 = vst.msk [vmem:[#allocation2] sm:$0xff] %vm401_vm1, %v671_v16  ;;  %v656_v53 = vmul.f32 %v3249_v18, %v3411_v62 }
 0x1aa   : > { %v674_v56 = vmul.f32 %v666_v17, %v658_v22 }
 0x1ab   : > { %v3251_v24 = vpop.eup %3250  ;;  %v672_v25 = vmul.f32 %v664_v23, %v656_v53 }
 0x1ac   : > { %v3253_v27 = vpop.eup %3252  ;;  %682 = vst.msk [vmem:[#allocation2 + $0x18] sm:$0xff] %vm401_vm1, %v674_v56  ;;  %v660_v28 = vmul.f32 %v3251_v24, %v3409_v61 }
 0x1ad   : > { %680 = vst.msk [vmem:[#allocation2 + $0x8] sm:$0xff] %vm401_vm1, %v672_v25  ;;  %v659_v58 = vmul.f32 %v3253_v27, %v3413_v0 }
 0x1ae   : > { %v676_v32 = vmul.f32 %v668_v26, %v660_v28  ;;  %v3777_v28 = vpop.permute.xlu1 %921 }
 0x1af   : > { %v3255_v11 = vpop.eup %3254  ;;  %v675_v12 = vmul.f32 %v667_v30, %v659_v58  ;;  %v689_v53 = vld [vmem:[#allocation2 + $0x10] sm:$0xff] }
 0x1b0   : > { %v3257_v62 = vpop.eup %3256  ;;  %684 = vst.msk [vmem:[#allocation2 + $0x28] sm:$0xff] %vm401_vm1, %v676_v32  ;;  %v662_v14 = vmul.f32 %v3255_v11, %v3423_v7  ;;  %v687_v0 = vld [vmem:[#allocation2] sm:$0xff] }
 0x1b1   : > { %683 = vst.msk [vmem:[#allocation2 + $0x20] sm:$0xff] %vm401_vm1, %v675_v12  ;;  %v661_v16 = vmul.f32 %v3257_v62, %v3427_v9  ;;  %v3787_v12 = vpop.permute.xlu0 %916 }
 0x1b2   : > { %v678_v61 = vmul.f32 %v670_v13, %v662_v14  ;;  %v3779_v30 = vpop.permute.xlu1 %926  ;;  %5188 = vst [vmem:[#allocation22_spill] sm:$0xff] %v3787_v12 }
 0x1b3   : > { %v677_v17 = vmul.f32 %v669_v15, %v661_v16  ;;  %v690_v18 = vld [vmem:[#allocation2 + $0x18] sm:$0xff] }
 0x1b4   : > { %686 = vst.msk [vmem:[#allocation2 + $0x38] sm:$0xff] %vm401_vm1, %v678_v61  ;;  %v688_v22 = vld [vmem:[#allocation2 + $0x8] sm:$0xff]  ;;  %v696_v56 = vpack.c.bf16 %v690_v18, %v689_v53 }
 0x1b5   : > { %685 = vst.msk [vmem:[#allocation2 + $0x30] sm:$0xff] %vm401_vm1, %v677_v17  ;;  %v695_v23 = vpack.c.bf16 %v688_v22, %v687_v0  ;;  %v3791_v62 = vpop.permute.xlu0 %1018 }
 0x1b6   : > { %v3781_v58 = vpop.permute.xlu1 %931 }
 0x1b7   : > { %2948 = vmatmul.mubr.msk.bf16.vlgmr.msra.gmra.mrb[4].mxu1 %vm401_vm1, %v695_v23  ;;  %3148 = vmatprep.mubr.msk.bf16.mxu0 %vm401_vm1, %v695_v23  ;;  %v692_v7 = vld [vmem:[#allocation2 + $0x28] sm:$0xff] }
 0x1b8   : > { %3149 = vmatmul.mubr.msk.bf16.vlgmr.msra.gmra.mrb[4].mxu0 %vm401_vm1, %v696_v56  ;;  %v691_v9 = vld [vmem:[#allocation2 + $0x20] sm:$0xff]  ;;  %793 = vmatprep.mubr.bf16.mxu1 %v5133_v39 }
 0x1b9   : > { %v697_v24 = vpack.c.bf16 %v692_v7, %v691_v9  ;;  %v3795_v15 = vpop.permute.xlu0 %1124 }
 0x1ba   : > { %v3783_v32 = vpop.permute.xlu1 %936 }
 0x1bb   : > { %3152 = vmatprep.mubr.msk.bf16.mxu0 %vm401_vm1, %v697_v24  ;;  %v694_v25 = vld [vmem:[#allocation2 + $0x38] sm:$0xff]  ;;  %5186 = vst [vmem:[#allocation20_spill] sm:$0xff] %v3783_v32 }
 0x1bc   : > { %v693_v26 = vld [vmem:[#allocation2 + $0x30] sm:$0xff] }
 0x1bd   : > { %v698_v27 = vpack.c.bf16 %v694_v25, %v693_v26  ;;  %v3799_v61 = vpop.permute.xlu0 %1229 }
 0x1be   : > { %v3785_v11 = vpop.permute.xlu1 %941 }
 0x1bf   : > { %2949 = vmatmul.mubr.msk.bf16.gmra.mrb[8].mxu1 %vm401_vm1, %v696_v56  ;;  %5187 = vst [vmem:[#allocation21_spill] sm:$0xff] %v3785_v11 }
 0x1c0   : > { %3153 = vmatmul.mubr.msk.bf16.gmra.mrb[8].mxu0 %vm401_vm1, %v698_v27  ;;  %803 = vmatprep.mubr.bf16.mxu1 %v5133_v39 }
 0x1c1   : > { %1802 = vmatprep.mubr.bf16.mxu0 %v5133_v39  ;;  %v3803_v18 = vpop.permute.xlu0 %1028 }
 0x1c2   : > { %v3789_v13 = vpop.permute.xlu1 %946 }
 0x1c3   : > { %5189 = vst [vmem:[#allocation23_spill] sm:$0xff] %v3789_v13 }
 0x1c5   : > { %v3807_v22 = vpop.permute.xlu0 %1345 }
 0x1c6   : > { %v3793_v14 = vpop.permute.xlu1 %951  ;;  %5194 = vst [vmem:[#allocation28_spill] sm:$0xff] %v3807_v22 }
 0x1c7   : > { %2950 = vmatmul.mubr.msk.bf16.gmra.mrb[12].mxu1 %vm401_vm1, %v697_v24  ;;  %5190 = vst [vmem:[#allocation24_spill] sm:$0xff] %v3793_v14 }
 0x1c8   : > { %813 = vmatprep.mubr.bf16.mxu1 %v5133_v39 }
 0x1c9   : > { %v3811_v53 = vpop.permute.xlu0 %1129 }
 0x1ca   : > { %v3797_v16 = vpop.permute.xlu1 %1013 }
 0x1cb   : > { %5191 = vst [vmem:[#allocation25_spill] sm:$0xff] %v3797_v16 }
 0x1ce   : > { %v3801_v17 = vpop.permute.xlu1 %1119 }
 0x1cf   : > { %2951 = vmatmul.mubr.msk.bf16.gmra.mrb[16].mxu1 %vm401_vm1, %v698_v27  ;;  %5192 = vst [vmem:[#allocation26_spill] sm:$0xff] %v3801_v17 }
 0x1d2   : > { %v3805_v0 = vpop.permute.xlu1 %1224 }
 0x1d3   : > { %5193 = vst [vmem:[#allocation27_spill] sm:$0xff] %v3805_v0 }
 0x1d6   : > { %v3809_v23 = vpop.permute.xlu1 %1023 }
 0x1da   : > { %v3813_v56 = vpop.permute.xlu1 %1350 }
 0x28a   : > { %v3815_v7 = vpop.f32.mrb[4].mxu1 }
 0x28b   : > { %v3817_v9 = vpop.f32.mrb[5].mxu1  ;;  %v3150_v24 = vpop.f32.mrb[4].mxu0  ;;  %978 = vrot.lane.b32.xlu1 %v3815_v7, %s3276_s22  ;;  %v5137_v27 = vrot.slane %v3815_v7, 7  ;;  %v5212_v49 = vrot.slane %v3815_v7, 7 }
 0x28c   : > { %v789_v25 = vpop.f32.mrb[6].mxu1  ;;  %v858_v26 = vpop.f32.mrb[5].mxu0  ;;  %1294 = vrot.lane.b32.xlu0 %v3817_v9, %s3276_s22  ;;  %v1595_v0 = vrot.slane %v3150_v24, 1 }
 0x28d   : > { %v890_v39 = vrot.slane %v789_v25, 7  ;;  %v3826_v14 = vpop.f32.mrb[7].mxu1  ;;  %v3151_v22 = vpop.f32.mrb[6].mxu0  ;;  %v1593_v8 = vrot.slane %v858_v26, 1 }
 0x28e   : > { %v1596_v13 = vrot.slane %v3151_v22, 1  ;;  %v861_v17 = vpop.f32.mrb[7].mxu0  ;;  %v3841_v22 = vpop.permute.xlu0 %1450 }
 0x28f   : > { %v1594_v16 = vrot.slane %v861_v17, 1  ;;  %1067 = vrot.lane.b32.xlu1 %v3815_v7, %s3277_s23  ;;  %v3834_v12 = vsel %vm897_vm8, %v5137_v27, %v890_v39  ;;  %5195 = vst [vmem:[#allocation29_spill] sm:$0xff] %v3841_v22  ;;  %v3851_v26 = vpop.permute.xlu1 %1134 }
 0x290   : > { %v3838_v10 = vsel %vm1099_vm9, %v1595_v0, %v1596_v13  ;;  %980 = vrot.lane.b32.xlu0 %v789_v25, %s3276_s22 }
 0x291   : > { %v3845_v17 = vsel %vm1099_vm9, %v1594_v16, %v1595_v0  ;;  %v3849_v24 = vsel %vm1099_vm9, %v1593_v8, %v1594_v16 }
 0x292   : > { %5196 = vst [vmem:[#allocation30_spill] sm:$0xff] %v3845_v17  ;;  %5197 = vst [vmem:[#allocation31_spill] sm:$0xff] %v3849_v24  ;;  %v795_v27 = vpop.f32.mrb[8].mxu1 }
 0x293   : > { %v891_v5 = vrot.slane %v795_v27, 7  ;;  %v3853_v6 = vpop.f32.mrb[9].mxu1  ;;  %1173 = vrot.lane.b32.xlu1 %v3815_v7, %s3278_s24  ;;  %v3154_v2 = vpop.f32.mrb[8].mxu0 }
 0x294   : > { %v799_v22 = vpop.f32.mrb[10].mxu1  ;;  %1069 = vrot.lane.b32.xlu0 %v789_v25, %s3277_s23  ;;  %v874_v0 = vpop.f32.mrb[9].mxu0  ;;  %v1599_v11 = vrot.slane %v3154_v2, 1 }
 0x295   : > { %v892_v17 = vrot.slane %v799_v22, 7  ;;  %v1597_v3 = vrot.slane %v874_v0, 1  ;;  %v3858_v63 = vpop.f32.mrb[11].mxu1  ;;  %v3155_v16 = vpop.f32.mrb[10].mxu0  ;;  %v3862_v24 = vsel %vm897_vm8, %v890_v39, %v891_v5 }
 0x296   : > { %v1600_v1 = vrot.slane %v3155_v16, 1  ;;  %v877_v59 = vpop.f32.mrb[11].mxu0  ;;  %v3893_v16 = vpop.permute.xlu0 %1234 }
 0x297   : > { %v3866_v32 = vsel %vm1099_vm9, %v1596_v13, %v1597_v3  ;;  %v1598_v60 = vrot.slane %v877_v59, 1  ;;  %1399 = vrot.lane.b32.xlu1 %v3817_v9, %s3277_s23  ;;  %v3872_v0 = vsel %vm897_vm8, %v891_v5, %v892_v17  ;;  %v3883_v13 = vpop.permute.xlu1 %1455 }
 0x298   : > { %5198 = vst [vmem:[#allocation32_spill] sm:$0xff] %v3866_v32  ;;  %5199 = vst [vmem:[#allocation33_spill] sm:$0xff] %v3872_v0  ;;  %1175 = vrot.lane.b32.xlu0 %v789_v25, %s3278_s24  ;;  %v3877_v39 = vsel %vm1099_vm9, %v1599_v11, %v1600_v1  ;;  %v3881_v2 = vsel %vm1099_vm9, %v1600_v1, %v1593_v8 }
 0x299   : > { %5200 = vst [vmem:[#allocation34_spill] sm:$0xff] %v3877_v39  ;;  %5201 = vst [vmem:[#allocation35_spill] sm:$0xff] %v3881_v2  ;;  %v3887_v59 = vsel %vm1099_vm9, %v1597_v3, %v1598_v60  ;;  %v3891_v5 = vsel %vm1099_vm9, %v1598_v60, %v1599_v11 }
 0x29a   : > { %5202 = vst [vmem:[#allocation36_spill] sm:$0xff] %v3887_v59  ;;  %5203 = vst [vmem:[#allocation37_spill] sm:$0xff] %v3891_v5  ;;  %v805_v25 = vpop.f32.mrb[12].mxu1  ;;  %v3915_v5 = vpop.permute.xlu0 %1544 }
 0x29b   : > { %v893_v0 = vrot.slane %v805_v25, 7  ;;  %1296 = vrot.lane.b32.xlu1 %v3826_v14, %s3276_s22  ;;  %v3897_v39 = vpop.f32.mrb[13].mxu1  ;;  %v3907_v11 = vpop.permute.xlu1 %1239 }
 0x29c   : > { %5204 = vst [vmem:[#allocation38_spill] sm:$0xff] %v3897_v39  ;;  %1401 = vrot.lane.b32.xlu0 %v3826_v14, %s3277_s23  ;;  %v809_v1 = vpop.f32.mrb[14].mxu1 }
 0x29d   : > { %v894_v8 = vrot.slane %v809_v1, 7  ;;  %v3901_v3 = vpop.f32.mrb[15].mxu1  ;;  %v3905_v60 = vsel %vm897_vm8, %v892_v17, %v893_v0 }
 0x29e   : > { %5205 = vst [vmem:[#allocation39_spill] sm:$0xff] %v3905_v60 }
 0x29f   : > { %1506 = vrot.lane.b32.xlu1 %v3826_v14, %s3278_s24  ;;  %v3913_v2 = vsel %vm897_vm8, %v893_v0, %v894_v8  ;;  %v3923_v60 = vpop.permute.xlu1 %1539 }
 0x2a0   : > { %5206 = vst [vmem:[#allocation40_spill] sm:$0xff] %v3913_v2  ;;  %982 = vrot.lane.b32.xlu0 %v795_v27, %s3276_s22  ;;  %5208 = vst [vmem:[#allocation42_spill] sm:$0xff] %v3923_v60  ;;  %v3931_v2 = vpop.permute.xlu0 %1620 }
 0x2a1   : > { %5211 = vst [vmem:[#allocation45_spill] sm:$0xff] %v3931_v2 }
 0x2a2   : > { %v815_v59 = vpop.f32.mrb[16].mxu1 }
 0x2a3   : > { %v895_v32 = vrot.slane %v815_v59, 7  ;;  %1071 = vrot.lane.b32.xlu1 %v795_v27, %s3277_s23  ;;  %v3919_v57 = vpop.f32.mrb[17].mxu1  ;;  %v3946_v47 = vpop.permute.xlu1 %1625 }
 0x2a4   : > { %5207 = vst [vmem:[#allocation41_spill] sm:$0xff] %v3919_v57  ;;  %1298 = vrot.lane.b32.xlu0 %v3853_v6, %s3276_s22  ;;  %v819_v17 = vpop.f32.mrb[18].mxu1 }
 0x2a5   : > { %v896_v51 = vrot.slane %v819_v17, 7  ;;  %v3925_v54 = vpop.f32.mrb[19].mxu1  ;;  %v3929_v0 = vsel %vm897_vm8, %v894_v8, %v895_v32  ;;  %v3950_v8 = vpop.permute.xlu0 %1038 }
 0x2a6   : > { %5209 = vst [vmem:[#allocation43_spill] sm:$0xff] %v3925_v54  ;;  %5210 = vst [vmem:[#allocation44_spill] sm:$0xff] %v3929_v0 }
 0x2a7   : > { %1177 = vrot.lane.b32.xlu1 %v795_v27, %s3278_s24  ;;  %v3938_v29 = vsel %vm897_vm8, %v896_v51, %v5212_v49  ;;  %v3942_v60 = vsel %vm897_vm8, %v895_v32, %v896_v51  ;;  %5214 = vst [vmem:[#allocation47_spill] sm:$0xff] %v3950_v8  ;;  %v3955_v49 = vpop.permute.xlu1 %1033  ;;  %v4016_v8 = vld [vmem:[%s5124_s2 + $0x228] sm:$0xff] }
 0x2a8   : > { %5213 = vst [vmem:[#allocation46_spill] sm:$0xff] %v3942_v60  ;;  %1508 = vrot.lane.b32.xlu0 %v3853_v6, %s3278_s24  ;;  %5215 = vst [vmem:[#allocation48_spill] sm:$0xff] %v3955_v49  ;;  %v3237_v49 = vld [vmem:[%s5128_s6 + $0x48] ss:$12 sps:$4 sm:$0xff]  }
 0x2a9   : > { %v3957_v51 = vpop.permute.xlu0 %1360  ;;  %5223 = vst [vmem:[#allocation56_spill] sm:$0xff] %v4016_v8 }
 0x2ab   : > { %1403 = vrot.lane.b32.xlu1 %v3853_v6, %s3277_s23  ;;  %v3962_v32 = vpop.permute.xlu1 %1355 }
 0x2ac   : > { %1073 = vrot.lane.b32.xlu0 %v799_v22, %s3277_s23 }
 0x2ad   : > { %v3966_v7 = vpop.permute.xlu0 %1144 }
 0x2ae   : > { %5216 = vst [vmem:[#allocation49_spill] sm:$0xff] %v3966_v7 }
 0x2af   : > { %984 = vrot.lane.b32.xlu1 %v799_v22, %s3276_s22  ;;  %v3974_v27 = vpop.permute.xlu1 %1139 }
 0x2b0   : > { %1179 = vrot.lane.b32.xlu0 %v799_v22, %s3278_s24  ;;  %5217 = vst [vmem:[#allocation50_spill] sm:$0xff] %v3974_v27 }
 0x2b1   : > { %v3976_v22 = vpop.permute.xlu0 %1465 }
 0x2b3   : > { %1300 = vrot.lane.b32.xlu1 %v3858_v63, %s3276_s22  ;;  %v3981_v0 = vpop.permute.xlu1 %1460 }
 0x2b4   : > { %986 = vrot.lane.b32.xlu0 %v805_v25, %s3276_s22 }
 0x2b5   : > { %v3984_v2 = vpop.permute.xlu0 %1249 }
 0x2b6   : > { %5218 = vst [vmem:[#allocation51_spill] sm:$0xff] %v3984_v2 }
 0x2b7   : > { %1405 = vrot.lane.b32.xlu1 %v3858_v63, %s3277_s23  ;;  %v3990_v60 = vpop.permute.xlu1 %1244 }
 0x2b8   : > { %1302 = vrot.lane.b32.xlu0 %v3897_v39, %s3276_s22  ;;  %5219 = vst [vmem:[#allocation52_spill] sm:$0xff] %v3990_v60 }
 0x2b9   : > { %v3992_v7 = vpop.permute.xlu0 %1554 }
 0x2ba   : > { %5220 = vst [vmem:[#allocation53_spill] sm:$0xff] %v3992_v7 }
 0x2bb   : > { %1510 = vrot.lane.b32.xlu1 %v3858_v63, %s3278_s24 }
 0x2bc   : > { %1407 = vrot.lane.b32.xlu0 %v3897_v39, %s3277_s23 }
 0x2bf   : > { %1075 = vrot.lane.b32.xlu1 %v805_v25, %s3277_s23 }
 0x2c0   : > { %1512 = vrot.lane.b32.xlu0 %v3897_v39, %s3278_s24  ;;  %v3997_v39 = vpop.permute.xlu1 %1549 }
 0x2c3   : > { %1181 = vrot.lane.b32.xlu1 %v805_v25, %s3278_s24  ;;  %v4001_v25 = vpop.permute.xlu0 %1635 }
 0x2c4   : > { %1077 = vrot.lane.b32.xlu0 %v809_v1, %s3277_s23  ;;  %5221 = vst [vmem:[#allocation54_spill] sm:$0xff] %v4001_v25  ;;  %v4007_v2 = vpop.permute.xlu1 %1630 }
 0x2c7   : > { %1304 = vrot.lane.b32.xlu1 %v3901_v3, %s3276_s22  ;;  %v4009_v60 = vpop.permute.xlu0 %1048 }
 0x2c8   : > { %1183 = vrot.lane.b32.xlu0 %v809_v1, %s3278_s24  ;;  %5222 = vst [vmem:[#allocation55_spill] sm:$0xff] %v4009_v60  ;;  %v4018_v25 = vpop.permute.xlu1 %1043  ;;  %v2987_v60 = vld [vmem:[%s5124_s2 + $0x178] sm:$0xff] }
 0x2c9   : > { %5224 = vst [vmem:[#allocation57_spill] sm:$0xff] %v4018_v25 }
 0x2cb   : > { %1079 = vrot.lane.b32.xlu1 %v815_v59, %s3277_s23  ;;  %v4021_v27 = vpop.permute.xlu0 %1370 }
 0x2cc   : > { %1409 = vrot.lane.b32.xlu0 %v3901_v3, %s3277_s23  ;;  %5225 = vst [vmem:[#allocation58_spill] sm:$0xff] %v4021_v27  ;;  %v3240_v27 = vld [vmem:[%s5128_s6 + $0x38] ss:$12 sps:$4 sm:$0xff]   ;;  %v4040_v25 = vpop.permute.xlu1 %1365 }
 0x2cd   : > { %5226 = vst [vmem:[#allocation59_spill] sm:$0xff] %v4040_v25  ;;  %3156 = vmatprep.subr.bf16.mxu1 %v3240_v27  ;;  %v2994_v25 = vld [vmem:[%s5124_s2 + $0x1b0] sm:$0xff] }
 0x2ce   : > { %3157 = vmatpush3.bf16.msra.mxu1 %v3240_v27 }
 0x2cf   : > { %1411 = vrot.lane.b32.xlu1 %v3919_v57, %s3277_s23  ;;  %v4045_v7 = vpop.permute.xlu0 %1154 }
 0x2d0   : > { %1306 = vrot.lane.b32.xlu0 %v3919_v57, %s3276_s22  ;;  %5227 = vst [vmem:[#allocation60_spill] sm:$0xff] %v4045_v7 }
 0x2d3   : > { %1081 = vrot.lane.b32.xlu1 %v819_v17, %s3277_s23  ;;  %v4061_v27 = vpop.permute.xlu0 %1475 }
 0x2d4   : > { %992 = vrot.lane.b32.xlu0 %v819_v17, %s3276_s22  ;;  %5228 = vst [vmem:[#allocation61_spill] sm:$0xff] %v4061_v27 }
 0x2d7   : > { %1187 = vrot.lane.b32.xlu1 %v819_v17, %s3278_s24  ;;  %v3236_v17 = vld [vmem:[%s5128_s6 + $0x34] ss:$12 sps:$4 sm:$0xff]  }
 0x2d8   : > { %988 = vrot.lane.b32.xlu0 %v809_v1, %s3276_s22  ;;  %v3234_v1 = vld [vmem:[%s5128_s6 + $0x30] ss:$12 sps:$4 sm:$0xff]   ;;  %1770 = vmatprep.subr.bf16.mxu0 %v3236_v17 }
 0x2d9   : > { %1771 = vmatpush1.bf16.msra.mxu0 %v3234_v1  ;;  %v3241_v1 = vld [vmem:[%s5128_s6 + $0x50] ss:$12 sps:$4 sm:$0xff]  }
 0x2da   : > { %3158 = vmatprep.subr.bf16.mxu1 %v3241_v1  ;;  %v3002_v17 = vld [vmem:[%s5124_s2 + $0x1f0] sm:$0xff] }
 0x2db   : > { %1645 = vperm.xlu1 %3223, %v4016_v8   ;;  %v2986_v8 = vld [vmem:[%s5124_s2 + $0x170] sm:$0xff]  ;;  %3159 = vmatpush3.bf16.msra.mxu1 %v3241_v1 }
 0x2dc   : > { %1185 = vrot.lane.b32.xlu0 %v815_v59, %s3278_s24 }
 0x2df   : > { %990 = vrot.lane.b32.xlu1 %v815_v59, %s3276_s22  ;;  %v2995_v59 = vld [vmem:[%s5124_s2 + $0x1b8] sm:$0xff] }
 0x2e0   : > { %1380 = vperm.xlu0 %3222, %v2987_v60   ;;  %v3239_v60 = vld [vmem:[%s5128_s6 + $0x4c] ss:$12 sps:$4 sm:$0xff]  }
 0x2e1   : > { %1772 = vmatprep.subr.bf16.mxu0 %v3239_v60  ;;  %v3011_v60 = vld [vmem:[%s5124_s2 + $0x238] sm:$0xff] }
 0x2e2   : > { %1773 = vmatpush1.bf16.msra.mxu0 %v3237_v49  ;;  %v3003_v49 = vld [vmem:[%s5124_s2 + $0x1f8] sm:$0xff] }
 0x2e3   : > { %1375 = vperm.xlu1 %3223, %v2986_v8   ;;  %v4059_v8 = vpop.permute.xlu1 %1149 }
 0x2e4   : > { %1485 = vperm.xlu0 %3222, %v2995_v59  }
 0x2e7   : > { %1480 = vperm.xlu1 %3223, %v2994_v25   ;;  %v4073_v59 = vpop.permute.xlu1 %1470  ;;  %v4075_v25 = vpop.permute.xlu0 %1259 }
 0x2e8   : > { %1516 = vrot.lane.b32.xlu0 %v3919_v57, %s3278_s24  ;;  %5229 = vst [vmem:[#allocation62_spill] sm:$0xff] %v4073_v59  ;;  %5230 = vst [vmem:[#allocation63_spill] sm:$0xff] %v4075_v25  ;;  %v3010_v59 = vld [vmem:[%s5124_s2 + $0x230] sm:$0xff] }
 0x2eb   : > { %1514 = vrot.lane.b32.xlu1 %v3901_v3, %s3278_s24  ;;  %v4082_v1 = vpop.permute.xlu1 %1254 }
 0x2ec   : > { %1569 = vperm.xlu0 %3222, %v3002_v17   ;;  %v4086_v17 = vpop.permute.xlu0 %1564 }
 0x2ed   : > { %5231 = vst [vmem:[#allocation64_spill] sm:$0xff] %v4086_v17 }
 0x2ef   : > { %1574 = vperm.xlu1 %3223, %v3003_v49   ;;  %v4093_v49 = vpop.permute.xlu1 %1559 }
 0x2f0   : > { %1413 = vrot.lane.b32.xlu0 %v3925_v54, %s3277_s23  ;;  %5232 = vst [vmem:[#allocation65_spill] sm:$0xff] %v4093_v49  ;;  %v4095_v27 = vpop.permute.xlu0 %1640 }
 0x2f1   : > { %5233 = vst [vmem:[#allocation66_spill] sm:$0xff] %v4095_v27 }
 0x2f3   : > { %1308 = vrot.lane.b32.xlu1 %v3925_v54, %s3276_s22 }
 0x2f4   : > { %1655 = vperm.xlu0 %3222, %v3011_v60  }
 0x2f7   : > { %1650 = vperm.xlu1 %3223, %v3010_v59  }
 0x2f8   : > { %1518 = vrot.lane.b32.xlu0 %v3925_v54, %s3278_s24 }
 0x2fb   : > { %1504 = vrot.lane.b32.xlu1 %v3817_v9, %s3278_s24 }
 0x2fc   : > { %1939 = vperm.xlu0 %3222, %v3444_v19  }
 0x2fd   : > { %v979_v25 = vpop.permute.xlu1 %978 }
 0x2fe   : > { %v4100_v17 = vpop.permute.xlu0 %1294  ;;  %v1052_v7 = vmul.f32 %v3791_v62, %v979_v25 }
 0x2ff   : > { %1934 = vperm.xlu1 %3223, %v3492_v31  }
 0x300   : > { %2030 = vperm.xlu0 %3222, %v3507_v34   ;;  %v955_v34 = vmul.f32 %v3777_v28, %v3938_v29 }
 0x301   : > { %v4104_v59 = vpop.permute.xlu1 %1067 }
 0x302   : > { %v981_v60 = vpop.permute.xlu0 %980  ;;  %v5156_v54 = vrot.slane %v4104_v59, 1  ;;  %v1060_v62 = vadd.f32 %v1052_v7, %v955_v34 }
 0x303   : > { %1944 = vperm.xlu1 %3223, %v3450_v20  }
 0x304   : > { %2134 = vperm.xlu0 %3222, %v3524_v37  }
 0x305   : > { %v4108_v27 = vpop.permute.xlu1 %1173 }
 0x306   : > { %v1070_v49 = vpop.permute.xlu0 %1069 }
 0x307   : > { %v1092_v19 = vrot.slane %v1070_v49, 1  ;;  %2035 = vperm.xlu1 %3223, %v3501_v33   ;;  %v1197_v49 = vrot.slane %v4108_v27, 7  ;;  %v5273_v27 = vld [vmem:[#allocation27_spill] sm:$0xff] }
 0x308   : > { %2238 = vperm.xlu0 %3222, %v3531_v38  }
 0x309   : > { %v1106_v31 = vsel %vm1099_vm9, %v5156_v54, %v1092_v19  ;;  %v4118_v20 = vpop.permute.xlu1 %1399 }
 0x30a   : > { %v1158_v37 = vmul.f32 %v3795_v15, %v1106_v31  ;;  %v1176_v57 = vpop.permute.xlu0 %1175 }
 0x30b   : > { %v1198_v33 = vrot.slane %v1176_v57, 7  ;;  %2139 = vperm.xlu1 %3223, %v3512_v35  }
 0x30c   : > { %2040 = vperm.xlu0 %3222, %v3548_v42   ;;  %v1166_v54 = vadd.f32 %v1158_v37, %v1060_v62 }
 0x30d   : > { %v1211_v38 = vsel %vm897_vm8, %v1197_v49, %v1198_v33  ;;  %v4130_v25 = vpop.permute.xlu1 %1296 }
 0x30e   : > { %v1263_v29 = vmul.f32 %v3799_v61, %v1211_v38  ;;  %v4133_v28 = vpop.permute.xlu0 %1401  ;;  %v1053_v61 = vmul.f32 %v3809_v23, %v981_v60 }
 0x30f   : > { %2243 = vperm.xlu1 %3223, %v3519_v36   ;;  %v1319_v36 = vrot.slane %v4130_v25, 1  ;;  %v1424_v62 = vrot.slane %v4133_v28, 7 }
 0x310   : > { %v1271_v57 = vadd.f32 %v1263_v29, %v1166_v54  ;;  %2363 = vperm.xlu0 %3222, %v3555_v43  }
 0x311   : > { %v4137_v35 = vpop.permute.xlu1 %1506 }
 0x312   : > { %v983_v42 = vpop.permute.xlu0 %982  ;;  %v1279_v15 = vadd.f32 %v1271_v57, %v3826_v14 }
 0x313   : > { %1949 = vperm.xlu1 %3223, %v3456_v21   ;;  %v956_v21 = vmul.f32 %v3779_v30, %v3834_v12 }
 0x314   : > { %2149 = vperm.xlu0 %3222, %v3572_v46  }
 0x315   : > { %v1072_v7 = vpop.permute.xlu1 %1071  ;;  %v1061_v60 = vadd.f32 %v1053_v61, %v956_v21 }
 0x316   : > { %v1093_v31 = vrot.slane %v1072_v7, 1  ;;  %v1299_v34 = vpop.permute.xlu0 %1298 }
 0x317   : > { %v1320_v37 = vrot.slane %v1299_v34, 1  ;;  %2045 = vperm.xlu1 %3223, %v3536_v40  }
 0x318   : > { %v1105_v43 = vsel %vm1099_vm9, %v1092_v19, %v1093_v31  ;;  %2467 = vperm.xlu0 %3222, %v3584_v48  }
 0x319   : > { %v1159_v46 = vmul.f32 %v3811_v53, %v1105_v43  ;;  %v1178_v54 = vpop.permute.xlu1 %1177  ;;  %v1331_v14 = vsel %vm1099_vm9, %v1319_v36, %v1320_v37 }
 0x31a   : > { %v1199_v23 = vrot.slane %v1178_v54, 7  ;;  %v1509_v40 = vpop.permute.xlu0 %1508  ;;  %v1384_v30 = vmul.f32 %v3813_v56, %v1331_v14  ;;  %v5234_v54 = vld [vmem:[#allocation5_spill] sm:$0xff]  ;;  %v5235_v14 = vld [vmem:[#allocation4_spill] sm:$0xff] }
 0x31b   : > { %2358 = vperm.xlu1 %3223, %v3543_v41   ;;  %v1167_v48 = vadd.f32 %v1159_v46, %v1061_v60  ;;  %v1054_v41 = vmul.f32 %v3803_v18, %v983_v42  ;;  %v957_v18 = vmul.f32 %v3781_v58, %v3862_v24 }
 0x31c   : > { %v1210_v19 = vsel %vm897_vm8, %v1198_v33, %v1199_v23  ;;  %2253 = vperm.xlu0 %3222, %v3596_v50   ;;  %v1392_v56 = vadd.f32 %v1384_v30, %v1279_v15 }
 0x31d   : > { %v1264_v12 = vmul.f32 %v3893_v16, %v1210_v19  ;;  %v1404_v53 = vpop.permute.xlu1 %1403  ;;  %v1062_v43 = vadd.f32 %v1054_v41, %v957_v18 }
 0x31e   : > { %v1425_v38 = vrot.slane %v1404_v53, 7  ;;  %v4162_v29 = vpop.permute.xlu0 %1073  ;;  %v5236_v53 = vld [vmem:[#allocation6_spill] sm:$0xff] }
 0x31f   : > { %v1272_v57 = vadd.f32 %v1264_v12, %v1167_v48  ;;  %v1094_v7 = vrot.slane %v4162_v29, 1  ;;  %2144 = vperm.xlu1 %3223, %v3560_v44  }
 0x320   : > { %v1436_v50 = vsel %vm897_vm8, %v1424_v62, %v1425_v38  ;;  %2550 = vperm.xlu0 %3222, %v3608_v52   ;;  %v1578_v52 = vmul.f32 %v3915_v5, %v1509_v40 }
 0x321   : > { %v1489_v16 = vmul.f32 %v3883_v13, %v1436_v50  ;;  %v1104_v33 = vsel %vm1099_vm9, %v1093_v31, %v1094_v7  ;;  %v985_v34 = vpop.permute.xlu1 %984  ;;  %v1280_v44 = vadd.f32 %v1272_v57, %v3853_v6  ;;  %v1659_v6 = vmul.f32 %v3946_v47, %v3838_v10  ;;  %v5237_v57 = vld [vmem:[#allocation8_spill] sm:$0xff] }
 0x322   : > { %v1160_v42 = vmul.f32 %v3851_v26, %v1104_v33  ;;  %v4181_v61 = vpop.permute.xlu0 %1179  ;;  %v4196_v26 = vld [vmem:[%s5129_s7] ss:$0 sm:$0xff] }
 0x323   : > { %v1497_v15 = vadd.f32 %v1489_v16, %v1392_v56  ;;  %v1200_v13 = vrot.slane %v4181_v61, 7  ;;  %2462 = vperm.xlu1 %3223, %v3567_v45  }
 0x324   : > { %2635 = vperm.xlu0 %3222, %v3620_v55   ;;  %v1168_v5 = vadd.f32 %v1160_v42, %v1062_v43  ;;  %v5238_v42 = vld [vmem:[#allocation7_spill] sm:$0xff] }
 0x325   : > { %v1586_v31 = vadd.f32 %v1578_v52, %v1497_v15  ;;  %v1209_v58 = vsel %vm897_vm8, %v1199_v23, %v1200_v13  ;;  %v1301_v24 = vpop.permute.xlu1 %1300  ;;  %v5239_v52 = vld [vmem:[#allocation9_spill] sm:$0xff]  ;;  %v5240_v15 = vld [vmem:[#allocation32_spill] sm:$0xff] }
 0x326   : > { %v1265_v45 = vmul.f32 %v3907_v11, %v1209_v58  ;;  %v1321_v21 = vrot.slane %v1301_v24, 1  ;;  %v987_v55 = vpop.permute.xlu0 %986 }
 0x327   : > { %v1667_v46 = vadd.f32 %v1659_v6, %v1586_v31  ;;  %2248 = vperm.xlu1 %3223, %v5234_v54  }
 0x328   : > { %v1273_v47 = vadd.f32 %v1265_v45, %v1168_v5  ;;  %v1330_v10 = vsel %vm1099_vm9, %v1320_v37, %v1321_v21  ;;  %1959 = vperm.xlu0 %3222, %v5235_v14   ;;  %v5241_v5 = vld [vmem:[#allocation48_spill] sm:$0xff]  ;;  %v5244_v14 = vld [vmem:[#allocation33_spill] sm:$0xff] }
 0x329   : > { %v1682_v23 = vadd.f32 %v4196_v26, %v1667_v46  ;;  %v1385_v40 = vmul.f32 %v3962_v32, %v1330_v10  ;;  %v1406_v60 = vpop.permute.xlu1 %1405  ;;  %v1055_v45 = vmul.f32 %v5241_v5, %v985_v34  ;;  %v5242_v46 = vld [vmem:[#allocation53_spill] sm:$0xff]  ;;  %v5243_v10 = vld [vmem:[#allocation11_spill] sm:$0xff] }
 0x32a   : > { %v1426_v19 = vrot.slane %v1406_v60, 7  ;;  %v4205_v48 = vpop.permute.xlu0 %1302  ;;  %v1281_v11 = vadd.f32 %v1273_v47, %v3858_v63  ;;  %v5246_v60 = vld [vmem:[#allocation50_spill] sm:$0xff] }
 0x32b   : > { %v1690_v30 = vmax.f32 %v1682_v23, 0.0  ;;  %v1322_v12 = vrot.slane %v4205_v48, 1  ;;  %2555 = vperm.xlu1 %3223, %v5236_v53   ;;  %v1393_v50 = vadd.f32 %v1385_v40, %v1280_v44  ;;  %v1660_v44 = vmul.f32 %v4007_v2, %v5240_v15  ;;  %v5245_v23 = vld [vmem:[#allocation20_spill] sm:$0xff] }
 0x32c   : > { %v1435_v37 = vsel %vm897_vm8, %v1425_v38, %v1426_v19  ;;  %2055 = vperm.xlu0 %3222, %v5237_v57  }
 0x32d   : > { %1698 = vst.msk [vmem:[#allocation2 + $0x8] sm:$0xff] %vm401_vm1, %v1690_v30  ;;  %v1490_v32 = vmul.f32 %v3981_v0, %v1435_v37  ;;  %v1329_v41 = vsel %vm1099_vm9, %v1321_v21, %v1322_v12  ;;  %v1511_v63 = vpop.permute.xlu1 %1510  ;;  %v1928_v0 = vld [vmem:[%s5124_s2 + $0x20] sm:$0xff]  ;;  %v5248_v30 = vld [vmem:[#allocation54_spill] sm:$0xff] }
 0x32e   : > { %v1386_v56 = vmul.f32 %v3957_v51, %v1329_v41  ;;  %v1579_v16 = vmul.f32 %v3997_v39, %v1511_v63  ;;  %v4221_v33 = vpop.permute.xlu0 %1407  ;;  %v5249_v63 = vld [vmem:[#allocation10_spill] sm:$0xff] }
 0x32f   : > { %v1498_v38 = vadd.f32 %v1490_v32, %v1393_v50  ;;  %v1427_v18 = vrot.slane %v4221_v33, 7  ;;  %2630 = vperm.xlu1 %3223, %v5238_v42   ;;  %v5250_v50 = vld [vmem:[#allocation47_spill] sm:$0xff]  ;;  %v5251_v42 = vld [vmem:[#allocation13_spill] sm:$0xff]  ;;  %v5288_v33 = vld [vmem:[#allocation62_spill] sm:$0xff] }
 0x330   : > { %2373 = vperm.xlu0 %3222, %v5239_v52   ;;  %v1394_v58 = vadd.f32 %v1386_v56, %v1281_v11  ;;  %v5247_v11 = vld [vmem:[#allocation36_spill] sm:$0xff]  ;;  %v1056_v56 = vmul.f32 %v5250_v50, %v987_v55  ;;  %v5254_v55 = vld [vmem:[#allocation21_spill] sm:$0xff]  ;;  %v5264_v50 = vld [vmem:[#allocation46_spill] sm:$0xff] }
 0x331   : > { %v1587_v43 = vadd.f32 %v1579_v16, %v1498_v38  ;;  %v1434_v39 = vsel %vm897_vm8, %v1426_v19, %v1427_v18  ;;  %v1076_v51 = vpop.permute.xlu1 %1075  ;;  %v1661_v53 = vmul.f32 %v5248_v30, %v5247_v11 }
 0x332   : > { %v1491_v6 = vmul.f32 %v3976_v22, %v1434_v39  ;;  %v1095_v31 = vrot.slane %v1076_v51, 1  ;;  %v1513_v24 = vpop.permute.xlu0 %1512  ;;  %v958_v22 = vmul.f32 %v5245_v23, %v5244_v14  ;;  %v5253_v39 = vld [vmem:[#allocation39_spill] sm:$0xff] }
 0x333   : > { %v1668_v21 = vadd.f32 %v1660_v44, %v1587_v43  ;;  %v1580_v54 = vmul.f32 %v5242_v46, %v1513_v24  ;;  %1954 = vperm.xlu1 %3223, %v1928_v0   ;;  %v5252_v0 = vld [vmem:[#allocation52_spill] sm:$0xff]  ;;  %v959_v51 = vmul.f32 %v5254_v55, %v5253_v39  ;;  %v5259_v23 = vld [vmem:[#allocation51_spill] sm:$0xff] }
 0x334   : > { %v1103_v2 = vsel %vm1099_vm9, %v1094_v7, %v1095_v31  ;;  %v1499_v47 = vadd.f32 %v1491_v6, %v1394_v58  ;;  %2159 = vperm.xlu0 %3222, %v5243_v10   ;;  %v1063_v32 = vadd.f32 %v1055_v45, %v958_v22  ;;  %v5255_v6 = vld [vmem:[#allocation49_spill] sm:$0xff]  ;;  %v5256_v45 = vld [vmem:[#allocation12_spill] sm:$0xff] }
 0x335   : > { %v1683_v40 = vadd.f32 %v4196_v26, %v1668_v21  ;;  %v1161_v19 = vmul.f32 %v5246_v60, %v1103_v2  ;;  %v1182_v34 = vpop.permute.xlu1 %1181  ;;  %v1064_v21 = vadd.f32 %v1056_v56, %v959_v51  ;;  %v5260_v60 = vld [vmem:[#allocation14_spill] sm:$0xff] }
 0x336   : > { %v1588_v37 = vadd.f32 %v1580_v54, %v1499_v47  ;;  %v1201_v57 = vrot.slane %v1182_v34, 7  ;;  %v4249_v29 = vpop.permute.xlu0 %1077  ;;  %v5257_v54 = vld [vmem:[#allocation15_spill] sm:$0xff]  ;;  %v5258_v47 = vld [vmem:[#allocation38_spill] sm:$0xff]  ;;  %v5261_v34 = vld [vmem:[#allocation17_spill] sm:$0xff] }
 0x337   : > { %v1691_v7 = vmax.f32 %v1683_v40, 0.0  ;;  %v1096_v41 = vrot.slane %v4249_v29, 1  ;;  %2050 = vperm.xlu1 %3223, %v5249_v63   ;;  %v1169_v52 = vadd.f32 %v1161_v19, %v1063_v32  ;;  %v1931_v32 = vld [vmem:[%s5124_s2 + $0x38] sm:$0xff] }
 0x338   : > { %v1669_v16 = vadd.f32 %v1661_v53, %v1588_v37  ;;  %v1208_v38 = vsel %vm897_vm8, %v1200_v13, %v1201_v57  ;;  %2477 = vperm.xlu0 %3222, %v5251_v42   ;;  %v5262_v37 = vld [vmem:[#allocation16_spill] sm:$0xff]  ;;  %v5265_v56 = vld [vmem:[#allocation22_spill] sm:$0xff] }
 0x339   : > { %1699 = vst.msk [vmem:[#allocation2 + $0x10] sm:$0xff] %vm401_vm1, %v1691_v7  ;;  %v1266_v15 = vmul.f32 %v5252_v0, %v1208_v38  ;;  %v1102_v44 = vsel %vm1099_vm9, %v1095_v31, %v1096_v41  ;;  %v4263_v43 = vpop.permute.xlu1 %1304  ;;  %v5266_v38 = vld [vmem:[#allocation25_spill] sm:$0xff] }
 0x33a   : > { %v1684_v61 = vadd.f32 %v4196_v26, %v1669_v16  ;;  %v1162_v58 = vmul.f32 %v5255_v6, %v1102_v44  ;;  %v4269_v13 = vpop.permute.xlu0 %1183  ;;  %v954_v16 = vmul.f32 %v5265_v56, %v5264_v50  ;;  %v5269_v44 = vld [vmem:[#allocation26_spill] sm:$0xff] }
 0x33b   : > { %v1274_v24 = vadd.f32 %v1266_v15, %v1169_v52  ;;  %v1202_v5 = vrot.slane %v4269_v13, 7  ;;  %2368 = vperm.xlu1 %3223, %v5256_v45   ;;  %v5268_v52 = vrot.slane %v4104_v59, 1  ;;  %v3258_v59 = vld [vmem:[%s5124_s2 + $0x1d0] sm:$0xff] }
 0x33c   : > { %v1692_v46 = vmax.f32 %v1684_v61, 0.0  ;;  %2263 = vperm.xlu0 %3222, %v5257_v54   ;;  %v1170_v14 = vadd.f32 %v1162_v58, %v1064_v21  ;;  %v5270_v58 = vld [vmem:[#allocation57_spill] sm:$0xff]  ;;  %v5271_v21 = vld [vmem:[#allocation40_spill] sm:$0xff] }
 0x33d   : > { %v1207_v31 = vsel %vm897_vm8, %v1201_v57, %v1202_v5  ;;  %v4276_v2 = vpop.permute.xlu1 %1079  ;;  %v4279_v10 = vadd.f32 %v1274_v24, %v5258_v47  ;;  %v5263_v57 = vld [vmem:[#allocation19_spill] sm:$0xff]  ;;  %v1318_v24 = vrot.slane %v4100_v17, 1 }
 0x33e   : > { %1700 = vst.msk [vmem:[#allocation2 + $0x18] sm:$0xff] %vm401_vm1, %v1692_v46  ;;  %v1267_v22 = vmul.f32 %v5259_v23, %v1207_v31  ;;  %v4283_v40 = vpop.permute.xlu0 %1409  ;;  %v1097_v15 = vrot.slane %v4276_v2, 1  ;;  %v5272_v46 = vld [vmem:[#allocation23_spill] sm:$0xff] }
 0x33f   : > { %2154 = vperm.xlu1 %3223, %v5260_v60   ;;  %v960_v54 = vmul.f32 %v5272_v46, %v5271_v21  ;;  %v3259_v31 = vld [vmem:[%s5124_s2 + $0x78] sm:$0xff] }
 0x340   : > { %v1275_v19 = vadd.f32 %v1267_v22, %v1170_v14  ;;  %2565 = vperm.xlu0 %3222, %v5261_v34   ;;  %v1101_v47 = vsel %vm1099_vm9, %v1096_v41, %v1097_v15  ;;  %v1423_v22 = vrot.slane %v4118_v20, 7  ;;  %v3260_v41 = vld [vmem:[%s5124_s2 + $0x210] sm:$0xff]  ;;  %v5297_v17 = vld [vmem:[#allocation35_spill] sm:$0xff] }
 0x341   : > { %v4287_v11 = vpop.permute.xlu1 %1411 }
 0x342   : > { %v4289_v30 = vpop.permute.xlu0 %1306  ;;  %v4292_v53 = vadd.f32 %v1275_v19, %v3901_v3  ;;  %v5267_v3 = vld [vmem:[#allocation18_spill] sm:$0xff]  ;;  %v1437_v25 = vsel %vm897_vm8, %v1423_v22, %v1424_v62 }
 0x343   : > { %2472 = vperm.xlu1 %3223, %v5262_v37  }
 0x344   : > { %2645 = vperm.xlu0 %3222, %v5263_v57   ;;  %v1163_v57 = vmul.f32 %v4059_v8, %v1101_v47  ;;  %v5275_v8 = vld [vmem:[#allocation29_spill] sm:$0xff]  ;;  %v3265_v47 = vld [vmem:[%s5124_s2 + $0xf8] sm:$0xff] }
 0x345   : > { %v4296_v29 = vpop.permute.xlu1 %1081 }
 0x346   : > { %v1098_v7 = vrot.slane %v4296_v29, 1  ;;  %v993_v63 = vpop.permute.xlu0 %992  ;;  %v1428_v29 = vrot.slane %v4283_v40, 7  ;;  %v3087_v40 = vld [vmem:[%s5124_s2 + $0x220] sm:$0xff] }
 0x347   : > { %v1051_v42 = vmul.f32 %v5266_v38, %v993_v63  ;;  %2258 = vperm.xlu1 %3223, %v5267_v3   ;;  %v5274_v63 = vld [vmem:[#allocation28_spill] sm:$0xff]  ;;  %v1488_v38 = vmul.f32 %v5275_v8, %v1437_v25  ;;  %v5282_v25 = vld [vmem:[#allocation55_spill] sm:$0xff] }
 0x348   : > { %v1107_v0 = vsel %vm1099_vm9, %v1098_v7, %v5268_v52  ;;  %1969 = vperm.xlu0 %3222, %v1931_v32   ;;  %v1930_v32 = vld [vmem:[%s5124_s2 + $0x30] sm:$0xff]  ;;  %v3262_v52 = vld [vmem:[%s5124_s2 + $0xb8] sm:$0xff]  ;;  %v1433_v48 = vsel %vm897_vm8, %v1427_v18, %v1428_v29 }
 0x349   : > { %v1157_v39 = vmul.f32 %v5269_v44, %v1107_v0  ;;  %v1059_v55 = vadd.f32 %v1051_v42, %v954_v16  ;;  %v4314_v51 = vpop.permute.xlu1 %1187  ;;  %v5276_v0 = vld [vmem:[#allocation42_spill] sm:$0xff] }
 0x34a   : > { %v1204_v61 = vrot.slane %v4314_v51, 7  ;;  %v989_v6 = vpop.permute.xlu0 %988  ;;  %v1577_v44 = vmul.f32 %v5276_v0, %v4137_v35  ;;  %v3063_v35 = vld [vmem:[%s5124_s2 + $0x160] sm:$0xff] }
 0x34b   : > { %v1057_v13 = vmul.f32 %v5270_v58, %v989_v6  ;;  %2560 = vperm.xlu1 %3223, %v3258_v59   ;;  %v1165_v14 = vadd.f32 %v1157_v39, %v1059_v55  ;;  %v5277_v39 = vld [vmem:[#allocation41_spill] sm:$0xff] }
 0x34c   : > { %v1212_v45 = vsel %vm897_vm8, %v1204_v61, %v1197_v49  ;;  %2065 = vperm.xlu0 %3222, %v3259_v31   ;;  %v1332_v49 = vsel %vm1099_vm9, %v1318_v24, %v1319_v36  ;;  %v3261_v36 = vld [vmem:[%s5124_s2 + $0x168] sm:$0xff] }
 0x34d   : > { %v1262_v23 = vmul.f32 %v5273_v27, %v1212_v45  ;;  %v1065_v60 = vadd.f32 %v1057_v13, %v960_v54  ;;  %v1383_v50 = vmul.f32 %v5274_v63, %v1332_v49  ;;  %v5279_v6 = vld [vmem:[#allocation45_spill] sm:$0xff]  ;;  %v1324_v45 = vrot.slane %v4289_v30, 1  ;;  %v3071_v63 = vld [vmem:[%s5124_s2 + $0x1a0] sm:$0xff] }
 0x34e   : > { %v1186_v19 = vpop.permute.xlu0 %1185  ;;  %v3263_v13 = vld [vmem:[%s5124_s2 + $0x70] sm:$0xff]  ;;  %v3264_v59 = vld [vmem:[%s5124_s2 + $0x1a8] sm:$0xff]  ;;  %v1323_v54 = vrot.slane %v4263_v43, 1  ;;  %v1100_v43 = vsel %vm1099_vm9, %v1097_v15, %v1098_v7 }
 0x34f   : > { %v1270_v34 = vadd.f32 %v1262_v23, %v1165_v14  ;;  %v1203_v37 = vrot.slane %v1186_v19, 7  ;;  %2640 = vperm.xlu1 %3223, %v3260_v41   ;;  %v1171_v16 = vadd.f32 %v1163_v57, %v1065_v60  ;;  %v3049_v14 = vld [vmem:[%s5124_s2 + $0xb0] sm:$0xff]  ;;  %v1429_v60 = vrot.slane %v4287_v11, 7  ;;  %v5280_v19 = vld [vmem:[#allocation44_spill] sm:$0xff] }
 0x350   : > { %2383 = vperm.xlu0 %3222, %v3261_v36   ;;  %v1327_v27 = vsel %vm1099_vm9, %v1323_v54, %v1324_v45  ;;  %v3266_v15 = vld [vmem:[%s5124_s2 + $0x1e8] sm:$0xff]  ;;  %v1328_v51 = vsel %vm1099_vm9, %v1322_v12, %v1323_v54  ;;  %v3057_v12 = vld [vmem:[%s5124_s2 + $0xf0] sm:$0xff] }
 0x351   : > { %v1278_v28 = vadd.f32 %v1270_v34, %v3817_v9  ;;  %v1206_v56 = vsel %vm897_vm8, %v1202_v5, %v1203_v37  ;;  %v5278_v5 = vld [vmem:[#allocation30_spill] sm:$0xff]  ;;  %v5281_v34 = vld [vmem:[#allocation24_spill] sm:$0xff]  ;;  %v1205_v7 = vsel %vm897_vm8, %v1203_v37, %v1204_v61  ;;  %v1432_v37 = vsel %vm897_vm8, %v1428_v29, %v1429_v60 }
 0x352   : > { %v1268_v62 = vmul.f32 %v4082_v1, %v1206_v56  ;;  %v1658_v1 = vmul.f32 %v5279_v6, %v5278_v5  ;;  %v961_v41 = vmul.f32 %v5281_v34, %v5280_v19  ;;  %v5292_v34 = vmov 0  }
 0x353   : > { %v1391_v42 = vadd.f32 %v1383_v50, %v1278_v28  ;;  %1964 = vperm.xlu1 %3223, %v1930_v32   ;;  %v5283_v32 = vld [vmem:[#allocation58_spill] sm:$0xff]  ;;  %v5284_v50 = vld [vmem:[#allocation60_spill] sm:$0xff] }
 0x354   : > { %v1276_v3 = vadd.f32 %v1268_v62, %v1171_v16  ;;  %2169 = vperm.xlu0 %3222, %v3262_v52   ;;  %v1388_v2 = vmul.f32 %v5283_v32, %v1327_v27  ;;  %v1164_v28 = vmul.f32 %v5284_v50, %v1100_v43  ;;  %v5285_v16 = vld [vmem:[#allocation63_spill] sm:$0xff] }
 0x355   : > { %v1496_v9 = vadd.f32 %v1488_v38, %v1391_v42  ;;  %v1269_v62 = vmul.f32 %v5285_v16, %v1205_v7  ;;  %v5295_v7 = vld [vmem:[#allocation66_spill] sm:$0xff] }
 0x356   : > { %v4373_v55 = vadd.f32 %v1276_v3, %v5277_v39  ;;  %v1396_v42 = vadd.f32 %v1388_v2, %v4292_v53  ;;  %v5286_v3 = vld [vmem:[#allocation59_spill] sm:$0xff]  ;;  %v5294_v2 = vld [vmem:[#allocation37_spill] sm:$0xff] }
 0x357   : > { %v1585_v58 = vadd.f32 %v1577_v44, %v1496_v9  ;;  %2060 = vperm.xlu1 %3223, %v3263_v13   ;;  %v1387_v52 = vmul.f32 %v5286_v3, %v1328_v51  ;;  %v1708_v44 = vld [vmem:[#allocation2 + $0x18] sm:$0xff]  ;;  %v5287_v9 = vld [vmem:[#allocation61_spill] sm:$0xff] }
 0x358   : > { %2487 = vperm.xlu0 %3222, %v3264_v59   ;;  %v1493_v39 = vmul.f32 %v5287_v9, %v1432_v37  ;;  %v1707_v59 = vld [vmem:[#allocation2 + $0x10] sm:$0xff] }
 0x359   : > { %v1666_v21 = vadd.f32 %v1658_v1, %v1585_v58  ;;  %v1706_v1 = vld [vmem:[#allocation2 + $0x8] sm:$0xff]  ;;  %v1492_v58 = vmul.f32 %v5288_v33, %v1433_v48  ;;  %v1395_v27 = vadd.f32 %v1387_v52, %v4279_v10 }
 0x35a   : > { %v1646_v46 = vpop.permute.xlu1 %1645  ;;  %v1501_v54 = vadd.f32 %v1493_v39, %v1396_v42 }
 0x35b   : > { %v1681_v31 = vadd.f32 %v4196_v26, %v1666_v21  ;;  %2378 = vperm.xlu1 %3223, %v3063_v35   ;;  %v5289_v35 = vld [vmem:[#allocation43_spill] sm:$0xff] }
 0x35c   : > { %2273 = vperm.xlu0 %3222, %v3265_v47   ;;  %v1714_v47 = vpack.c.bf16 %v1708_v44, %v1707_v59 }
 0x35d   : > { %v1689_v23 = vmax.f32 %v1681_v31, 0.0  ;;  %v5290_v31 = vld [vmem:[#allocation64_spill] sm:$0xff] }
 0x35e   : > { %v991_v49 = vpop.permute.xlu1 %990 }
 0x35f   : > { %1697 = vst.msk [vmem:[#allocation2] sm:$0xff] %vm401_vm1, %v1689_v23  ;;  %v1058_v57 = vmul.f32 %v5282_v25, %v991_v49  ;;  %2164 = vperm.xlu1 %3223, %v3049_v14   ;;  %v4410_v36 = vpop.permute.xlu0 %1380  ;;  %v3079_v14 = vld [vmem:[%s5124_s2 + $0x1e0] sm:$0xff]  ;;  %v5291_v23 = vld [vmem:[#allocation34_spill] sm:$0xff]  ;;  %v5293_v25 = vld [vmem:[#allocation65_spill] sm:$0xff] }
 0x360   : > { %2575 = vperm.xlu0 %3222, %v3266_v15   ;;  %v1663_v43 = vmul.f32 %v1646_v46, %v5291_v23  ;;  %v1662_v15 = vmul.f32 %v5295_v7, %v5294_v2 }
 0x361   : > { %v1066_v56 = vadd.f32 %v1058_v57, %v961_v41  ;;  %v1500_v41 = vadd.f32 %v1492_v58, %v1395_v27 }
 0x362   : > { %v4432_v61 = vpop.permute.xlu1 %1375 }
 0x363   : > { %v1172_v8 = vadd.f32 %v1164_v28, %v1066_v56  ;;  %2482 = vperm.xlu1 %3223, %v3071_v63   ;;  %v1486_v38 = vpop.permute.xlu0 %1485  ;;  %v5296_v28 = vld [vmem:[#allocation56_spill] sm:$0xff] }
 0x364   : > { %2650 = vperm.xlu0 %3222, %v3087_v40  }
 0x365   : > { %v1277_v0 = vadd.f32 %v1269_v62, %v1172_v8 }
 0x366   : > { %v1481_v5 = vpop.permute.xlu1 %1480  ;;  %v1705_v6 = vld [vmem:[#allocation2] sm:$0xff] }
 0x367   : > { %2268 = vperm.xlu1 %3223, %v3057_v12   ;;  %v1517_v18 = vpop.permute.xlu0 %1516  ;;  %v1713_v13 = vpack.c.bf16 %v1706_v1, %v1705_v6  ;;  %v1285_v21 = vadd.f32 %v1277_v0, %v5289_v35 }
 0x368   : > { %v1582_v53 = vmul.f32 %v5290_v31, %v1517_v18 }
 0x369   : > { %3027 = vmatmul.mubr.msk.bf16.vlgmr.msra.gmra.mrb[12].mxu0 %vm401_vm1, %v1713_v13  ;;  %3160 = vmatprep.mubr.msk.bf16.mxu1 %vm401_vm1, %v1713_v13 }
 0x36a   : > { %v1590_v49 = vadd.f32 %v1582_v53, %v1501_v54  ;;  %v1515_v19 = vpop.permute.xlu1 %1514  ;;  %3161 = vmatmul.mubr.msk.bf16.vlgmr.msra.gmra.mrb[20].mxu1 %vm401_vm1, %v1714_v47  ;;  %1812 = vmatprep.mubr.bf16.mxu0 %v5292_v34 }
 0x36b   : > { %v1581_v57 = vmul.f32 %v5293_v25, %v1515_v19  ;;  %2570 = vperm.xlu1 %3223, %v3079_v14   ;;  %v1570_v29 = vpop.permute.xlu0 %1569 }
 0x36c   : > { %v1671_v32 = vadd.f32 %v1663_v43, %v1590_v49 }
 0x36d   : > { %v1589_v63 = vadd.f32 %v1581_v57, %v1500_v41 }
 0x36e   : > { %v1686_v10 = vadd.f32 %v4196_v26, %v1671_v32  ;;  %v1575_v50 = vpop.permute.xlu1 %1574 }
 0x36f   : > { %v1670_v46 = vadd.f32 %v1662_v15, %v1589_v63  ;;  %2655 = vperm.xlu1 %3223, %v5296_v28   ;;  %v1414_v56 = vpop.permute.xlu0 %1413 }
 0x370   : > { %v1694_v40 = vmax.f32 %v1686_v10, 0.0  ;;  %v1430_v37 = vrot.slane %v1414_v56, 7 }
 0x371   : > { %v1685_v51 = vadd.f32 %v4196_v26, %v1670_v46  ;;  %3028 = vmatmul.mubr.msk.bf16.gmra.mrb[16].mxu0 %vm401_vm1, %v1714_v47 }
 0x372   : > { %1702 = vst.msk [vmem:[#allocation2 + $0x28] sm:$0xff] %vm401_vm1, %v1694_v40  ;;  %v1309_v16 = vpop.permute.xlu1 %1308  ;;  %1822 = vmatprep.mubr.bf16.mxu0 %v5292_v34  ;;  %v1431_v12 = vsel %vm897_vm8, %v1429_v60, %v1430_v37  ;;  %v1438_v42 = vsel %vm897_vm8, %v1430_v37, %v1423_v22 }
 0x373   : > { %v1693_v62 = vmax.f32 %v1685_v51, 0.0  ;;  %v1325_v8 = vrot.slane %v1309_v16, 1  ;;  %v1656_v48 = vpop.permute.xlu0 %1655  ;;  %v1494_v20 = vmul.f32 %v1481_v5, %v1431_v12  ;;  %v1495_v9 = vmul.f32 %v1486_v38, %v1438_v42 }
 0x375   : > { %1701 = vst.msk [vmem:[#allocation2 + $0x20] sm:$0xff] %vm401_vm1, %v1693_v62  ;;  %v1326_v3 = vsel %vm1099_vm9, %v1324_v45, %v1325_v8  ;;  %v1333_v52 = vsel %vm1099_vm9, %v1325_v8, %v1318_v24 }
 0x376   : > { %v1389_v11 = vmul.f32 %v4432_v61, %v1326_v3  ;;  %v1390_v0 = vmul.f32 %v4410_v36, %v1333_v52  ;;  %v1651_v60 = vpop.permute.xlu1 %1650  ;;  %v5298_v61 = vld [vmem:[#allocation31_spill] sm:$0xff] }
 0x377   : > { %v1519_v44 = vpop.permute.xlu0 %1518  ;;  %v1664_v58 = vmul.f32 %v1651_v60, %v5297_v17  ;;  %v1665_v59 = vmul.f32 %v1656_v48, %v5298_v61 }
 0x378   : > { %v1397_v22 = vadd.f32 %v1389_v11, %v4373_v55  ;;  %v1398_v39 = vadd.f32 %v1390_v0, %v1285_v21  ;;  %v1583_v6 = vmul.f32 %v1570_v29, %v1519_v44 }
 0x379   : > { %v1710_v13 = vld [vmem:[#allocation2 + $0x28] sm:$0xff] }
 0x37a   : > { %v1502_v30 = vadd.f32 %v1494_v20, %v1397_v22  ;;  %v1505_v1 = vpop.permute.xlu1 %1504  ;;  %v1503_v45 = vadd.f32 %v1495_v9, %v1398_v39 }
 0x37b   : > { %v1584_v33 = vmul.f32 %v1575_v50, %v1505_v1  ;;  %v4505_v43 = vpop.permute.xlu0 %1939 }
 0x37c   : > { %v1591_v18 = vadd.f32 %v1583_v6, %v1502_v30  ;;  %v1709_v24 = vld [vmem:[#allocation2 + $0x20] sm:$0xff] }
 0x37d   : > { %v1592_v36 = vadd.f32 %v1584_v33, %v1503_v45  ;;  %v1715_v35 = vpack.c.bf16 %v1710_v13, %v1709_v24 }
 0x37e   : > { %v1672_v54 = vadd.f32 %v1664_v58, %v1591_v18  ;;  %v4501_v27 = vpop.permute.xlu1 %1934 }
 0x37f   : > { %v1673_v5 = vadd.f32 %v1665_v59, %v1592_v36  ;;  %3029 = vmatmul.mubr.msk.bf16.gmra.mrb[20].mxu0 %vm401_vm1, %v1715_v35  ;;  %3164 = vmatprep.mubr.msk.bf16.mxu1 %vm401_vm1, %v1715_v35  ;;  %5299 = vst [vmem:[#allocation5_spill] sm:$0xff] %v4501_v27  ;;  %v4509_v49 = vpop.permute.xlu0 %2030 }
 0x380   : > { %v1687_v55 = vadd.f32 %v4196_v26, %v1672_v54  ;;  %1832 = vmatprep.mubr.bf16.mxu0 %v5292_v34 }
 0x381   : > { %v1688_v38 = vadd.f32 %v4196_v26, %v1673_v5 }
 0x382   : > { %v1695_v21 = vmax.f32 %v1687_v55, 0.0  ;;  %v4503_v23 = vpop.permute.xlu1 %1944 }
 0x383   : > { %v1696_v31 = vmax.f32 %v1688_v38, 0.0  ;;  %v4513_v34 = vpop.permute.xlu0 %2134 }
 0x384   : > { %1703 = vst.msk [vmem:[#allocation2 + $0x30] sm:$0xff] %vm401_vm1, %v1695_v21  ;;  %5300 = vst [vmem:[#allocation4_spill] sm:$0xff] %v4513_v34  ;;  %v3073_v34 = vld [vmem:[%s5124_s2 + $0x1b0] sm:$0xff] }
 0x385   : > { %1704 = vst.msk [vmem:[#allocation2 + $0x38] sm:$0xff] %vm401_vm1, %v1696_v31 }
 0x386   : > { %v4507_v26 = vpop.permute.xlu1 %2035 }
 0x387   : > { %v4517_v25 = vpop.permute.xlu0 %2238 }
 0x388   : > { %5301 = vst [vmem:[#allocation6_spill] sm:$0xff] %v4517_v25 }
 0x38a   : > { %v4511_v19 = vpop.permute.xlu1 %2139 }
 0x38b   : > { %v1711_v53 = vld [vmem:[#allocation2 + $0x30] sm:$0xff]  ;;  %v4521_v29 = vpop.permute.xlu0 %2040 }
 0x38c   : > { %v1712_v47 = vld [vmem:[#allocation2 + $0x38] sm:$0xff] }
 0x38d   : > { %v1716_v14 = vpack.c.bf16 %v1712_v47, %v1711_v53 }
 0x38e   : > { %v4515_v41 = vpop.permute.xlu1 %2243 }
 0x38f   : > { %3030 = vmatmul.mubr.msk.bf16.gmra.mrb[24].mxu0 %vm401_vm1, %v1716_v14  ;;  %3165 = vmatmul.mubr.msk.bf16.gmra.mrb[24].mxu1 %vm401_vm1, %v1716_v14  ;;  %v4525_v2 = vpop.permute.xlu0 %2363 }
 0x392   : > { %v4519_v57 = vpop.permute.xlu1 %1949 }
 0x393   : > { %v4529_v15 = vpop.permute.xlu0 %2149 }
 0x396   : > { %v4523_v32 = vpop.permute.xlu1 %2045 }
 0x397   : > { %v4533_v10 = vpop.permute.xlu0 %2467 }
 0x39a   : > { %v4527_v7 = vpop.permute.xlu1 %2358 }
 0x39b   : > { %5302 = vst [vmem:[#allocation8_spill] sm:$0xff] %v4527_v7  ;;  %v4537_v46 = vpop.permute.xlu0 %2253 }
 0x39e   : > { %v4531_v63 = vpop.permute.xlu1 %2144 }
 0x39f   : > { %v4568_v44 = vpop.permute.xlu0 %2550 }
 0x3a0   : > { %5305 = vst [vmem:[#allocation32_spill] sm:$0xff] %v4568_v44 }
 0x3a2   : > { %v4535_v50 = vpop.permute.xlu1 %2462 }
 0x3a3   : > { %5303 = vst [vmem:[#allocation7_spill] sm:$0xff] %v4535_v50  ;;  %v4599_v18 = vpop.permute.xlu0 %2635 }
 0x3a6   : > { %v4539_v28 = vpop.permute.xlu1 %2248 }
 0x3a7   : > { %v4612_v61 = vpop.permute.xlu0 %1959 }
 0x3aa   : > { %v4576_v9 = vpop.permute.xlu1 %2555 }
 0x3ab   : > { %v4621_v5 = vpop.permute.xlu0 %2055 }
 0x3ae   : > { %v4601_v24 = vpop.permute.xlu1 %2630 }
 0x3af   : > { %5308 = vst [vmem:[#allocation11_spill] sm:$0xff] %v4601_v24  ;;  %v4642_v14 = vpop.permute.xlu0 %2373 }
 0x3b2   : > { %v4614_v59 = vpop.permute.xlu1 %1954 }
 0x3b6   : > { %v4623_v38 = vpop.permute.xlu1 %2050 }
 0x43c   : > { %v4541_v56 = vpop.f32.mrb[12].mxu0 }
 0x43d   : > { %v3162_v40 = vpop.f32.mrb[20].mxu1  ;;  %1996 = vrot.lane.b32.xlu1 %v4541_v56, %s3276_s22  ;;  %2084 = vrot.lane.b32.xlu0 %v4541_v56, %s3277_s23  ;;  %v4547_v51 = vpop.f32.mrb[13].mxu0  ;;  %v5158_v62 = vrot.slane %v4541_v56, 7 }
 0x43e   : > { %5304 = vst [vmem:[#allocation9_spill] sm:$0xff] %v4547_v51  ;;  %v1808_v37 = vpop.f32.mrb[14].mxu0  ;;  %v4549_v16 = vpop.f32.mrb[21].mxu1  ;;  %v2606_v42 = vrot.slane %v3162_v40, 1 }
 0x43f   : > { %v1909_v8 = vrot.slane %v1808_v37, 7  ;;  %v4552_v48 = vpop.f32.mrb[15].mxu0  ;;  %v4554_v12 = vpop.f32.mrb[22].mxu1  ;;  %v5157_v11 = vrot.slane %v4549_v16, 1 }
 0x440   : > { %v5159_v3 = vrot.slane %v4554_v12, 1  ;;  %v1880_v52 = vpop.f32.mrb[23].mxu1  ;;  %v4644_v40 = vpop.permute.xlu1 %2368  ;;  %v5313_v50 = vrot.slane %v4554_v12, 1 }
 0x441   : > { %v2605_v0 = vrot.slane %v1880_v52, 1  ;;  %2188 = vrot.lane.b32.xlu0 %v4541_v56, %s3278_s24  ;;  %2308 = vrot.lane.b32.xlu1 %v4547_v51, %s3276_s22  ;;  %v4566_v60 = vsel %vm897_vm8, %v5158_v62, %v1909_v8 }
 0x442   : > { %v4574_v20 = vsel %vm1099_vm9, %v2606_v42, %v5159_v3 }
 0x443   : > { %v4580_v22 = vsel %vm1099_vm9, %v2605_v0, %v2606_v42  ;;  %v4586_v39 = vsel %vm1099_vm9, %v5157_v11, %v2605_v0 }
 0x444   : > { %5306 = vst [vmem:[#allocation48_spill] sm:$0xff] %v4580_v22  ;;  %5307 = vst [vmem:[#allocation53_spill] sm:$0xff] %v4586_v39  ;;  %v1814_v30 = vpop.f32.mrb[16].mxu0 }
 0x445   : > { %v1910_v6 = vrot.slane %v1814_v30, 7  ;;  %2412 = vrot.lane.b32.xlu0 %v4547_v51, %s3277_s23  ;;  %2086 = vrot.lane.b32.xlu1 %v1808_v37, %s3277_s23  ;;  %v4591_v1 = vpop.f32.mrb[17].mxu0 }
 0x446   : > { %v1818_v45 = vpop.f32.mrb[18].mxu0 }
 0x447   : > { %v1911_v33 = vrot.slane %v1818_v45, 7  ;;  %v4593_v17 = vpop.f32.mrb[19].mxu0  ;;  %v4597_v58 = vsel %vm897_vm8, %v1909_v8, %v1910_v6  ;;  %v4651_v8 = vpop.permute.xlu1 %2154 }
 0x449   : > { %2190 = vrot.lane.b32.xlu1 %v1808_v37, %s3278_s24  ;;  %2310 = vrot.lane.b32.xlu0 %v4552_v48, %s3276_s22  ;;  %v4608_v13 = vsel %vm897_vm8, %v1910_v6, %v1911_v33 }
 0x44d   : > { %1998 = vrot.lane.b32.xlu1 %v1808_v37, %s3276_s22  ;;  %2088 = vrot.lane.b32.xlu0 %v1814_v30, %s3277_s23  ;;  %v4649_v37 = vpop.permute.xlu0 %2159 }
 0x451   : > { %2414 = vrot.lane.b32.xlu1 %v4552_v48, %s3277_s23  ;;  %2000 = vrot.lane.b32.xlu0 %v1814_v30, %s3276_s22 }
 0x452   : > { %v1824_v36 = vpop.f32.mrb[20].mxu0 }
 0x453   : > { %v1912_v35 = vrot.slane %v1824_v36, 7  ;;  %v4619_v54 = vpop.f32.mrb[21].mxu0 }
 0x454   : > { %v1828_v55 = vpop.f32.mrb[22].mxu0 }
 0x455   : > { %v1913_v21 = vrot.slane %v1828_v55, 7  ;;  %2518 = vrot.lane.b32.xlu1 %v4552_v48, %s3278_s24  ;;  %2416 = vrot.lane.b32.xlu0 %v4591_v1, %s3277_s23  ;;  %v4629_v31 = vpop.f32.mrb[23].mxu0  ;;  %v4633_v53 = vsel %vm897_vm8, %v1911_v33, %v1912_v35 }
 0x457   : > { %v4637_v47 = vsel %vm897_vm8, %v1912_v35, %v1913_v21 }
 0x458   : > { %5309 = vst [vmem:[#allocation33_spill] sm:$0xff] %v4637_v47 }
 0x459   : > { %2192 = vrot.lane.b32.xlu1 %v1814_v30, %s3278_s24  ;;  %2520 = vrot.lane.b32.xlu0 %v4591_v1, %s3278_s24 }
 0x45d   : > { %2312 = vrot.lane.b32.xlu1 %v4591_v1, %s3276_s22  ;;  %2194 = vrot.lane.b32.xlu0 %v1818_v45, %s3278_s24 }
 0x461   : > { %2090 = vrot.lane.b32.xlu1 %v1818_v45, %s3277_s23  ;;  %2004 = vrot.lane.b32.xlu0 %v1824_v36, %s3276_s22 }
 0x462   : > { %v1834_v42 = vpop.f32.mrb[24].mxu0  ;;  %v3166_v52 = vpop.f32.mrb[24].mxu1 }
 0x463   : > { %v1914_v0 = vrot.slane %v1834_v42, 7  ;;  %v4655_v30 = vpop.f32.mrb[25].mxu0  ;;  %v1893_v6 = vpop.f32.mrb[25].mxu1  ;;  %v2610_v62 = vrot.slane %v3166_v52, 1 }
 0x464   : > { %5310 = vst [vmem:[#allocation20_spill] sm:$0xff] %v4655_v30  ;;  %v2608_v33 = vrot.slane %v1893_v6, 1  ;;  %v1838_v35 = vpop.f32.mrb[26].mxu0  ;;  %v3167_v11 = vpop.f32.mrb[26].mxu1 }
 0x465   : > { %v1915_v3 = vrot.slane %v1838_v35, 7  ;;  %v2611_v39 = vrot.slane %v3167_v11, 1  ;;  %2002 = vrot.lane.b32.xlu1 %v1818_v45, %s3276_s22  ;;  %2316 = vrot.lane.b32.xlu0 %v4619_v54, %s3276_s22  ;;  %v4660_v24 = vpop.f32.mrb[27].mxu0  ;;  %v1896_v22 = vpop.f32.mrb[27].mxu1  ;;  %v4664_v44 = vsel %vm897_vm8, %v1913_v21, %v1914_v0  ;;  %v5315_v45 = vrot.slane %v4541_v56, 7 }
 0x466   : > { %5311 = vst [vmem:[#allocation50_spill] sm:$0xff] %v4660_v24  ;;  %5312 = vst [vmem:[#allocation36_spill] sm:$0xff] %v4664_v44  ;;  %v4670_v6 = vsel %vm1099_vm9, %v5313_v50, %v2608_v33  ;;  %v2609_v52 = vrot.slane %v1896_v22, 1  ;;  %v4694_v22 = vpop.permute.xlu0 %2477  ;;  %v5317_v56 = vrot.slane %v4549_v16, 1 }
 0x467   : > { %v4674_v11 = vsel %vm1099_vm9, %v2610_v62, %v2611_v39  ;;  %v4680_v7 = vsel %vm897_vm8, %v1915_v3, %v5315_v45  ;;  %v4684_v21 = vsel %vm897_vm8, %v1914_v0, %v1915_v3 }
 0x468   : > { %5314 = vst [vmem:[#allocation54_spill] sm:$0xff] %v4674_v11  ;;  %v4688_v12 = vsel %vm1099_vm9, %v2609_v52, %v2610_v62  ;;  %v4692_v50 = vsel %vm1099_vm9, %v2608_v33, %v2609_v52  ;;  %v4696_v11 = vpop.permute.xlu1 %2472  ;;  %v4706_v62 = vsel %vm1099_vm9, %v2611_v39, %v5317_v56 }
 0x469   : > { %5316 = vst [vmem:[#allocation10_spill] sm:$0xff] %v4688_v12  ;;  %2314 = vrot.lane.b32.xlu1 %v4593_v17, %s3276_s22  ;;  %2420 = vrot.lane.b32.xlu0 %v4619_v54, %s3277_s23  ;;  %5318 = vst [vmem:[#allocation47_spill] sm:$0xff] %v4706_v62  ;;  %v3065_v62 = vld [vmem:[%s5124_s2 + $0x170] sm:$0xff] }
 0x46a   : > { %v4712_v3 = vpop.permute.xlu0 %2263 }
 0x46c   : > { %v4714_v0 = vpop.permute.xlu1 %2258 }
 0x46d   : > { %2418 = vrot.lane.b32.xlu1 %v4593_v17, %s3277_s23  ;;  %2524 = vrot.lane.b32.xlu0 %v4619_v54, %s3278_s24 }
 0x46e   : > { %v4719_v16 = vpop.permute.xlu0 %2565 }
 0x470   : > { %v4721_v33 = vpop.permute.xlu1 %2560 }
 0x471   : > { %2522 = vrot.lane.b32.xlu1 %v4593_v17, %s3278_s24  ;;  %2094 = vrot.lane.b32.xlu0 %v1828_v55, %s3277_s23 }
 0x472   : > { %v4727_v39 = vpop.permute.xlu0 %2645 }
 0x474   : > { %v4729_v52 = vpop.permute.xlu1 %2640 }
 0x475   : > { %2092 = vrot.lane.b32.xlu1 %v1824_v36, %s3277_s23  ;;  %2198 = vrot.lane.b32.xlu0 %v1828_v55, %s3278_s24 }
 0x476   : > { %v4735_v45 = vpop.permute.xlu0 %1969 }
 0x477   : > { %5319 = vst [vmem:[#allocation13_spill] sm:$0xff] %v4735_v45  ;;  %v3066_v45 = vld [vmem:[%s5124_s2 + $0x178] sm:$0xff] }
 0x478   : > { %v4737_v56 = vpop.permute.xlu1 %1964 }
 0x479   : > { %2196 = vrot.lane.b32.xlu1 %v1824_v36, %s3278_s24  ;;  %2006 = vrot.lane.b32.xlu0 %v1828_v55, %s3276_s22  ;;  %5320 = vst [vmem:[#allocation52_spill] sm:$0xff] %v4737_v56 }
 0x47a   : > { %v4744_v36 = vpop.permute.xlu0 %2065 }
 0x47b   : > { %5321 = vst [vmem:[#allocation39_spill] sm:$0xff] %v4744_v36 }
 0x47c   : > { %v4746_v55 = vpop.permute.xlu1 %2060 }
 0x47d   : > { %2422 = vrot.lane.b32.xlu0 %v4629_v31, %s3277_s23  ;;  %2318 = vrot.lane.b32.xlu1 %v4629_v31, %s3276_s22  ;;  %5322 = vst [vmem:[#allocation21_spill] sm:$0xff] %v4746_v55 }
 0x47e   : > { %v4754_v12 = vpop.permute.xlu0 %2383 }
 0x47f   : > { %5323 = vst [vmem:[#allocation49_spill] sm:$0xff] %v4754_v12  ;;  %v3081_v12 = vld [vmem:[%s5124_s2 + $0x1f0] sm:$0xff] }
 0x480   : > { %v4756_v25 = vpop.permute.xlu1 %2378 }
 0x481   : > { %2096 = vrot.lane.b32.xlu1 %v1834_v42, %s3277_s23  ;;  %2320 = vrot.lane.b32.xlu0 %v4655_v30, %s3276_s22  ;;  %5324 = vst [vmem:[#allocation12_spill] sm:$0xff] %v4756_v25 }
 0x482   : > { %v4766_v44 = vpop.permute.xlu0 %2169 }
 0x483   : > { %5325 = vst [vmem:[#allocation15_spill] sm:$0xff] %v4766_v44 }
 0x484   : > { %v4768_v56 = vpop.permute.xlu1 %2164 }
 0x485   : > { %2008 = vrot.lane.b32.xlu1 %v1834_v42, %s3276_s22  ;;  %2098 = vrot.lane.b32.xlu0 %v1838_v35, %s3277_s23  ;;  %5326 = vst [vmem:[#allocation38_spill] sm:$0xff] %v4768_v56 }
 0x489   : > { %2424 = vrot.lane.b32.xlu1 %v4655_v30, %s3277_s23  ;;  %2010 = vrot.lane.b32.xlu0 %v1838_v35, %s3276_s22 }
 0x48d   : > { %2388 = vperm.xlu1 %3223, %v3065_v62   ;;  %2202 = vrot.lane.b32.xlu0 %v1838_v35, %s3278_s24  ;;  %v3082_v35 = vld [vmem:[%s5124_s2 + $0x1f8] sm:$0xff]  ;;  %v4780_v62 = vpop.permute.xlu1 %2482 }
 0x48e   : > { %5328 = vst [vmem:[#allocation14_spill] sm:$0xff] %v4780_v62 }
 0x491   : > { %2492 = vperm.xlu1 %3223, %v3073_v34   ;;  %2200 = vrot.lane.b32.xlu0 %v1834_v42, %s3278_s24  ;;  %v3074_v34 = vld [vmem:[%s5124_s2 + $0x1b8] sm:$0xff]  ;;  %v4778_v42 = vpop.permute.xlu0 %2487 }
 0x492   : > { %5327 = vst [vmem:[#allocation51_spill] sm:$0xff] %v4778_v42  ;;  %v4794_v42 = vpop.permute.xlu1 %2268 }
 0x493   : > { %5330 = vst [vmem:[#allocation16_spill] sm:$0xff] %v4794_v42 }
 0x495   : > { %2526 = vrot.lane.b32.xlu1 %v4629_v31, %s3278_s24  ;;  %2393 = vperm.xlu0 %3222, %v3066_v45   ;;  %v3089_v45 = vld [vmem:[%s5124_s2 + $0x230] sm:$0xff]  ;;  %v4792_v25 = vpop.permute.xlu0 %2273 }
 0x496   : > { %5329 = vst [vmem:[#allocation17_spill] sm:$0xff] %v4792_v25  ;;  %v4799_v62 = vpop.permute.xlu1 %2570  ;;  %v3090_v25 = vld [vmem:[%s5124_s2 + $0x238] sm:$0xff] }
 0x497   : > { %5332 = vst [vmem:[#allocation46_spill] sm:$0xff] %v4799_v62 }
 0x499   : > { %2585 = vperm.xlu1 %3223, %v3082_v35   ;;  %2497 = vperm.xlu0 %3222, %v3074_v34   ;;  %v5161_v35 = vmov 0.0|0.0   ;;  %v4797_v34 = vpop.permute.xlu0 %2575 }
 0x49a   : > { %3187 = vmatprep.subr.bf16.mxu0 %v5161_v35  ;;  %5331 = vst [vmem:[#allocation19_spill] sm:$0xff] %v4797_v34 }
 0x49d   : > { %2322 = vrot.lane.b32.xlu1 %v4660_v24, %s3276_s22  ;;  %2528 = vrot.lane.b32.xlu0 %v4655_v30, %s3278_s24  ;;  %v2741_v30 = vld [vmem:[#allocation3] sm:$0x1] }
 0x4a1   : > { %2660 = vperm.xlu1 %3223, %v3089_v45   ;;  %2580 = vperm.xlu0 %3222, %v3081_v12   ;;  %v4808_v12 = vpop.permute.xlu0 %2650  ;;  %v4810_v45 = vpop.permute.xlu1 %2655 }
 0x4a2   : > { %5333 = vst [vmem:[#allocation22_spill] sm:$0xff] %v4808_v12  ;;  %5334 = vst [vmem:[#allocation25_spill] sm:$0xff] %v4810_v45 }
 0x4a5   : > { %2516 = vrot.lane.b32.xlu1 %v4547_v51, %s3278_s24  ;;  %2426 = vrot.lane.b32.xlu0 %v4660_v24, %s3277_s23 }
 0x4a9   : > { %2744 = vperm.xlu1 %3223, %v2741_v30   ;;  %2665 = vperm.xlu0 %3222, %v3090_v25  }
 0x4ad   : > { %2530 = vrot.lane.b32.xlu0 %v4660_v24, %s3278_s24  ;;  %v1973_v24 = vmul.f32 %v4505_v43, %v4680_v7 }
 0x4af   : > { %v1997_v35 = vpop.permute.xlu1 %1996  ;;  %v4814_v34 = vpop.permute.xlu0 %2084 }
 0x4b0   : > { %5335 = vst [vmem:[#allocation18_spill] sm:$0xff] %v4814_v34  ;;  %v5167_v30 = vrot.slane %v4814_v34, 1  ;;  %v2069_v12 = vmul.f32 %v4507_v26, %v1997_v35 }
 0x4b2   : > { %v2077_v36 = vadd.f32 %v2069_v12, %v1973_v24 }
 0x4b3   : > { %v4816_v62 = vpop.permute.xlu1 %2308  ;;  %v4818_v42 = vpop.permute.xlu0 %2188 }
 0x4b4   : > { %5336 = vst [vmem:[#allocation26_spill] sm:$0xff] %v4816_v62 }
 0x4b7   : > { %v2087_v51 = vpop.permute.xlu1 %2086  ;;  %v4820_v44 = vpop.permute.xlu0 %2412 }
 0x4b8   : > { %5337 = vst [vmem:[#allocation57_spill] sm:$0xff] %v4820_v44  ;;  %v2109_v25 = vrot.slane %v2087_v51, 1  ;;  %v5169_v44 = vrot.slane %v4818_v42, 7 }
 0x4ba   : > { %v2122_v45 = vsel %vm1099_vm9, %v5167_v30, %v2109_v25 }
 0x4bb   : > { %v2173_v56 = vmul.f32 %v4511_v19, %v2122_v45  ;;  %v2191_v47 = vpop.permute.xlu1 %2190  ;;  %v4831_v55 = vpop.permute.xlu0 %2310 }
 0x4bc   : > { %v2213_v62 = vrot.slane %v2191_v47, 7  ;;  %v3281_v47 = vmov 0.0  }
 0x4bd   : > { %v2181_v51 = vadd.f32 %v2173_v56, %v2077_v36  ;;  %3184 = vmatprep.mubr.msk.f32.mxu0 %vm3280_vm10, %v3281_v47  ;;  %v1974_v56 = vmul.f32 %v4503_v23, %v4566_v60 }
 0x4be   : > { %v2226_v26 = vsel %vm897_vm8, %v5169_v44, %v2213_v62 }
 0x4bf   : > { %v2277_v35 = vmul.f32 %v4515_v41, %v2226_v26  ;;  %v1999_v30 = vpop.permute.xlu1 %1998  ;;  %v2089_v34 = vpop.permute.xlu0 %2088 }
 0x4c0   : > { %v2110_v27 = vrot.slane %v2089_v34, 1  ;;  %v2070_v24 = vmul.f32 %v4521_v29, %v1999_v30 }
 0x4c1   : > { %v2285_v43 = vadd.f32 %v2277_v35, %v2181_v51 }
 0x4c2   : > { %v2121_v41 = vsel %vm1099_vm9, %v2109_v25, %v2110_v27  ;;  %v2078_v36 = vadd.f32 %v2070_v24, %v1974_v56  ;;  %v2333_v25 = vrot.slane %v4831_v55, 1 }
 0x4c3   : > { %v4839_v7 = vpop.permute.xlu1 %2414  ;;  %v2001_v19 = vpop.permute.xlu0 %2000  ;;  %v2293_v45 = vadd.f32 %v2285_v43, %v4552_v48  ;;  %v2174_v26 = vmul.f32 %v4531_v63, %v2121_v41 }
 0x4c4   : > { %v2437_v23 = vrot.slane %v4839_v7, 7  ;;  %v2071_v24 = vmul.f32 %v4523_v32, %v2001_v19 }
 0x4c5   : > { %v2182_v30 = vadd.f32 %v2174_v26, %v2078_v36 }
 0x4c7   : > { %v4843_v12 = vpop.permute.xlu1 %2518  ;;  %v4845_v44 = vpop.permute.xlu0 %2416 }
 0x4c8   : > { %5338 = vst [vmem:[#allocation40_spill] sm:$0xff] %v4843_v12  ;;  %v2438_v35 = vrot.slane %v4845_v44, 7 }
 0x4ca   : > { %v2449_v44 = vsel %vm897_vm8, %v2437_v23, %v2438_v35 }
 0x4cb   : > { %v2193_v48 = vpop.permute.xlu1 %2192  ;;  %v2521_v34 = vpop.permute.xlu0 %2520 }
 0x4cc   : > { %v2214_v51 = vrot.slane %v2193_v48, 7 }
 0x4ce   : > { %v2225_v29 = vsel %vm897_vm8, %v2213_v62, %v2214_v51 }
 0x4cf   : > { %v2278_v43 = vmul.f32 %v4539_v28, %v2225_v29  ;;  %v2313_v47 = vpop.permute.xlu1 %2312  ;;  %v4856_v12 = vpop.permute.xlu0 %2194  ;;  %v1975_v29 = vmul.f32 %v4519_v57, %v4597_v58 }
 0x4d0   : > { %v2334_v60 = vrot.slane %v2313_v47, 1  ;;  %v2215_v28 = vrot.slane %v4856_v12, 7 }
 0x4d1   : > { %v2286_v63 = vadd.f32 %v2278_v43, %v2182_v30  ;;  %v2501_v30 = vmul.f32 %v4533_v10, %v2449_v44  ;;  %v2079_v19 = vadd.f32 %v2071_v24, %v1975_v29  ;;  %v2669_v10 = vmul.f32 %v4599_v18, %v4574_v20 }
 0x4d2   : > { %v2345_v62 = vsel %vm1099_vm9, %v2333_v25, %v2334_v60  ;;  %v2224_v32 = vsel %vm897_vm8, %v2214_v51, %v2215_v28 }
 0x4d3   : > { %v2397_v41 = vmul.f32 %v4525_v2, %v2345_v62  ;;  %v4871_v56 = vpop.permute.xlu1 %2090  ;;  %v2005_v36 = vpop.permute.xlu0 %2004  ;;  %v2294_v26 = vadd.f32 %v2286_v63, %v4591_v1  ;;  %v2589_v1 = vmul.f32 %v4576_v9, %v2521_v34  ;;  %v2279_v51 = vmul.f32 %v4537_v46, %v2224_v32 }
 0x4d4   : > { %v2111_v48 = vrot.slane %v4871_v56, 1 }
 0x4d5   : > { %v2405_v43 = vadd.f32 %v2397_v41, %v2293_v45 }
 0x4d6   : > { %v2120_v2 = vsel %vm1099_vm9, %v2110_v27, %v2111_v48  ;;  %v4896_v27 = vld [vmem:[%s5129_s7 + $0x1] ss:$0 sm:$0xff] }
 0x4d7   : > { %v2509_v47 = vadd.f32 %v2501_v30, %v2405_v43  ;;  %v2175_v63 = vmul.f32 %v4529_v15, %v2120_v2  ;;  %v2003_v57 = vpop.permute.xlu1 %2002  ;;  %v4888_v58 = vpop.permute.xlu0 %2316 }
 0x4d8   : > { %v2336_v15 = vrot.slane %v4888_v58, 1  ;;  %v5366_v58 = vld [vmem:[#allocation12_spill] sm:$0xff] }
 0x4d9   : > { %v2597_v45 = vadd.f32 %v2589_v1, %v2509_v47  ;;  %v2183_v44 = vadd.f32 %v2175_v63, %v2079_v19 }
 0x4db   : > { %v2677_v62 = vadd.f32 %v2669_v10, %v2597_v45  ;;  %v2287_v9 = vadd.f32 %v2279_v51, %v2183_v44  ;;  %v2315_v34 = vpop.permute.xlu1 %2314  ;;  %v4898_v24 = vpop.permute.xlu0 %2420 }
 0x4dc   : > { %v2335_v41 = vrot.slane %v2315_v34, 1  ;;  %v2440_v1 = vrot.slane %v4898_v24, 7 }
 0x4dd   : > { %v2693_v29 = vadd.f32 %v4896_v27, %v2677_v62  ;;  %v2295_v20 = vadd.f32 %v2287_v9, %v4593_v17 }
 0x4de   : > { %v2343_v46 = vsel %vm1099_vm9, %v2335_v41, %v2336_v15  ;;  %v2344_v18 = vsel %vm1099_vm9, %v2334_v60, %v2335_v41  ;;  %v2670_v41 = vmul.f32 %v4729_v52, %v4670_v6  ;;  %v1976_v6 = vmul.f32 %v4614_v59, %v4608_v13 }
 0x4df   : > { %v2701_v30 = vmax.f32 %v2693_v29, 0.0  ;;  %v2398_v43 = vmul.f32 %v4644_v40, %v2344_v18  ;;  %v2399_v32 = vmul.f32 %v4642_v14, %v2343_v46  ;;  %v2419_v2 = vpop.permute.xlu1 %2418  ;;  %v2525_v19 = vpop.permute.xlu0 %2524  ;;  %v2073_v18 = vmul.f32 %v4621_v5, %v2005_v36 }
 0x4e0   : > { %v2439_v47 = vrot.slane %v2419_v2, 7  ;;  %v2591_v9 = vmul.f32 %v4719_v16, %v2525_v19 }
 0x4e1   : > { %2709 = vst.msk [vmem:[#allocation2 + $0x8] sm:$0xff] %vm401_vm1, %v2701_v30  ;;  %v2407_v14 = vadd.f32 %v2399_v32, %v2295_v20  ;;  %v2406_v45 = vadd.f32 %v2398_v43, %v2294_v26  ;;  %v1977_v43 = vmul.f32 %v4612_v61, %v4633_v53 }
 0x4e2   : > { %v2447_v17 = vsel %vm897_vm8, %v2439_v47, %v2440_v1  ;;  %v2448_v60 = vsel %vm897_vm8, %v2438_v35, %v2439_v47  ;;  %v2671_v35 = vmul.f32 %v4727_v39, %v4692_v50 }
 0x4e3   : > { %v2502_v63 = vmul.f32 %v4696_v11, %v2448_v60  ;;  %v2503_v40 = vmul.f32 %v4694_v22, %v2447_v17  ;;  %v2523_v10 = vpop.permute.xlu1 %2522  ;;  %v2095_v51 = vpop.permute.xlu0 %2094 }
 0x4e4   : > { %v2590_v44 = vmul.f32 %v4721_v33, %v2523_v10  ;;  %v2113_v20 = vrot.slane %v2095_v51, 1  ;;  %v2072_v33 = vmul.f32 %v4623_v38, %v2003_v57  ;;  %v2081_v57 = vadd.f32 %v2073_v18, %v1977_v43  ;;  %v5343_v18 = vld [vmem:[#allocation26_spill] sm:$0xff]  ;;  %v5345_v43 = vld [vmem:[#allocation33_spill] sm:$0xff] }
 0x4e5   : > { %v2511_v62 = vadd.f32 %v2503_v40, %v2407_v14  ;;  %v2510_v34 = vadd.f32 %v2502_v63, %v2406_v45 }
 0x4e6   : > { %v2080_v32 = vadd.f32 %v2072_v33, %v1976_v6  ;;  %v2332_v33 = vrot.slane %v5343_v18, 1  ;;  %v5346_v6 = vld [vmem:[#allocation52_spill] sm:$0xff] }
 0x4e7   : > { %v2599_v29 = vadd.f32 %v2591_v9, %v2511_v62  ;;  %v2598_v11 = vadd.f32 %v2590_v44, %v2510_v34  ;;  %v2093_v46 = vpop.permute.xlu1 %2092  ;;  %v4927_v22 = vpop.permute.xlu0 %2198  ;;  %v5339_v34 = vld [vmem:[#allocation5_spill] sm:$0xff] }
 0x4e8   : > { %v2112_v26 = vrot.slane %v2093_v46, 1  ;;  %v2217_v13 = vrot.slane %v4927_v22, 7 }
 0x4e9   : > { %v2679_v30 = vadd.f32 %v2671_v35, %v2599_v29  ;;  %v2678_v16 = vadd.f32 %v2670_v41, %v2598_v11  ;;  %v1972_v41 = vmul.f32 %v5339_v34, %v4684_v21  ;;  %v5340_v35 = vld [vmem:[#allocation18_spill] sm:$0xff]  ;;  %v5342_v11 = vld [vmem:[#allocation39_spill] sm:$0xff] }
 0x4ea   : > { %v2118_v50 = vsel %vm1099_vm9, %v2112_v26, %v2113_v20  ;;  %v2119_v39 = vsel %vm1099_vm9, %v2111_v48, %v2112_v26  ;;  %v5341_v29 = vrot.slane %v5340_v35, 1  ;;  %v5358_v35 = vld [vmem:[#allocation17_spill] sm:$0xff] }
 0x4eb   : > { %v2695_v5 = vadd.f32 %v4896_v27, %v2679_v30  ;;  %v2694_v38 = vadd.f32 %v4896_v27, %v2678_v16  ;;  %v2176_v52 = vmul.f32 %v4651_v8, %v2119_v39  ;;  %v2177_v36 = vmul.f32 %v4649_v37, %v2118_v50  ;;  %v2197_v61 = vpop.permute.xlu1 %2196  ;;  %v2007_v53 = vpop.permute.xlu0 %2006  ;;  %v5344_v30 = vld [vmem:[#allocation21_spill] sm:$0xff]  ;;  %v5347_v39 = vld [vmem:[#allocation36_spill] sm:$0xff] }
 0x4ec   : > { %v2216_v59 = vrot.slane %v2197_v61, 7  ;;  %v2074_v16 = vmul.f32 %v5344_v30, %v2007_v53  ;;  %v1978_v50 = vmul.f32 %v5346_v6, %v5345_v43  ;;  %v2346_v53 = vsel %vm1099_vm9, %v2332_v33, %v2333_v25  ;;  %v5363_v43 = vld [vmem:[#allocation20_spill] sm:$0xff] }
 0x4ed   : > { %v2703_v2 = vmax.f32 %v2695_v5, 0.0  ;;  %v2702_v56 = vmax.f32 %v2694_v38, 0.0  ;;  %v2184_v37 = vadd.f32 %v2176_v52, %v2080_v32  ;;  %v2185_v8 = vadd.f32 %v2177_v36, %v2081_v57  ;;  %v5348_v5 = vld [vmem:[#allocation13_spill] sm:$0xff]  ;;  %v5349_v52 = vld [vmem:[#allocation4_spill] sm:$0xff] }
 0x4ee   : > { %v2222_v48 = vsel %vm897_vm8, %v2216_v59, %v2217_v13  ;;  %v2223_v19 = vsel %vm897_vm8, %v2215_v28, %v2216_v59  ;;  %v1979_v38 = vmul.f32 %v5348_v5, %v5347_v39  ;;  %v5350_v36 = vld [vmem:[#allocation57_spill] sm:$0xff]  ;;  %v5351_v59 = vld [vmem:[#allocation38_spill] sm:$0xff]  ;;  %v5352_v32 = vrot.slane %v4818_v42, 7  ;;  %v5364_v5 = vld [vmem:[#allocation48_spill] sm:$0xff] }
 0x4ef   : > { %2711 = vst.msk [vmem:[#allocation2 + $0x18] sm:$0xff] %vm401_vm1, %v2703_v2  ;;  %2710 = vst.msk [vmem:[#allocation2 + $0x10] sm:$0xff] %vm401_vm1, %v2702_v56  ;;  %v2280_v47 = vmul.f32 %v4714_v0, %v2223_v19  ;;  %v2281_v17 = vmul.f32 %v4712_v3, %v2222_v48  ;;  %v4956_v60 = vpop.permute.xlu0 %2422  ;;  %v4958_v63 = vpop.permute.xlu1 %2318  ;;  %v2436_v61 = vrot.slane %v5350_v36, 7  ;;  %v5353_v48 = vld [vmem:[#allocation15_spill] sm:$0xff]  ;;  %v2082_v55 = vadd.f32 %v2074_v16, %v1978_v50  ;;  %v5379_v36 = vld [vmem:[#allocation53_spill] sm:$0xff] }
 0x4f0   : > { %v2441_v50 = vrot.slane %v4956_v60, 7 }
 0x4f1   : > { %v2288_v40 = vadd.f32 %v2280_v47, %v2184_v37  ;;  %v2289_v14 = vadd.f32 %v2281_v17, %v2185_v8  ;;  %v5354_v8 = vld [vmem:[#allocation6_spill] sm:$0xff]  ;;  %v2450_v42 = vsel %vm897_vm8, %v2436_v61, %v2437_v23  ;;  %v5359_v23 = vld [vmem:[#allocation7_spill] sm:$0xff] }
 0x4f3   : > { %v4960_v12 = vpop.permute.xlu0 %2320  ;;  %v4963_v28 = vadd.f32 %v2288_v40, %v4619_v54  ;;  %v4966_v10 = vadd.f32 %v2289_v14, %v4629_v31  ;;  %v2097_v45 = vpop.permute.xlu1 %2096  ;;  %v5355_v14 = vld [vmem:[#allocation8_spill] sm:$0xff] }
 0x4f4   : > { %v2114_v0 = vrot.slane %v2097_v45, 1  ;;  %v2396_v45 = vmul.f32 %v5355_v14, %v2346_v53  ;;  %v5370_v14 = vld [vmem:[#allocation10_spill] sm:$0xff] }
 0x4f6   : > { %v2117_v31 = vsel %vm1099_vm9, %v2113_v20, %v2114_v0 }
 0x4f7   : > { %v2099_v51 = vpop.permute.xlu0 %2098  ;;  %v2009_v3 = vpop.permute.xlu1 %2008  ;;  %v2178_v57 = vmul.f32 %v5351_v59, %v2117_v31  ;;  %v2500_v31 = vmul.f32 %v5359_v23, %v2450_v42 }
 0x4f8   : > { %v2115_v44 = vrot.slane %v2099_v51, 1  ;;  %v2075_v46 = vmul.f32 %v5342_v11, %v2009_v3  ;;  %v2337_v51 = vrot.slane %v4958_v63, 1 }
 0x4fa   : > { %v2123_v54 = vsel %vm1099_vm9, %v2115_v44, %v5341_v29  ;;  %v2083_v56 = vadd.f32 %v2075_v46, %v1979_v38  ;;  %v5365_v38 = vld [vmem:[#allocation11_spill] sm:$0xff] }
 0x4fb   : > { %v2011_v62 = vpop.permute.xlu0 %2010  ;;  %v2172_v20 = vmul.f32 %v5349_v52, %v2123_v54  ;;  %v5016_v54 = vpop.permute.xlu1 %2424  ;;  %v2668_v52 = vmul.f32 %v5365_v38, %v5364_v5  ;;  %v2726_v38 = vld [vmem:[%s3739_s21 + $0x10] sm:$0xff] }
 0x4fc   : > { %v2068_v9 = vmul.f32 %v4509_v49, %v2011_v62  ;;  %v2116_v49 = vsel %vm1099_vm9, %v2114_v0, %v2115_v44  ;;  %v2186_v44 = vadd.f32 %v2178_v57, %v2082_v55  ;;  %v2446_v57 = vsel %vm897_vm8, %v2440_v1, %v2441_v50 }
 0x4fd   : > { %v2179_v19 = vmul.f32 %v5353_v48, %v2116_v49  ;;  %v5362_v49 = vld [vmem:[#allocation50_spill] sm:$0xff]  ;;  %v2442_v60 = vrot.slane %v5016_v54, 7 }
 0x4fe   : > { %v2076_v22 = vadd.f32 %v2068_v9, %v1972_v41  ;;  %v5356_v9 = vld [vmem:[#allocation9_spill] sm:$0xff]  ;;  %v5357_v41 = vld [vmem:[#allocation16_spill] sm:$0xff]  ;;  %v5367_v48 = vld [vmem:[#allocation14_spill] sm:$0xff] }
 0x4ff   : > { %v2203_v26 = vpop.permute.xlu0 %2202  ;;  %v2187_v3 = vadd.f32 %v2179_v19, %v2083_v56  ;;  %v2504_v19 = vmul.f32 %v5367_v48, %v2446_v57  ;;  %v2445_v1 = vsel %vm897_vm8, %v2441_v50, %v2442_v60  ;;  %v5378_v48 = vmov 0.0|0.0  }
 0x500   : > { %v2219_v21 = vrot.slane %v2203_v26, 7  ;;  %v2180_v37 = vadd.f32 %v2172_v20, %v2076_v22  ;;  %v2342_v22 = vsel %vm1099_vm9, %v2336_v15, %v2337_v51  ;;  %v5361_v26 = vld [vmem:[#allocation32_spill] sm:$0xff]  ;;  %v2338_v15 = vrot.slane %v4960_v12, 1 }
 0x501   : > { %v2400_v20 = vmul.f32 %v5366_v58, %v2342_v22  ;;  %v5373_v22 = vld [vmem:[#allocation19_spill] sm:$0xff] }
 0x502   : > { %v2227_v2 = vsel %vm897_vm8, %v2219_v21, %v5352_v32 }
 0x503   : > { %v2276_v47 = vmul.f32 %v5354_v8, %v2227_v2  ;;  %v2201_v17 = vpop.permute.xlu0 %2200  ;;  %v2408_v56 = vadd.f32 %v2400_v20, %v4963_v28  ;;  %v2718_v20 = vld [vmem:[#allocation2 + $0x10] sm:$0xff] }
 0x504   : > { %v2218_v40 = vrot.slane %v2201_v17, 7  ;;  %v5368_v17 = vld [vmem:[#allocation46_spill] sm:$0xff] }
 0x505   : > { %v2284_v25 = vadd.f32 %v2276_v47, %v2180_v37  ;;  %v2341_v37 = vsel %vm1099_vm9, %v2337_v51, %v2338_v15  ;;  %v2512_v47 = vadd.f32 %v2504_v19, %v2408_v56  ;;  %v5372_v51 = vld [vmem:[#allocation51_spill] sm:$0xff]  ;;  %v2734_v19 = vmul.f32 %v2726_v38, %v2718_v20 }
 0x506   : > { %v2220_v0 = vsel %vm897_vm8, %v2218_v40, %v2219_v21  ;;  %v2221_v62 = vsel %vm897_vm8, %v2217_v13, %v2218_v40  ;;  %v5360_v13 = vld [vmem:[#allocation40_spill] sm:$0xff]  ;;  %v5369_v40 = vld [vmem:[#allocation49_spill] sm:$0xff] }
 0x507   : > { %v2292_v34 = vadd.f32 %v2284_v25, %v5356_v9  ;;  %v2282_v7 = vmul.f32 %v5357_v41, %v2221_v62  ;;  %v2283_v29 = vmul.f32 %v5358_v35, %v2220_v0  ;;  %v2588_v30 = vmul.f32 %v5361_v26, %v5360_v13  ;;  %v2717_v9 = vld [vmem:[#allocation2 + $0x8] sm:$0xff] }
 0x508   : > { %v2401_v28 = vmul.f32 %v5369_v40, %v2341_v37 }
 0x509   : > { %v2404_v11 = vadd.f32 %v2396_v45, %v2292_v34  ;;  %v2290_v63 = vadd.f32 %v2282_v7, %v2186_v44  ;;  %v2291_v46 = vadd.f32 %v2283_v29, %v2187_v3  ;;  %v5371_v45 = vld [vmem:[#allocation22_spill] sm:$0xff]  ;;  %v2505_v44 = vmul.f32 %v5372_v51, %v2445_v1  ;;  %v2725_v34 = vld [vmem:[%s3739_s21 + $0x8] sm:$0xff]  ;;  %v2724_v7 = vld [vmem:[%s3739_s21] sm:$0xff] }
 0x50a   : > { %v2672_v42 = vmul.f32 %v5371_v45, %v5370_v14  ;;  %v2409_v41 = vadd.f32 %v2401_v28, %v4966_v10  ;;  %v5376_v10 = vld [vmem:[#allocation54_spill] sm:$0xff] }
 0x50b   : > { %v2508_v16 = vadd.f32 %v2500_v31, %v2404_v11  ;;  %v2299_v21 = vadd.f32 %v2291_v46, %v5362_v49  ;;  %v5027_v6 = vadd.f32 %v2290_v63, %v5363_v43  ;;  %v2733_v11 = vmul.f32 %v2725_v34, %v2717_v9  ;;  %v5380_v34 = vld [vmem:[#allocation47_spill] sm:$0xff] }
 0x50c   : > { %v5030_v39 = vpop.permute.xlu1 %2388  ;;  %v2513_v54 = vadd.f32 %v2505_v44, %v2409_v41  ;;  %v2729_v44 = vld [vmem:[%s3739_s21 + $0x28] sm:$0xff] }
 0x50d   : > { %v2596_v53 = vadd.f32 %v2588_v30, %v2508_v16  ;;  %v5377_v16 = vld [vmem:[#allocation25_spill] sm:$0xff] }
 0x50e   : > { %v2673_v49 = vmul.f32 %v5377_v16, %v5376_v10 }
 0x50f   : > { %v2676_v59 = vadd.f32 %v2668_v52, %v2596_v53  ;;  %v2719_v53 = vld [vmem:[#allocation2 + $0x18] sm:$0xff] }
 0x510   : > { %v5040_v32 = vpop.permute.xlu1 %2492 }
 0x511   : > { %v2692_v2 = vadd.f32 %v4896_v27, %v2676_v59  ;;  %v2727_v59 = vld [vmem:[%s3739_s21 + $0x18] sm:$0xff] }
 0x513   : > { %v2700_v12 = vmax.f32 %v2692_v2, 0.0 }
 0x514   : > { %v2527_v8 = vpop.permute.xlu1 %2526  ;;  %v2394_v24 = vpop.permute.xlu0 %2393 }
 0x515   : > { %2708 = vst.msk [vmem:[#allocation2] sm:$0xff] %vm401_vm1, %v2700_v12  ;;  %v2592_v55 = vmul.f32 %v5368_v17, %v2527_v8 }
 0x517   : > { %v2600_v25 = vadd.f32 %v2592_v55, %v2512_v47 }
 0x518   : > { %v2586_v0 = vpop.permute.xlu1 %2585  ;;  %v2498_v62 = vpop.permute.xlu0 %2497 }
 0x519   : > { %v2680_v3 = vadd.f32 %v2672_v42, %v2600_v25 }
 0x51b   : > { %v2696_v35 = vadd.f32 %v4896_v27, %v2680_v3 }
 0x51c   : > { %v2323_v29 = vpop.permute.xlu1 %2322  ;;  %v2529_v23 = vpop.permute.xlu0 %2528  ;;  %v2716_v31 = vld [vmem:[#allocation2] sm:$0xff] }
 0x51d   : > { %v2704_v63 = vmax.f32 %v2696_v35, 0.0  ;;  %v2339_v46 = vrot.slane %v2323_v29, 1  ;;  %v2593_v13 = vmul.f32 %v5373_v22, %v2529_v23  ;;  %v2732_v26 = vmul.f32 %v2724_v7, %v2716_v31  ;;  %v2731_v22 = vld [vmem:[%s3739_s21 + $0x38] sm:$0xff] }
 0x51f   : > { %2712 = vst.msk [vmem:[#allocation2 + $0x20] sm:$0xff] %vm401_vm1, %v2704_v63  ;;  %v2347_v43 = vsel %vm1099_vm9, %v2339_v46, %v2332_v33  ;;  %v2601_v50 = vadd.f32 %v2593_v13, %v2513_v54  ;;  %v3188_v5 = vpack.c.bf16 %v2733_v11, %v2732_v26  ;;  %v2735_v33 = vmul.f32 %v2727_v59, %v2719_v53 }
 0x520   : > { %v2403_v52 = vmul.f32 %v2394_v24, %v2347_v43  ;;  %v2581_v58 = vpop.permute.xlu0 %2580  ;;  %v2661_v2 = vpop.permute.xlu1 %2660  ;;  %v2340_v37 = vsel %vm1099_vm9, %v2338_v15, %v2339_v46  ;;  %v2730_v46 = vld [vmem:[%s3739_s21 + $0x30] sm:$0xff] }
 0x521   : > { %v2681_v57 = vadd.f32 %v2673_v49, %v2601_v50  ;;  %3190 = vmatpush3.bf16.xpose.msk.msra.mxu0 %vm5063_vm11, %v3188_v5  ;;  %v2402_v1 = vmul.f32 %v5030_v39, %v2340_v37  ;;  %v3192_v55 = vpack.c.bf16 %v2735_v33, %v2734_v19  ;;  %v2674_v41 = vmul.f32 %v2661_v2, %v5380_v34 }
 0x522   : > { %v2411_v56 = vadd.f32 %v2403_v52, %v2299_v21  ;;  %3191 = vmatprep.subr.bf16.mxu0 %v5378_v48  ;;  %v2749_v49 = vsub.s32 0, %v3356_v4 }
 0x523   : > { %v2697_v18 = vadd.f32 %v4896_v27, %v2681_v57 }
 0x524   : > { %v2427_v12 = vpop.permute.xlu0 %2426  ;;  %v2517_v47 = vpop.permute.xlu1 %2516 }
 0x525   : > { %v2705_v8 = vmax.f32 %v2697_v18, 0.0  ;;  %v2443_v24 = vrot.slane %v2427_v12, 7  ;;  %v2595_v39 = vmul.f32 %v2586_v0, %v2517_v47 }
 0x526   : > { %v2720_v51 = vld [vmem:[#allocation2 + $0x20] sm:$0xff] }
 0x527   : > { %2713 = vst.msk [vmem:[#allocation2 + $0x28] sm:$0xff] %vm401_vm1, %v2705_v8  ;;  %v2444_v21 = vsel %vm897_vm8, %v2442_v60, %v2443_v24  ;;  %v2451_v17 = vsel %vm897_vm8, %v2443_v24, %v2436_v61  ;;  %v2410_v60 = vadd.f32 %v2402_v1, %v5027_v6  ;;  %v2728_v61 = vld [vmem:[%s3739_s21 + $0x20] sm:$0xff]  ;;  %s388_s21 = scalar_lea.vmem %s5132_s10, %s5382_s16 }
 0x528   : > { %v2507_v15 = vmul.f32 %v2498_v62, %v2451_v17  ;;  %v2666_v40 = vpop.permute.xlu0 %2665  ;;  %v2506_v28 = vmul.f32 %v5040_v32, %v2444_v21  ;;  %v2736_v7 = vmul.f32 %v2728_v61, %v2720_v51  ;;  %v2745_v43 = vpop.permute.xlu1 %2744 }
 0x529   : > { %3194 = vmatpush3.bf16.xpose.msk.msra.mxu0 %vm5063_vm11, %v3192_v55  ;;  %v2675_v42 = vmul.f32 %v2666_v40, %v5379_v36  ;;  %v2750_v50 = vrot.slane %v2745_v43, %v2749_v49 }
 0x52a   : > { %v2515_v14 = vadd.f32 %v2507_v15, %v2411_v56  ;;  %3195 = vmatprep.subr.bf16.mxu0 %v5378_v48  ;;  %v2514_v62 = vadd.f32 %v2506_v28, %v2410_v60 }
 0x52c   : > { %v2603_v45 = vadd.f32 %v2595_v39, %v2515_v14  ;;  %v2531_v25 = vpop.permute.xlu0 %2530 }
 0x52d   : > { %v2594_v3 = vmul.f32 %v2581_v58, %v2531_v25 }
 0x52e   : > { %v2683_v9 = vadd.f32 %v2675_v42, %v2603_v45  ;;  %v2721_v32 = vld [vmem:[#allocation2 + $0x28] sm:$0xff] }
 0x52f   : > { %v2602_v0 = vadd.f32 %v2594_v3, %v2514_v62  ;;  %v2737_v35 = vmul.f32 %v2729_v44, %v2721_v32 }
 0x530   : > { %v2699_v6 = vadd.f32 %v4896_v27, %v2683_v9 }
 0x531   : > { %v2682_v29 = vadd.f32 %v2674_v41, %v2602_v0  ;;  %v3196_v54 = vpack.c.bf16 %v2737_v35, %v2736_v7 }
 0x532   : > { %v2707_v23 = vmax.f32 %v2699_v6, 0.0 }
 0x533   : > { %v2698_v31 = vadd.f32 %v4896_v27, %v2682_v29  ;;  %3198 = vmatpush3.bf16.xpose.msk.msra.mxu0 %vm5063_vm11, %v3196_v54  ;;  %v2740_v27 = vld [vmem:[%s5130_s8] sm:$0x1] }
 0x534   : > { %2715 = vst.msk [vmem:[#allocation2 + $0x38] sm:$0xff] %vm401_vm1, %v2707_v23  ;;  %3199 = vmatprep.subr.bf16.mxu0 %v5378_v48 }
 0x535   : > { %v2706_v11 = vmax.f32 %v2698_v31, 0.0 }
 0x537   : > { %2714 = vst.msk [vmem:[#allocation2 + $0x30] sm:$0xff] %vm401_vm1, %v2706_v11 }
 0x53b   : > { %v2723_v63 = vld [vmem:[#allocation2 + $0x38] sm:$0xff] }
 0x53c   : > { %v2739_v10 = vmul.f32 %v2731_v22, %v2723_v63 }
 0x53e   : > { %v2722_v13 = vld [vmem:[#allocation2 + $0x30] sm:$0xff] }
 0x53f   : > { %v2738_v26 = vmul.f32 %v2730_v46, %v2722_v13 }
 0x541   : > { %v3200_v16 = vpack.c.bf16 %v2739_v10, %v2738_v26 }
 0x543   : > { %3202 = vmatpush3.bf16.xpose.msk.msra.mxu0 %vm5063_vm11, %v3200_v16 }
 0x54a   : > { %3185 = vmatmul.mubr.msk.f32.vlgmr.msra.gmra.mrb[28].mxu0 %vm401_vm1, %v2740_v27 }
 0x61d   : > { %v2844_v5 = vpop.f32.mrb[28].mxu0 }
 0x61e   : > { %v2845_v38 = vadd.f32 %v2844_v5, %v2750_v50  ;;  %v3186_v52 = vpop.f32.mrb[29].mxu0 }
 0x620   : > { %2849 = vst.msk [vmem:[%s388_s21] sm:$0x1] %vm2848_vm12, %v2845_v38 }
 0x621 PF: > { %s22_s15 = sadd.s32 1, %s3273_s15  }
 0x622   : > { %p19_p4 = scmp.ge.s32.totalorder %s22_s15, 4  }
 0x624   :  { %21 = sbr.rel (!%p19_p4) target bundleno = 3 (0x3), region = 105 }

</bundles_post_ra>
